<compile_context>
chip_gen: v6e
topology: v6e:2x2x1
jax: 0.10.0
libtpu: 0.0.40
codegen_flags: <defaults>
</compile_context>

<pallas_src>
import functools

import jax
import jax.numpy as jnp
from jax.experimental import pallas as pl
from jax.experimental.pallas import tpu as pltpu

HIDDEN = 16
INPUT = 1
_UNROLL = 8          # perf item 7: cap the recurrence unroll
_MXU_MIN_BATCH = 32  # perf item 2: below this batch-chunk use the VPU matvec


def _rnn_net_kernel(use_mxu, s_chunk,
                    x_ref,      # (Bc, Sc)     f32  batch-major input chunk (squeezed feature dim)
                    h0_ref,     # (1, Bc, H)   f32  initial hidden state (nn.RNN layout)
                    wcols_ref,  # (H, H, Bc)   f32  wcols[i, j, b] = W_hh[j, i]  (lane-broadcast cols)
                    whh_ref,    # (H, H)       f32  W_hh (natural layout, MXU path only)
                    wihb_ref,   # (H, Bc)      f32  W_ih[:, 0] broadcast over batch lanes
                    biasb_ref,  # (H, Bc)      f32  (b_ih + b_hh) broadcast over batch lanes
                    wlinb_ref,  # (H, Bc)      f32  linear.weight broadcast over batch lanes
                    blin_ref,   # (1, 1)       f32  linear.bias
                    y_ref,      # (Bc, Sc)     f32  per-step linear output (lane-dense in S)
                    hN_ref,     # (1, Bc, H)   f32  final hidden state
                    hc_ref,     # (H, Bc)      f32  scratch: hidden carried across S-chunks
                    xt_ref,     # (Sc, Bc)     f32  scratch: time-major x chunk
                    ysb_ref):   # (Sc, Bc)     f32  scratch: time-major projected outputs
    H = HIDDEN
    si = pl.program_id(1)

    # Initialize the carried hidden state once per batch chunk (item 5: the
    # hidden state lives in a persistent VMEM scratch across the S-chunk axis).
    @pl.when(si == 0)
    def _init():
        hc_ref[...] = h0_ref[0].T                       # (Bc, H) -> (H, Bc)

    # Item 8: batch-major -> time-major with one bulk in-VMEM transpose per
    # chunk instead of an XLA-side HBM transpose of the whole x.
    xt_ref[...] = x_ref[...].T                          # (Sc, Bc)

    # Loop-invariant operands hoisted out of the recurrence.
    wihb = wihb_ref[...]
    biasb = biasb_ref[...]
    wlinb = wlinb_ref[...]
    whh = whh_ref[...]

    def step(s, h):                                     # h: (H, Bc)
        # Item 4: per-step input transform (one VPU mul+add, co-issues under
        # the serial chain; no (S,B,H) scratch).
        xs = xt_ref[pl.ds(s, 1), :]                     # (1, Bc) dynamic row read
        pre = wihb * xs + biasb                         # (H, Bc)

        if use_mxu:
            # Large batch chunk: single MXU pass (W_hh is loop-invariant; the
            # compiler can keep the weights resident across steps).
            hw = jnp.dot(whh, h, preferred_element_type=jnp.float32)
        else:
            # Item 2: VPU matvec — 16 FMAs against pre-broadcast W_hh columns,
            # only cheap sublane broadcasts of h rows on the critical path.
            terms = [wcols_ref[i] * h[i:i + 1, :] for i in range(H)]
            while len(terms) > 1:                       # balanced add tree
                nxt = [terms[j] + terms[j + 1] for j in range(0, len(terms) - 1, 2)]
                if len(terms) % 2:
                    nxt.append(terms[-1])
                terms = nxt
            hw = terms[0]                               # (H, Bc)

        h_new = jnp.tanh(pre + hw)                      # (H, Bc)

        # Item 9: projection interleaved with the recurrence (off the critical
        # path): one sublane reduce + one row store per step.
        yrow = jnp.sum(wlinb * h_new, axis=0, keepdims=True)   # (1, Bc)
        ysb_ref[pl.ds(s, 1), :] = yrow
        return h_new

    # Item 7: bounded unroll instead of full unroll (keeps IMEM/compile time
    # in check for long sequences while still hiding loads under the chain).
    h_final = jax.lax.fori_loop(0, s_chunk, step, hc_ref[...],
                                unroll=min(_UNROLL, s_chunk))
    hc_ref[...] = h_final

    @pl.when(si == pl.num_programs(1) - 1)
    def _finalize():
        hN_ref[0] = h_final.T                           # (H, Bc) -> (Bc, H)

    # One lane-dense (Bc, Sc) store per chunk; write-back overlaps the next
    # chunk's recurrence via the Pallas pipeline.
    y_ref[...] = ysb_ref[...].T + blin_ref[...]


def _pick_chunk(total, max_chunk, align):
    """Largest chunk <= max_chunk that divides `total` and is either == total
    or a multiple of `align` (the (8,128) block rule)."""
    if total <= max_chunk:
        return total
    c = (max_chunk // align) * align
    while c >= align:
        if total % c == 0:
            return c
        c -= align
    return total


def net_forward(x, hidden_prev, params):
    """Pallas implementation of Net.forward.

    x:           (B, S, 1) float32  (batch_first, like the PyTorch module)
    hidden_prev: (1, B, H) float32
    returns:     out (1, B*S, 1), hidden (1, B, H)
    """
    B, S, F = x.shape
    H = HIDDEN
    assert F == INPUT == 1, "input transform broadcast trick requires input_size == 1"

    # Items 5/6: chunk the batch (parallel across v7x's 2 TCs) and the sequence
    # (bounded VMEM for long S); for the toy sizes both chunks == full axes.
    b_chunk = _pick_chunk(B, 128, 8)
    s_chunk = _pick_chunk(S, 512, 128)
    use_mxu = b_chunk >= _MXU_MIN_BATCH

    x2 = x.reshape(B, S).astype(jnp.float32)            # contiguous, free
    h0 = hidden_prev.astype(jnp.float32)                # (1, B, H)

    whh = params["w_hh"].astype(jnp.float32)                                   # (H, H)
    wcols = jnp.broadcast_to(whh.T[:, :, None], (H, H, b_chunk))               # wcols[i,j,b]=Whh[j,i]
    wih_v = params["w_ih"].astype(jnp.float32).reshape(H)                      # (H,)
    bias_v = (params["b_ih"] + params["b_hh"]).astype(jnp.float32).reshape(H)  # (H,)
    wlin_v = params["w_lin"].astype(jnp.float32).reshape(H)                    # (H,)
    wihb = jnp.broadcast_to(wih_v[:, None], (H, b_chunk))
    biasb = jnp.broadcast_to(bias_v[:, None], (H, b_chunk))
    wlinb = jnp.broadcast_to(wlin_v[:, None], (H, b_chunk))
    blin = params["b_lin"].astype(jnp.float32).reshape(1, 1)

    grid = (B // b_chunk, S // s_chunk)
    kernel = functools.partial(_rnn_net_kernel, use_mxu, s_chunk)

    y, hN = pl.pallas_call(
        kernel,
        out_shape=(jax.ShapeDtypeStruct((B, S), jnp.float32),
                   jax.ShapeDtypeStruct((1, B, H), jnp.float32)),
        grid_spec=pltpu.PrefetchScalarGridSpec(
            num_scalar_prefetch=0,
            grid=grid,
            in_specs=[
                pl.BlockSpec((b_chunk, s_chunk), lambda bi, si: (bi, si)),   # x
                pl.BlockSpec((1, b_chunk, H), lambda bi, si: (0, bi, 0)),    # h0
                pl.BlockSpec((H, H, b_chunk), lambda bi, si: (0, 0, 0)),     # wcols
                pl.BlockSpec((H, H), lambda bi, si: (0, 0)),                 # whh
                pl.BlockSpec((H, b_chunk), lambda bi, si: (0, 0)),           # wihb
                pl.BlockSpec((H, b_chunk), lambda bi, si: (0, 0)),           # biasb
                pl.BlockSpec((H, b_chunk), lambda bi, si: (0, 0)),           # wlinb
                pl.BlockSpec((1, 1), lambda bi, si: (0, 0)),                 # blin
            ],
            out_specs=[
                pl.BlockSpec((b_chunk, s_chunk), lambda bi, si: (bi, si)),   # y
                pl.BlockSpec((1, b_chunk, H), lambda bi, si: (0, bi, 0)),    # hN
            ],
            scratch_shapes=[
                pltpu.VMEM((H, b_chunk), jnp.float32),        # carried hidden state
                pltpu.VMEM((s_chunk, b_chunk), jnp.float32),  # time-major x chunk
                pltpu.VMEM((s_chunk, b_chunk), jnp.float32),  # time-major y chunk
            ],
        ),
        compiler_params=pltpu.CompilerParams(
            dimension_semantics=("parallel", "arbitrary"),   # item 6 / item 5
            vmem_limit_bytes=32 * 1024 * 1024,               # item 5: explicit scoped limit
        ),
    )(x2, h0, wcols, whh, wihb, biasb, wlinb, blin)

    # (B, S) is batch-major, so a contiguous reshape reproduces PyTorch's
    # out.view(-1, 16) -> Linear -> unsqueeze(0) ordering exactly.
    out = y.reshape(1, B * S, 1)
    return out, hN


def init_params(key):
    """Deterministic init mirroring nn.RNN / nn.Linear shapes (uniform +-1/sqrt(H))."""
    k = 1.0 / jnp.sqrt(jnp.float32(HIDDEN))
    keys = jax.random.split(key, 6)
    u = lambda kk, shape: jax.random.uniform(kk, shape, jnp.float32, -k, k)
    return {
        "w_ih": u(keys[0], (HIDDEN, INPUT)),   # weight_ih_l0
        "w_hh": u(keys[1], (HIDDEN, HIDDEN)),  # weight_hh_l0
        "b_ih": u(keys[2], (HIDDEN,)),         # bias_ih_l0
        "b_hh": u(keys[3], (HIDDEN,)),         # bias_hh_l0
        "w_lin": u(keys[4], (1, HIDDEN)),      # linear.weight
        "b_lin": u(keys[5], (1,)),             # linear.bias
    }


def _reference_forward(x, hidden_prev, params):
    """Pure-JAX reference of the PyTorch forward (silent sanity check)."""
    B, S, _ = x.shape
    h = hidden_prev[0]
    outs = []
    for s in range(S):
        h = jnp.tanh(x[:, s, :] @ params["w_ih"].T + params["b_ih"]
                     + h @ params["w_hh"].T + params["b_hh"])
        outs.append(h)
    rnn_out = jnp.stack(outs, axis=1)                       # (B, S, H)
    flat = rnn_out.reshape(-1, HIDDEN)                      # (B*S, H)
    y = flat @ params["w_lin"].T + params["b_lin"]          # (B*S, 1)
    return y[None], h[None]


if __name__ == "__main__":
    B, S = 2, 8
    key = jax.random.PRNGKey(0)
    kx, kh, kp = jax.random.split(key, 3)

    x = jax.random.normal(kx, (B, S, INPUT), jnp.float32)
    hidden_prev = jax.random.normal(kh, (1, B, HIDDEN), jnp.float32)
    params = init_params(kp)

    fwd = jax.jit(net_forward)
    out, hidden = jax.block_until_ready(fwd(x, hidden_prev, params))

    ref_out, ref_hidden = _reference_forward(x, hidden_prev, params)
    assert out.shape == (1, B * S, 1) and hidden.shape == (1, B, HIDDEN)
    assert jnp.allclose(out, ref_out, atol=1e-4, rtol=1e-4)
    assert jnp.allclose(hidden, ref_hidden, atol=1e-4, rtol=1e-4)

    print("KERNEL_OK")
</pallas_src>

<mosaic_0001>
module attributes {stable_mosaic.version = 11 : i64} {
  func.func @_rnn_net_kernel(%arg0: i32, %arg1: i32, %arg2: memref<2x8xf32, #tpu.memory_space<vmem>>, %arg3: memref<1x2x16xf32, #tpu.memory_space<vmem>>, %arg4: memref<16x16x2xf32, #tpu.memory_space<vmem>>, %arg5: memref<16x16xf32, #tpu.memory_space<vmem>>, %arg6: memref<16x2xf32, #tpu.memory_space<vmem>>, %arg7: memref<16x2xf32, #tpu.memory_space<vmem>>, %arg8: memref<16x2xf32, #tpu.memory_space<vmem>>, %arg9: memref<1x1xf32, #tpu.memory_space<vmem>>, %arg10: memref<2x8xf32, #tpu.memory_space<vmem>>, %arg11: memref<1x2x16xf32, #tpu.memory_space<vmem>>, %arg12: memref<16x2xf32, #tpu.memory_space<vmem>>, %arg13: memref<8x2xf32, #tpu.memory_space<vmem>>, %arg14: memref<8x2xf32, #tpu.memory_space<vmem>>) attributes {dimension_semantics = [#tpu.dimension_semantics<parallel>, #tpu.dimension_semantics<arbitrary>], iteration_bounds = array<i64: 1, 1>, scalar_prefetch = 0 : i64, scratch_operands = 3 : i64, tpu.core_type = #tpu.core_type<tc>, window_params = [{transform_indices = @transform_0, window_bounds = array<i64: 2, 8>}, {transform_indices = @transform_1, window_bounds = array<i64: 1, 2, 16>}, {pipeline_mode = #tpu.pipeline_mode<synchronous>, transform_indices = @transform_2, window_bounds = array<i64: 16, 16, 2>}, {pipeline_mode = #tpu.pipeline_mode<synchronous>, transform_indices = @transform_3, window_bounds = array<i64: 16, 16>}, {pipeline_mode = #tpu.pipeline_mode<synchronous>, transform_indices = @transform_4, window_bounds = array<i64: 16, 2>}, {pipeline_mode = #tpu.pipeline_mode<synchronous>, transform_indices = @transform_5, window_bounds = array<i64: 16, 2>}, {pipeline_mode = #tpu.pipeline_mode<synchronous>, transform_indices = @transform_6, window_bounds = array<i64: 16, 2>}, {pipeline_mode = #tpu.pipeline_mode<synchronous>, transform_indices = @transform_7, window_bounds = array<i64: 1, 1>}, {transform_indices = @transform_8, window_bounds = array<i64: 2, 8>}, {transform_indices = @transform_9, window_bounds = array<i64: 1, 2, 16>}]} {
    %c0_i32 = arith.constant 0 : i32
    %0 = arith.cmpi eq, %arg1, %c0_i32 : i32
    %1 = arith.extui %0 : i1 to i32
    %c0_i32_0 = arith.constant 0 : i32
    %2 = arith.cmpi ne, %1, %c0_i32_0 : i32
    scf.if %2 {
      %c0_415 = arith.constant 0 : index
      %c0_416 = arith.constant 0 : index
      %c0_417 = arith.constant 0 : index
      %876 = vector.load %arg3[%c0_415, %c0_416, %c0_417] : memref<1x2x16xf32, #tpu.memory_space<vmem>>, vector<1x2x16xf32>
      %877 = vector.shape_cast %876 : vector<1x2x16xf32> to vector<2x16xf32>
      %878 = tpu.transpose %877, [1, 0] : vector<2x16xf32> -> vector<16x2xf32>
      %c0_418 = arith.constant 0 : index
      %c0_419 = arith.constant 0 : index
      %879 = vector.load %arg12[%c0_418, %c0_419] : memref<16x2xf32, #tpu.memory_space<vmem>>, vector<16x2xf32>
      tpu.vector_store %arg12[%c0_418, %c0_419], %878 {strides = array<i32>} : memref<16x2xf32, #tpu.memory_space<vmem>>, vector<16x2xf32>,
    } else {
    }
    %c0 = arith.constant 0 : index
    %c0_1 = arith.constant 0 : index
    %3 = vector.load %arg2[%c0, %c0_1] : memref<2x8xf32, #tpu.memory_space<vmem>>, vector<2x8xf32>
    %4 = tpu.transpose %3, [1, 0] : vector<2x8xf32> -> vector<8x2xf32>
    %c0_2 = arith.constant 0 : index
    %c0_3 = arith.constant 0 : index
    %5 = vector.load %arg13[%c0_2, %c0_3] : memref<8x2xf32, #tpu.memory_space<vmem>>, vector<8x2xf32>
    tpu.vector_store %arg13[%c0_2, %c0_3], %4 {strides = array<i32>} : memref<8x2xf32, #tpu.memory_space<vmem>>, vector<8x2xf32>,
    %c0_4 = arith.constant 0 : index
    %c0_5 = arith.constant 0 : index
    %6 = vector.load %arg6[%c0_4, %c0_5] : memref<16x2xf32, #tpu.memory_space<vmem>>, vector<16x2xf32>
    %c0_6 = arith.constant 0 : index
    %c0_7 = arith.constant 0 : index
    %7 = vector.load %arg7[%c0_6, %c0_7] : memref<16x2xf32, #tpu.memory_space<vmem>>, vector<16x2xf32>
    %c0_8 = arith.constant 0 : index
    %c0_9 = arith.constant 0 : index
    %8 = vector.load %arg8[%c0_8, %c0_9] : memref<16x2xf32, #tpu.memory_space<vmem>>, vector<16x2xf32>
    %c0_10 = arith.constant 0 : index
    %c0_11 = arith.constant 0 : index
    %9 = vector.load %arg12[%c0_10, %c0_11] : memref<16x2xf32, #tpu.memory_space<vmem>>, vector<16x2xf32>
    %c0_i32_12 = arith.constant 0 : i32
    %10 = arith.index_cast %c0_i32_12 : i32 to index
    %c0_13 = arith.constant 0 : index
    %11 = vector.load %arg13[%10, %c0_13] : memref<8x2xf32, #tpu.memory_space<vmem>>, vector<1x2xf32>
    %12 = vector.broadcast %11 : vector<1x2xf32> to vector<16x2xf32>
    %13 = arith.mulf %6, %12 : vector<16x2xf32>
    %14 = arith.addf %13, %7 : vector<16x2xf32>
    %c0_14 = arith.constant 0 : index
    %c0_15 = arith.constant 0 : index
    %c0_16 = arith.constant 0 : index
    %15 = vector.load %arg4[%c0_14, %c0_15, %c0_16] : memref<16x16x2xf32, #tpu.memory_space<vmem>>, vector<1x16x2xf32>
    %16 = vector.shape_cast %15 : vector<1x16x2xf32> to vector<16x2xf32>
    %17 = vector.extract_strided_slice %9 {offsets = [0, 0], sizes = [1, 2], strides = [1, 1]} : vector<16x2xf32> to vector<1x2xf32>
    %18 = vector.broadcast %17 : vector<1x2xf32> to vector<16x2xf32>
    %19 = arith.mulf %16, %18 : vector<16x2xf32>
    %c1 = arith.constant 1 : index
    %c0_17 = arith.constant 0 : index
    %c0_18 = arith.constant 0 : index
    %20 = vector.load %arg4[%c1, %c0_17, %c0_18] : memref<16x16x2xf32, #tpu.memory_space<vmem>>, vector<1x16x2xf32>
    %21 = vector.shape_cast %20 : vector<1x16x2xf32> to vector<16x2xf32>
    %22 = vector.extract_strided_slice %9 {offsets = [1, 0], sizes = [1, 2], strides = [1, 1]} : vector<16x2xf32> to vector<1x2xf32>
    %23 = vector.broadcast %22 : vector<1x2xf32> to vector<16x2xf32>
    %24 = arith.mulf %21, %23 : vector<16x2xf32>
    %c2 = arith.constant 2 : index
    %c0_19 = arith.constant 0 : index
    %c0_20 = arith.constant 0 : index
    %25 = vector.load %arg4[%c2, %c0_19, %c0_20] : memref<16x16x2xf32, #tpu.memory_space<vmem>>, vector<1x16x2xf32>
    %26 = vector.shape_cast %25 : vector<1x16x2xf32> to vector<16x2xf32>
    %27 = vector.extract_strided_slice %9 {offsets = [2, 0], sizes = [1, 2], strides = [1, 1]} : vector<16x2xf32> to vector<1x2xf32>
    %28 = vector.broadcast %27 : vector<1x2xf32> to vector<16x2xf32>
    %29 = arith.mulf %26, %28 : vector<16x2xf32>
    %c3 = arith.constant 3 : index
    %c0_21 = arith.constant 0 : index
    %c0_22 = arith.constant 0 : index
    %30 = vector.load %arg4[%c3, %c0_21, %c0_22] : memref<16x16x2xf32, #tpu.memory_space<vmem>>, vector<1x16x2xf32>
    %31 = vector.shape_cast %30 : vector<1x16x2xf32> to vector<16x2xf32>
    %32 = vector.extract_strided_slice %9 {offsets = [3, 0], sizes = [1, 2], strides = [1, 1]} : vector<16x2xf32> to vector<1x2xf32>
    %33 = vector.broadcast %32 : vector<1x2xf32> to vector<16x2xf32>
    %34 = arith.mulf %31, %33 : vector<16x2xf32>
    %c4 = arith.constant 4 : index
    %c0_23 = arith.constant 0 : index
    %c0_24 = arith.constant 0 : index
    %35 = vector.load %arg4[%c4, %c0_23, %c0_24] : memref<16x16x2xf32, #tpu.memory_space<vmem>>, vector<1x16x2xf32>
    %36 = vector.shape_cast %35 : vector<1x16x2xf32> to vector<16x2xf32>
    %37 = vector.extract_strided_slice %9 {offsets = [4, 0], sizes = [1, 2], strides = [1, 1]} : vector<16x2xf32> to vector<1x2xf32>
    %38 = vector.broadcast %37 : vector<1x2xf32> to vector<16x2xf32>
    %39 = arith.mulf %36, %38 : vector<16x2xf32>
    %c5 = arith.constant 5 : index
    %c0_25 = arith.constant 0 : index
    %c0_26 = arith.constant 0 : index
    %40 = vector.load %arg4[%c5, %c0_25, %c0_26] : memref<16x16x2xf32, #tpu.memory_space<vmem>>, vector<1x16x2xf32>
    %41 = vector.shape_cast %40 : vector<1x16x2xf32> to vector<16x2xf32>
    %42 = vector.extract_strided_slice %9 {offsets = [5, 0], sizes = [1, 2], strides = [1, 1]} : vector<16x2xf32> to vector<1x2xf32>
    %43 = vector.broadcast %42 : vector<1x2xf32> to vector<16x2xf32>
    %44 = arith.mulf %41, %43 : vector<16x2xf32>
    %c6 = arith.constant 6 : index
    %c0_27 = arith.constant 0 : index
    %c0_28 = arith.constant 0 : index
    %45 = vector.load %arg4[%c6, %c0_27, %c0_28] : memref<16x16x2xf32, #tpu.memory_space<vmem>>, vector<1x16x2xf32>
    %46 = vector.shape_cast %45 : vector<1x16x2xf32> to vector<16x2xf32>
    %47 = vector.extract_strided_slice %9 {offsets = [6, 0], sizes = [1, 2], strides = [1, 1]} : vector<16x2xf32> to vector<1x2xf32>
    %48 = vector.broadcast %47 : vector<1x2xf32> to vector<16x2xf32>
    %49 = arith.mulf %46, %48 : vector<16x2xf32>
    %c7 = arith.constant 7 : index
    %c0_29 = arith.constant 0 : index
    %c0_30 = arith.constant 0 : index
    %50 = vector.load %arg4[%c7, %c0_29, %c0_30] : memref<16x16x2xf32, #tpu.memory_space<vmem>>, vector<1x16x2xf32>
    %51 = vector.shape_cast %50 : vector<1x16x2xf32> to vector<16x2xf32>
    %52 = vector.extract_strided_slice %9 {offsets = [7, 0], sizes = [1, 2], strides = [1, 1]} : vector<16x2xf32> to vector<1x2xf32>
    %53 = vector.broadcast %52 : vector<1x2xf32> to vector<16x2xf32>
    %54 = arith.mulf %51, %53 : vector<16x2xf32>
    %c8 = arith.constant 8 : index
    %c0_31 = arith.constant 0 : index
    %c0_32 = arith.constant 0 : index
    %55 = vector.load %arg4[%c8, %c0_31, %c0_32] : memref<16x16x2xf32, #tpu.memory_space<vmem>>, vector<1x16x2xf32>
    %56 = vector.shape_cast %55 : vector<1x16x2xf32> to vector<16x2xf32>
    %57 = vector.extract_strided_slice %9 {offsets = [8, 0], sizes = [1, 2], strides = [1, 1]} : vector<16x2xf32> to vector<1x2xf32>
    %58 = vector.broadcast %57 : vector<1x2xf32> to vector<16x2xf32>
    %59 = arith.mulf %56, %58 : vector<16x2xf32>
    %c9 = arith.constant 9 : index
    %c0_33 = arith.constant 0 : index
    %c0_34 = arith.constant 0 : index
    %60 = vector.load %arg4[%c9, %c0_33, %c0_34] : memref<16x16x2xf32, #tpu.memory_space<vmem>>, vector<1x16x2xf32>
    %61 = vector.shape_cast %60 : vector<1x16x2xf32> to vector<16x2xf32>
    %62 = vector.extract_strided_slice %9 {offsets = [9, 0], sizes = [1, 2], strides = [1, 1]} : vector<16x2xf32> to vector<1x2xf32>
    %63 = vector.broadcast %62 : vector<1x2xf32> to vector<16x2xf32>
    %64 = arith.mulf %61, %63 : vector<16x2xf32>
    %c10 = arith.constant 10 : index
    %c0_35 = arith.constant 0 : index
    %c0_36 = arith.constant 0 : index
    %65 = vector.load %arg4[%c10, %c0_35, %c0_36] : memref<16x16x2xf32, #tpu.memory_space<vmem>>, vector<1x16x2xf32>
    %66 = vector.shape_cast %65 : vector<1x16x2xf32> to vector<16x2xf32>
    %67 = vector.extract_strided_slice %9 {offsets = [10, 0], sizes = [1, 2], strides = [1, 1]} : vector<16x2xf32> to vector<1x2xf32>
    %68 = vector.broadcast %67 : vector<1x2xf32> to vector<16x2xf32>
    %69 = arith.mulf %66, %68 : vector<16x2xf32>
    %c11 = arith.constant 11 : index
    %c0_37 = arith.constant 0 : index
    %c0_38 = arith.constant 0 : index
    %70 = vector.load %arg4[%c11, %c0_37, %c0_38] : memref<16x16x2xf32, #tpu.memory_space<vmem>>, vector<1x16x2xf32>
    %71 = vector.shape_cast %70 : vector<1x16x2xf32> to vector<16x2xf32>
    %72 = vector.extract_strided_slice %9 {offsets = [11, 0], sizes = [1, 2], strides = [1, 1]} : vector<16x2xf32> to vector<1x2xf32>
    %73 = vector.broadcast %72 : vector<1x2xf32> to vector<16x2xf32>
    %74 = arith.mulf %71, %73 : vector<16x2xf32>
    %c12 = arith.constant 12 : index
    %c0_39 = arith.constant 0 : index
    %c0_40 = arith.constant 0 : index
    %75 = vector.load %arg4[%c12, %c0_39, %c0_40] : memref<16x16x2xf32, #tpu.memory_space<vmem>>, vector<1x16x2xf32>
    %76 = vector.shape_cast %75 : vector<1x16x2xf32> to vector<16x2xf32>
    %77 = vector.extract_strided_slice %9 {offsets = [12, 0], sizes = [1, 2], strides = [1, 1]} : vector<16x2xf32> to vector<1x2xf32>
    %78 = vector.broadcast %77 : vector<1x2xf32> to vector<16x2xf32>
    %79 = arith.mulf %76, %78 : vector<16x2xf32>
    %c13 = arith.constant 13 : index
    %c0_41 = arith.constant 0 : index
    %c0_42 = arith.constant 0 : index
    %80 = vector.load %arg4[%c13, %c0_41, %c0_42] : memref<16x16x2xf32, #tpu.memory_space<vmem>>, vector<1x16x2xf32>
    %81 = vector.shape_cast %80 : vector<1x16x2xf32> to vector<16x2xf32>
    %82 = vector.extract_strided_slice %9 {offsets = [13, 0], sizes = [1, 2], strides = [1, 1]} : vector<16x2xf32> to vector<1x2xf32>
    %83 = vector.broadcast %82 : vector<1x2xf32> to vector<16x2xf32>
    %84 = arith.mulf %81, %83 : vector<16x2xf32>
    %c14 = arith.constant 14 : index
    %c0_43 = arith.constant 0 : index
    %c0_44 = arith.constant 0 : index
    %85 = vector.load %arg4[%c14, %c0_43, %c0_44] : memref<16x16x2xf32, #tpu.memory_space<vmem>>, vector<1x16x2xf32>
    %86 = vector.shape_cast %85 : vector<1x16x2xf32> to vector<16x2xf32>
    %87 = vector.extract_strided_slice %9 {offsets = [14, 0], sizes = [1, 2], strides = [1, 1]} : vector<16x2xf32> to vector<1x2xf32>
    %88 = vector.broadcast %87 : vector<1x2xf32> to vector<16x2xf32>
    %89 = arith.mulf %86, %88 : vector<16x2xf32>
    %c15 = arith.constant 15 : index
    %c0_45 = arith.constant 0 : index
    %c0_46 = arith.constant 0 : index
    %90 = vector.load %arg4[%c15, %c0_45, %c0_46] : memref<16x16x2xf32, #tpu.memory_space<vmem>>, vector<1x16x2xf32>
    %91 = vector.shape_cast %90 : vector<1x16x2xf32> to vector<16x2xf32>
    %92 = vector.extract_strided_slice %9 {offsets = [15, 0], sizes = [1, 2], strides = [1, 1]} : vector<16x2xf32> to vector<1x2xf32>
    %93 = vector.broadcast %92 : vector<1x2xf32> to vector<16x2xf32>
    %94 = arith.mulf %91, %93 : vector<16x2xf32>
    %95 = arith.addf %19, %24 : vector<16x2xf32>
    %96 = arith.addf %29, %34 : vector<16x2xf32>
    %97 = arith.addf %39, %44 : vector<16x2xf32>
    %98 = arith.addf %49, %54 : vector<16x2xf32>
    %99 = arith.addf %59, %64 : vector<16x2xf32>
    %100 = arith.addf %69, %74 : vector<16x2xf32>
    %101 = arith.addf %79, %84 : vector<16x2xf32>
    %102 = arith.addf %89, %94 : vector<16x2xf32>
    %103 = arith.addf %95, %96 : vector<16x2xf32>
    %104 = arith.addf %97, %98 : vector<16x2xf32>
    %105 = arith.addf %99, %100 : vector<16x2xf32>
    %106 = arith.addf %101, %102 : vector<16x2xf32>
    %107 = arith.addf %103, %104 : vector<16x2xf32>
    %108 = arith.addf %105, %106 : vector<16x2xf32>
    %109 = arith.addf %107, %108 : vector<16x2xf32>
    %110 = arith.addf %14, %109 : vector<16x2xf32>
    %111 = math.tanh %110 : vector<16x2xf32>
    %112 = arith.mulf %8, %111 : vector<16x2xf32>
    %cst = arith.constant dense<0.000000e+00> : vector<2xf32>
    %113 = vector.multi_reduction <add>, %112, %cst [0] : vector<16x2xf32> to vector<2xf32>
    %114 = vector.shape_cast %113 : vector<2xf32> to vector<1x2xf32>
    %115 = arith.index_cast %c0_i32_12 : i32 to index
    %c0_47 = arith.constant 0 : index
    %116 = vector.load %arg14[%115, %c0_47] : memref<8x2xf32, #tpu.memory_space<vmem>>, vector<1x2xf32>
    tpu.vector_store %arg14[%115, %c0_47], %114 {strides = array<i32>} : memref<8x2xf32, #tpu.memory_space<vmem>>, vector<1x2xf32>,
    %c1_i32 = arith.constant 1 : i32
    %117 = arith.index_cast %c1_i32 : i32 to index
    %c0_48 = arith.constant 0 : index
    %118 = vector.load %arg13[%117, %c0_48] : memref<8x2xf32, #tpu.memory_space<vmem>>, vector<1x2xf32>
    %119 = vector.broadcast %118 : vector<1x2xf32> to vector<16x2xf32>
    %120 = arith.mulf %6, %119 : vector<16x2xf32>
    %121 = arith.addf %120, %7 : vector<16x2xf32>
    %c0_49 = arith.constant 0 : index
    %c0_50 = arith.constant 0 : index
    %c0_51 = arith.constant 0 : index
    %122 = vector.load %arg4[%c0_49, %c0_50, %c0_51] : memref<16x16x2xf32, #tpu.memory_space<vmem>>, vector<1x16x2xf32>
    %123 = vector.shape_cast %122 : vector<1x16x2xf32> to vector<16x2xf32>
    %124 = vector.extract_strided_slice %111 {offsets = [0, 0], sizes = [1, 2], strides = [1, 1]} : vector<16x2xf32> to vector<1x2xf32>
    %125 = vector.broadcast %124 : vector<1x2xf32> to vector<16x2xf32>
    %126 = arith.mulf %123, %125 : vector<16x2xf32>
    %c1_52 = arith.constant 1 : index
    %c0_53 = arith.constant 0 : index
    %c0_54 = arith.constant 0 : index
    %127 = vector.load %arg4[%c1_52, %c0_53, %c0_54] : memref<16x16x2xf32, #tpu.memory_space<vmem>>, vector<1x16x2xf32>
    %128 = vector.shape_cast %127 : vector<1x16x2xf32> to vector<16x2xf32>
    %129 = vector.extract_strided_slice %111 {offsets = [1, 0], sizes = [1, 2], strides = [1, 1]} : vector<16x2xf32> to vector<1x2xf32>
    %130 = vector.broadcast %129 : vector<1x2xf32> to vector<16x2xf32>
    %131 = arith.mulf %128, %130 : vector<16x2xf32>
    %c2_55 = arith.constant 2 : index
    %c0_56 = arith.constant 0 : index
    %c0_57 = arith.constant 0 : index
    %132 = vector.load %arg4[%c2_55, %c0_56, %c0_57] : memref<16x16x2xf32, #tpu.memory_space<vmem>>, vector<1x16x2xf32>
    %133 = vector.shape_cast %132 : vector<1x16x2xf32> to vector<16x2xf32>
    %134 = vector.extract_strided_slice %111 {offsets = [2, 0], sizes = [1, 2], strides = [1, 1]} : vector<16x2xf32> to vector<1x2xf32>
    %135 = vector.broadcast %134 : vector<1x2xf32> to vector<16x2xf32>
    %136 = arith.mulf %133, %135 : vector<16x2xf32>
    %c3_58 = arith.constant 3 : index
    %c0_59 = arith.constant 0 : index
    %c0_60 = arith.constant 0 : index
    %137 = vector.load %arg4[%c3_58, %c0_59, %c0_60] : memref<16x16x2xf32, #tpu.memory_space<vmem>>, vector<1x16x2xf32>
    %138 = vector.shape_cast %137 : vector<1x16x2xf32> to vector<16x2xf32>
    %139 = vector.extract_strided_slice %111 {offsets = [3, 0], sizes = [1, 2], strides = [1, 1]} : vector<16x2xf32> to vector<1x2xf32>
    %140 = vector.broadcast %139 : vector<1x2xf32> to vector<16x2xf32>
    %141 = arith.mulf %138, %140 : vector<16x2xf32>
    %c4_61 = arith.constant 4 : index
    %c0_62 = arith.constant 0 : index
    %c0_63 = arith.constant 0 : index
    %142 = vector.load %arg4[%c4_61, %c0_62, %c0_63] : memref<16x16x2xf32, #tpu.memory_space<vmem>>, vector<1x16x2xf32>
    %143 = vector.shape_cast %142 : vector<1x16x2xf32> to vector<16x2xf32>
    %144 = vector.extract_strided_slice %111 {offsets = [4, 0], sizes = [1, 2], strides = [1, 1]} : vector<16x2xf32> to vector<1x2xf32>
    %145 = vector.broadcast %144 : vector<1x2xf32> to vector<16x2xf32>
    %146 = arith.mulf %143, %145 : vector<16x2xf32>
    %c5_64 = arith.constant 5 : index
    %c0_65 = arith.constant 0 : index
    %c0_66 = arith.constant 0 : index
    %147 = vector.load %arg4[%c5_64, %c0_65, %c0_66] : memref<16x16x2xf32, #tpu.memory_space<vmem>>, vector<1x16x2xf32>
    %148 = vector.shape_cast %147 : vector<1x16x2xf32> to vector<16x2xf32>
    %149 = vector.extract_strided_slice %111 {offsets = [5, 0], sizes = [1, 2], strides = [1, 1]} : vector<16x2xf32> to vector<1x2xf32>
    %150 = vector.broadcast %149 : vector<1x2xf32> to vector<16x2xf32>
    %151 = arith.mulf %148, %150 : vector<16x2xf32>
    %c6_67 = arith.constant 6 : index
    %c0_68 = arith.constant 0 : index
    %c0_69 = arith.constant 0 : index
    %152 = vector.load %arg4[%c6_67, %c0_68, %c0_69] : memref<16x16x2xf32, #tpu.memory_space<vmem>>, vector<1x16x2xf32>
    %153 = vector.shape_cast %152 : vector<1x16x2xf32> to vector<16x2xf32>
    %154 = vector.extract_strided_slice %111 {offsets = [6, 0], sizes = [1, 2], strides = [1, 1]} : vector<16x2xf32> to vector<1x2xf32>
    %155 = vector.broadcast %154 : vector<1x2xf32> to vector<16x2xf32>
    %156 = arith.mulf %153, %155 : vector<16x2xf32>
    %c7_70 = arith.constant 7 : index
    %c0_71 = arith.constant 0 : index
    %c0_72 = arith.constant 0 : index
    %157 = vector.load %arg4[%c7_70, %c0_71, %c0_72] : memref<16x16x2xf32, #tpu.memory_space<vmem>>, vector<1x16x2xf32>
    %158 = vector.shape_cast %157 : vector<1x16x2xf32> to vector<16x2xf32>
    %159 = vector.extract_strided_slice %111 {offsets = [7, 0], sizes = [1, 2], strides = [1, 1]} : vector<16x2xf32> to vector<1x2xf32>
    %160 = vector.broadcast %159 : vector<1x2xf32> to vector<16x2xf32>
    %161 = arith.mulf %158, %160 : vector<16x2xf32>
    %c8_73 = arith.constant 8 : index
    %c0_74 = arith.constant 0 : index
    %c0_75 = arith.constant 0 : index
    %162 = vector.load %arg4[%c8_73, %c0_74, %c0_75] : memref<16x16x2xf32, #tpu.memory_space<vmem>>, vector<1x16x2xf32>
    %163 = vector.shape_cast %162 : vector<1x16x2xf32> to vector<16x2xf32>
    %164 = vector.extract_strided_slice %111 {offsets = [8, 0], sizes = [1, 2], strides = [1, 1]} : vector<16x2xf32> to vector<1x2xf32>
    %165 = vector.broadcast %164 : vector<1x2xf32> to vector<16x2xf32>
    %166 = arith.mulf %163, %165 : vector<16x2xf32>
    %c9_76 = arith.constant 9 : index
    %c0_77 = arith.constant 0 : index
    %c0_78 = arith.constant 0 : index
    %167 = vector.load %arg4[%c9_76, %c0_77, %c0_78] : memref<16x16x2xf32, #tpu.memory_space<vmem>>, vector<1x16x2xf32>
    %168 = vector.shape_cast %167 : vector<1x16x2xf32> to vector<16x2xf32>
    %169 = vector.extract_strided_slice %111 {offsets = [9, 0], sizes = [1, 2], strides = [1, 1]} : vector<16x2xf32> to vector<1x2xf32>
    %170 = vector.broadcast %169 : vector<1x2xf32> to vector<16x2xf32>
    %171 = arith.mulf %168, %170 : vector<16x2xf32>
    %c10_79 = arith.constant 10 : index
    %c0_80 = arith.constant 0 : index
    %c0_81 = arith.constant 0 : index
    %172 = vector.load %arg4[%c10_79, %c0_80, %c0_81] : memref<16x16x2xf32, #tpu.memory_space<vmem>>, vector<1x16x2xf32>
    %173 = vector.shape_cast %172 : vector<1x16x2xf32> to vector<16x2xf32>
    %174 = vector.extract_strided_slice %111 {offsets = [10, 0], sizes = [1, 2], strides = [1, 1]} : vector<16x2xf32> to vector<1x2xf32>
    %175 = vector.broadcast %174 : vector<1x2xf32> to vector<16x2xf32>
    %176 = arith.mulf %173, %175 : vector<16x2xf32>
    %c11_82 = arith.constant 11 : index
    %c0_83 = arith.constant 0 : index
    %c0_84 = arith.constant 0 : index
    %177 = vector.load %arg4[%c11_82, %c0_83, %c0_84] : memref<16x16x2xf32, #tpu.memory_space<vmem>>, vector<1x16x2xf32>
    %178 = vector.shape_cast %177 : vector<1x16x2xf32> to vector<16x2xf32>
    %179 = vector.extract_strided_slice %111 {offsets = [11, 0], sizes = [1, 2], strides = [1, 1]} : vector<16x2xf32> to vector<1x2xf32>
    %180 = vector.broadcast %179 : vector<1x2xf32> to vector<16x2xf32>
    %181 = arith.mulf %178, %180 : vector<16x2xf32>
    %c12_85 = arith.constant 12 : index
    %c0_86 = arith.constant 0 : index
    %c0_87 = arith.constant 0 : index
    %182 = vector.load %arg4[%c12_85, %c0_86, %c0_87] : memref<16x16x2xf32, #tpu.memory_space<vmem>>, vector<1x16x2xf32>
    %183 = vector.shape_cast %182 : vector<1x16x2xf32> to vector<16x2xf32>
    %184 = vector.extract_strided_slice %111 {offsets = [12, 0], sizes = [1, 2], strides = [1, 1]} : vector<16x2xf32> to vector<1x2xf32>
    %185 = vector.broadcast %184 : vector<1x2xf32> to vector<16x2xf32>
    %186 = arith.mulf %183, %185 : vector<16x2xf32>
    %c13_88 = arith.constant 13 : index
    %c0_89 = arith.constant 0 : index
    %c0_90 = arith.constant 0 : index
    %187 = vector.load %arg4[%c13_88, %c0_89, %c0_90] : memref<16x16x2xf32, #tpu.memory_space<vmem>>, vector<1x16x2xf32>
    %188 = vector.shape_cast %187 : vector<1x16x2xf32> to vector<16x2xf32>
    %189 = vector.extract_strided_slice %111 {offsets = [13, 0], sizes = [1, 2], strides = [1, 1]} : vector<16x2xf32> to vector<1x2xf32>
    %190 = vector.broadcast %189 : vector<1x2xf32> to vector<16x2xf32>
    %191 = arith.mulf %188, %190 : vector<16x2xf32>
    %c14_91 = arith.constant 14 : index
    %c0_92 = arith.constant 0 : index
    %c0_93 = arith.constant 0 : index
    %192 = vector.load %arg4[%c14_91, %c0_92, %c0_93] : memref<16x16x2xf32, #tpu.memory_space<vmem>>, vector<1x16x2xf32>
    %193 = vector.shape_cast %192 : vector<1x16x2xf32> to vector<16x2xf32>
    %194 = vector.extract_strided_slice %111 {offsets = [14, 0], sizes = [1, 2], strides = [1, 1]} : vector<16x2xf32> to vector<1x2xf32>
    %195 = vector.broadcast %194 : vector<1x2xf32> to vector<16x2xf32>
    %196 = arith.mulf %193, %195 : vector<16x2xf32>
    %c15_94 = arith.constant 15 : index
    %c0_95 = arith.constant 0 : index
    %c0_96 = arith.constant 0 : index
    %197 = vector.load %arg4[%c15_94, %c0_95, %c0_96] : memref<16x16x2xf32, #tpu.memory_space<vmem>>, vector<1x16x2xf32>
    %198 = vector.shape_cast %197 : vector<1x16x2xf32> to vector<16x2xf32>
    %199 = vector.extract_strided_slice %111 {offsets = [15, 0], sizes = [1, 2], strides = [1, 1]} : vector<16x2xf32> to vector<1x2xf32>
    %200 = vector.broadcast %199 : vector<1x2xf32> to vector<16x2xf32>
    %201 = arith.mulf %198, %200 : vector<16x2xf32>
    %202 = arith.addf %126, %131 : vector<16x2xf32>
    %203 = arith.addf %136, %141 : vector<16x2xf32>
    %204 = arith.addf %146, %151 : vector<16x2xf32>
    %205 = arith.addf %156, %161 : vector<16x2xf32>
    %206 = arith.addf %166, %171 : vector<16x2xf32>
    %207 = arith.addf %176, %181 : vector<16x2xf32>
    %208 = arith.addf %186, %191 : vector<16x2xf32>
    %209 = arith.addf %196, %201 : vector<16x2xf32>
    %210 = arith.addf %202, %203 : vector<16x2xf32>
    %211 = arith.addf %204, %205 : vector<16x2xf32>
    %212 = arith.addf %206, %207 : vector<16x2xf32>
    %213 = arith.addf %208, %209 : vector<16x2xf32>
    %214 = arith.addf %210, %211 : vector<16x2xf32>
    %215 = arith.addf %212, %213 : vector<16x2xf32>
    %216 = arith.addf %214, %215 : vector<16x2xf32>
    %217 = arith.addf %121, %216 : vector<16x2xf32>
    %218 = math.tanh %217 : vector<16x2xf32>
    %219 = arith.mulf %8, %218 : vector<16x2xf32>
    %cst_97 = arith.constant dense<0.000000e+00> : vector<2xf32>
    %220 = vector.multi_reduction <add>, %219, %cst_97 [0] : vector<16x2xf32> to vector<2xf32>
    %221 = vector.shape_cast %220 : vector<2xf32> to vector<1x2xf32>
    %222 = arith.index_cast %c1_i32 : i32 to index
    %c0_98 = arith.constant 0 : index
    %223 = vector.load %arg14[%222, %c0_98] : memref<8x2xf32, #tpu.memory_space<vmem>>, vector<1x2xf32>
    tpu.vector_store %arg14[%222, %c0_98], %221 {strides = array<i32>} : memref<8x2xf32, #tpu.memory_space<vmem>>, vector<1x2xf32>,
    %c2_i32 = arith.constant 2 : i32
    %224 = arith.index_cast %c2_i32 : i32 to index
    %c0_99 = arith.constant 0 : index
    %225 = vector.load %arg13[%224, %c0_99] : memref<8x2xf32, #tpu.memory_space<vmem>>, vector<1x2xf32>
    %226 = vector.broadcast %225 : vector<1x2xf32> to vector<16x2xf32>
    %227 = arith.mulf %6, %226 : vector<16x2xf32>
    %228 = arith.addf %227, %7 : vector<16x2xf32>
    %c0_100 = arith.constant 0 : index
    %c0_101 = arith.constant 0 : index
    %c0_102 = arith.constant 0 : index
    %229 = vector.load %arg4[%c0_100, %c0_101, %c0_102] : memref<16x16x2xf32, #tpu.memory_space<vmem>>, vector<1x16x2xf32>
    %230 = vector.shape_cast %229 : vector<1x16x2xf32> to vector<16x2xf32>
    %231 = vector.extract_strided_slice %218 {offsets = [0, 0], sizes = [1, 2], strides = [1, 1]} : vector<16x2xf32> to vector<1x2xf32>
    %232 = vector.broadcast %231 : vector<1x2xf32> to vector<16x2xf32>
    %233 = arith.mulf %230, %232 : vector<16x2xf32>
    %c1_103 = arith.constant 1 : index
    %c0_104 = arith.constant 0 : index
    %c0_105 = arith.constant 0 : index
    %234 = vector.load %arg4[%c1_103, %c0_104, %c0_105] : memref<16x16x2xf32, #tpu.memory_space<vmem>>, vector<1x16x2xf32>
    %235 = vector.shape_cast %234 : vector<1x16x2xf32> to vector<16x2xf32>
    %236 = vector.extract_strided_slice %218 {offsets = [1, 0], sizes = [1, 2], strides = [1, 1]} : vector<16x2xf32> to vector<1x2xf32>
    %237 = vector.broadcast %236 : vector<1x2xf32> to vector<16x2xf32>
    %238 = arith.mulf %235, %237 : vector<16x2xf32>
    %c2_106 = arith.constant 2 : index
    %c0_107 = arith.constant 0 : index
    %c0_108 = arith.constant 0 : index
    %239 = vector.load %arg4[%c2_106, %c0_107, %c0_108] : memref<16x16x2xf32, #tpu.memory_space<vmem>>, vector<1x16x2xf32>
    %240 = vector.shape_cast %239 : vector<1x16x2xf32> to vector<16x2xf32>
    %241 = vector.extract_strided_slice %218 {offsets = [2, 0], sizes = [1, 2], strides = [1, 1]} : vector<16x2xf32> to vector<1x2xf32>
    %242 = vector.broadcast %241 : vector<1x2xf32> to vector<16x2xf32>
    %243 = arith.mulf %240, %242 : vector<16x2xf32>
    %c3_109 = arith.constant 3 : index
    %c0_110 = arith.constant 0 : index
    %c0_111 = arith.constant 0 : index
    %244 = vector.load %arg4[%c3_109, %c0_110, %c0_111] : memref<16x16x2xf32, #tpu.memory_space<vmem>>, vector<1x16x2xf32>
    %245 = vector.shape_cast %244 : vector<1x16x2xf32> to vector<16x2xf32>
    %246 = vector.extract_strided_slice %218 {offsets = [3, 0], sizes = [1, 2], strides = [1, 1]} : vector<16x2xf32> to vector<1x2xf32>
    %247 = vector.broadcast %246 : vector<1x2xf32> to vector<16x2xf32>
    %248 = arith.mulf %245, %247 : vector<16x2xf32>
    %c4_112 = arith.constant 4 : index
    %c0_113 = arith.constant 0 : index
    %c0_114 = arith.constant 0 : index
    %249 = vector.load %arg4[%c4_112, %c0_113, %c0_114] : memref<16x16x2xf32, #tpu.memory_space<vmem>>, vector<1x16x2xf32>
    %250 = vector.shape_cast %249 : vector<1x16x2xf32> to vector<16x2xf32>
    %251 = vector.extract_strided_slice %218 {offsets = [4, 0], sizes = [1, 2], strides = [1, 1]} : vector<16x2xf32> to vector<1x2xf32>
    %252 = vector.broadcast %251 : vector<1x2xf32> to vector<16x2xf32>
    %253 = arith.mulf %250, %252 : vector<16x2xf32>
    %c5_115 = arith.constant 5 : index
    %c0_116 = arith.constant 0 : index
    %c0_117 = arith.constant 0 : index
    %254 = vector.load %arg4[%c5_115, %c0_116, %c0_117] : memref<16x16x2xf32, #tpu.memory_space<vmem>>, vector<1x16x2xf32>
    %255 = vector.shape_cast %254 : vector<1x16x2xf32> to vector<16x2xf32>
    %256 = vector.extract_strided_slice %218 {offsets = [5, 0], sizes = [1, 2], strides = [1, 1]} : vector<16x2xf32> to vector<1x2xf32>
    %257 = vector.broadcast %256 : vector<1x2xf32> to vector<16x2xf32>
    %258 = arith.mulf %255, %257 : vector<16x2xf32>
    %c6_118 = arith.constant 6 : index
    %c0_119 = arith.constant 0 : index
    %c0_120 = arith.constant 0 : index
    %259 = vector.load %arg4[%c6_118, %c0_119, %c0_120] : memref<16x16x2xf32, #tpu.memory_space<vmem>>, vector<1x16x2xf32>
    %260 = vector.shape_cast %259 : vector<1x16x2xf32> to vector<16x2xf32>
    %261 = vector.extract_strided_slice %218 {offsets = [6, 0], sizes = [1, 2], strides = [1, 1]} : vector<16x2xf32> to vector<1x2xf32>
    %262 = vector.broadcast %261 : vector<1x2xf32> to vector<16x2xf32>
    %263 = arith.mulf %260, %262 : vector<16x2xf32>
    %c7_121 = arith.constant 7 : index
    %c0_122 = arith.constant 0 : index
    %c0_123 = arith.constant 0 : index
    %264 = vector.load %arg4[%c7_121, %c0_122, %c0_123] : memref<16x16x2xf32, #tpu.memory_space<vmem>>, vector<1x16x2xf32>
    %265 = vector.shape_cast %264 : vector<1x16x2xf32> to vector<16x2xf32>
    %266 = vector.extract_strided_slice %218 {offsets = [7, 0], sizes = [1, 2], strides = [1, 1]} : vector<16x2xf32> to vector<1x2xf32>
    %267 = vector.broadcast %266 : vector<1x2xf32> to vector<16x2xf32>
    %268 = arith.mulf %265, %267 : vector<16x2xf32>
    %c8_124 = arith.constant 8 : index
    %c0_125 = arith.constant 0 : index
    %c0_126 = arith.constant 0 : index
    %269 = vector.load %arg4[%c8_124, %c0_125, %c0_126] : memref<16x16x2xf32, #tpu.memory_space<vmem>>, vector<1x16x2xf32>
    %270 = vector.shape_cast %269 : vector<1x16x2xf32> to vector<16x2xf32>
    %271 = vector.extract_strided_slice %218 {offsets = [8, 0], sizes = [1, 2], strides = [1, 1]} : vector<16x2xf32> to vector<1x2xf32>
    %272 = vector.broadcast %271 : vector<1x2xf32> to vector<16x2xf32>
    %273 = arith.mulf %270, %272 : vector<16x2xf32>
    %c9_127 = arith.constant 9 : index
    %c0_128 = arith.constant 0 : index
    %c0_129 = arith.constant 0 : index
    %274 = vector.load %arg4[%c9_127, %c0_128, %c0_129] : memref<16x16x2xf32, #tpu.memory_space<vmem>>, vector<1x16x2xf32>
    %275 = vector.shape_cast %274 : vector<1x16x2xf32> to vector<16x2xf32>
    %276 = vector.extract_strided_slice %218 {offsets = [9, 0], sizes = [1, 2], strides = [1, 1]} : vector<16x2xf32> to vector<1x2xf32>
    %277 = vector.broadcast %276 : vector<1x2xf32> to vector<16x2xf32>
    %278 = arith.mulf %275, %277 : vector<16x2xf32>
    %c10_130 = arith.constant 10 : index
    %c0_131 = arith.constant 0 : index
    %c0_132 = arith.constant 0 : index
    %279 = vector.load %arg4[%c10_130, %c0_131, %c0_132] : memref<16x16x2xf32, #tpu.memory_space<vmem>>, vector<1x16x2xf32>
    %280 = vector.shape_cast %279 : vector<1x16x2xf32> to vector<16x2xf32>
    %281 = vector.extract_strided_slice %218 {offsets = [10, 0], sizes = [1, 2], strides = [1, 1]} : vector<16x2xf32> to vector<1x2xf32>
    %282 = vector.broadcast %281 : vector<1x2xf32> to vector<16x2xf32>
    %283 = arith.mulf %280, %282 : vector<16x2xf32>
    %c11_133 = arith.constant 11 : index
    %c0_134 = arith.constant 0 : index
    %c0_135 = arith.constant 0 : index
    %284 = vector.load %arg4[%c11_133, %c0_134, %c0_135] : memref<16x16x2xf32, #tpu.memory_space<vmem>>, vector<1x16x2xf32>
    %285 = vector.shape_cast %284 : vector<1x16x2xf32> to vector<16x2xf32>
    %286 = vector.extract_strided_slice %218 {offsets = [11, 0], sizes = [1, 2], strides = [1, 1]} : vector<16x2xf32> to vector<1x2xf32>
    %287 = vector.broadcast %286 : vector<1x2xf32> to vector<16x2xf32>
    %288 = arith.mulf %285, %287 : vector<16x2xf32>
    %c12_136 = arith.constant 12 : index
    %c0_137 = arith.constant 0 : index
    %c0_138 = arith.constant 0 : index
    %289 = vector.load %arg4[%c12_136, %c0_137, %c0_138] : memref<16x16x2xf32, #tpu.memory_space<vmem>>, vector<1x16x2xf32>
    %290 = vector.shape_cast %289 : vector<1x16x2xf32> to vector<16x2xf32>
    %291 = vector.extract_strided_slice %218 {offsets = [12, 0], sizes = [1, 2], strides = [1, 1]} : vector<16x2xf32> to vector<1x2xf32>
    %292 = vector.broadcast %291 : vector<1x2xf32> to vector<16x2xf32>
    %293 = arith.mulf %290, %292 : vector<16x2xf32>
    %c13_139 = arith.constant 13 : index
    %c0_140 = arith.constant 0 : index
    %c0_141 = arith.constant 0 : index
    %294 = vector.load %arg4[%c13_139, %c0_140, %c0_141] : memref<16x16x2xf32, #tpu.memory_space<vmem>>, vector<1x16x2xf32>
    %295 = vector.shape_cast %294 : vector<1x16x2xf32> to vector<16x2xf32>
    %296 = vector.extract_strided_slice %218 {offsets = [13, 0], sizes = [1, 2], strides = [1, 1]} : vector<16x2xf32> to vector<1x2xf32>
    %297 = vector.broadcast %296 : vector<1x2xf32> to vector<16x2xf32>
    %298 = arith.mulf %295, %297 : vector<16x2xf32>
    %c14_142 = arith.constant 14 : index
    %c0_143 = arith.constant 0 : index
    %c0_144 = arith.constant 0 : index
    %299 = vector.load %arg4[%c14_142, %c0_143, %c0_144] : memref<16x16x2xf32, #tpu.memory_space<vmem>>, vector<1x16x2xf32>
    %300 = vector.shape_cast %299 : vector<1x16x2xf32> to vector<16x2xf32>
    %301 = vector.extract_strided_slice %218 {offsets = [14, 0], sizes = [1, 2], strides = [1, 1]} : vector<16x2xf32> to vector<1x2xf32>
    %302 = vector.broadcast %301 : vector<1x2xf32> to vector<16x2xf32>
    %303 = arith.mulf %300, %302 : vector<16x2xf32>
    %c15_145 = arith.constant 15 : index
    %c0_146 = arith.constant 0 : index
    %c0_147 = arith.constant 0 : index
    %304 = vector.load %arg4[%c15_145, %c0_146, %c0_147] : memref<16x16x2xf32, #tpu.memory_space<vmem>>, vector<1x16x2xf32>
    %305 = vector.shape_cast %304 : vector<1x16x2xf32> to vector<16x2xf32>
    %306 = vector.extract_strided_slice %218 {offsets = [15, 0], sizes = [1, 2], strides = [1, 1]} : vector<16x2xf32> to vector<1x2xf32>
    %307 = vector.broadcast %306 : vector<1x2xf32> to vector<16x2xf32>
    %308 = arith.mulf %305, %307 : vector<16x2xf32>
    %309 = arith.addf %233, %238 : vector<16x2xf32>
    %310 = arith.addf %243, %248 : vector<16x2xf32>
    %311 = arith.addf %253, %258 : vector<16x2xf32>
    %312 = arith.addf %263, %268 : vector<16x2xf32>
    %313 = arith.addf %273, %278 : vector<16x2xf32>
    %314 = arith.addf %283, %288 : vector<16x2xf32>
    %315 = arith.addf %293, %298 : vector<16x2xf32>
    %316 = arith.addf %303, %308 : vector<16x2xf32>
    %317 = arith.addf %309, %310 : vector<16x2xf32>
    %318 = arith.addf %311, %312 : vector<16x2xf32>
    %319 = arith.addf %313, %314 : vector<16x2xf32>
    %320 = arith.addf %315, %316 : vector<16x2xf32>
    %321 = arith.addf %317, %318 : vector<16x2xf32>
    %322 = arith.addf %319, %320 : vector<16x2xf32>
    %323 = arith.addf %321, %322 : vector<16x2xf32>
    %324 = arith.addf %228, %323 : vector<16x2xf32>
    %325 = math.tanh %324 : vector<16x2xf32>
    %326 = arith.mulf %8, %325 : vector<16x2xf32>
    %cst_148 = arith.constant dense<0.000000e+00> : vector<2xf32>
    %327 = vector.multi_reduction <add>, %326, %cst_148 [0] : vector<16x2xf32> to vector<2xf32>
    %328 = vector.shape_cast %327 : vector<2xf32> to vector<1x2xf32>
    %329 = arith.index_cast %c2_i32 : i32 to index
    %c0_149 = arith.constant 0 : index
    %330 = vector.load %arg14[%329, %c0_149] : memref<8x2xf32, #tpu.memory_space<vmem>>, vector<1x2xf32>
    tpu.vector_store %arg14[%329, %c0_149], %328 {strides = array<i32>} : memref<8x2xf32, #tpu.memory_space<vmem>>, vector<1x2xf32>,
    %c3_i32 = arith.constant 3 : i32
    %331 = arith.index_cast %c3_i32 : i32 to index
    %c0_150 = arith.constant 0 : index
    %332 = vector.load %arg13[%331, %c0_150] : memref<8x2xf32, #tpu.memory_space<vmem>>, vector<1x2xf32>
    %333 = vector.broadcast %332 : vector<1x2xf32> to vector<16x2xf32>
    %334 = arith.mulf %6, %333 : vector<16x2xf32>
    %335 = arith.addf %334, %7 : vector<16x2xf32>
    %c0_151 = arith.constant 0 : index
    %c0_152 = arith.constant 0 : index
    %c0_153 = arith.constant 0 : index
    %336 = vector.load %arg4[%c0_151, %c0_152, %c0_153] : memref<16x16x2xf32, #tpu.memory_space<vmem>>, vector<1x16x2xf32>
    %337 = vector.shape_cast %336 : vector<1x16x2xf32> to vector<16x2xf32>
    %338 = vector.extract_strided_slice %325 {offsets = [0, 0], sizes = [1, 2], strides = [1, 1]} : vector<16x2xf32> to vector<1x2xf32>
    %339 = vector.broadcast %338 : vector<1x2xf32> to vector<16x2xf32>
    %340 = arith.mulf %337, %339 : vector<16x2xf32>
    %c1_154 = arith.constant 1 : index
    %c0_155 = arith.constant 0 : index
    %c0_156 = arith.constant 0 : index
    %341 = vector.load %arg4[%c1_154, %c0_155, %c0_156] : memref<16x16x2xf32, #tpu.memory_space<vmem>>, vector<1x16x2xf32>
    %342 = vector.shape_cast %341 : vector<1x16x2xf32> to vector<16x2xf32>
    %343 = vector.extract_strided_slice %325 {offsets = [1, 0], sizes = [1, 2], strides = [1, 1]} : vector<16x2xf32> to vector<1x2xf32>
    %344 = vector.broadcast %343 : vector<1x2xf32> to vector<16x2xf32>
    %345 = arith.mulf %342, %344 : vector<16x2xf32>
    %c2_157 = arith.constant 2 : index
    %c0_158 = arith.constant 0 : index
    %c0_159 = arith.constant 0 : index
    %346 = vector.load %arg4[%c2_157, %c0_158, %c0_159] : memref<16x16x2xf32, #tpu.memory_space<vmem>>, vector<1x16x2xf32>
    %347 = vector.shape_cast %346 : vector<1x16x2xf32> to vector<16x2xf32>
    %348 = vector.extract_strided_slice %325 {offsets = [2, 0], sizes = [1, 2], strides = [1, 1]} : vector<16x2xf32> to vector<1x2xf32>
    %349 = vector.broadcast %348 : vector<1x2xf32> to vector<16x2xf32>
    %350 = arith.mulf %347, %349 : vector<16x2xf32>
    %c3_160 = arith.constant 3 : index
    %c0_161 = arith.constant 0 : index
    %c0_162 = arith.constant 0 : index
    %351 = vector.load %arg4[%c3_160, %c0_161, %c0_162] : memref<16x16x2xf32, #tpu.memory_space<vmem>>, vector<1x16x2xf32>
    %352 = vector.shape_cast %351 : vector<1x16x2xf32> to vector<16x2xf32>
    %353 = vector.extract_strided_slice %325 {offsets = [3, 0], sizes = [1, 2], strides = [1, 1]} : vector<16x2xf32> to vector<1x2xf32>
    %354 = vector.broadcast %353 : vector<1x2xf32> to vector<16x2xf32>
    %355 = arith.mulf %352, %354 : vector<16x2xf32>
    %c4_163 = arith.constant 4 : index
    %c0_164 = arith.constant 0 : index
    %c0_165 = arith.constant 0 : index
    %356 = vector.load %arg4[%c4_163, %c0_164, %c0_165] : memref<16x16x2xf32, #tpu.memory_space<vmem>>, vector<1x16x2xf32>
    %357 = vector.shape_cast %356 : vector<1x16x2xf32> to vector<16x2xf32>
    %358 = vector.extract_strided_slice %325 {offsets = [4, 0], sizes = [1, 2], strides = [1, 1]} : vector<16x2xf32> to vector<1x2xf32>
    %359 = vector.broadcast %358 : vector<1x2xf32> to vector<16x2xf32>
    %360 = arith.mulf %357, %359 : vector<16x2xf32>
    %c5_166 = arith.constant 5 : index
    %c0_167 = arith.constant 0 : index
    %c0_168 = arith.constant 0 : index
    %361 = vector.load %arg4[%c5_166, %c0_167, %c0_168] : memref<16x16x2xf32, #tpu.memory_space<vmem>>, vector<1x16x2xf32>
    %362 = vector.shape_cast %361 : vector<1x16x2xf32> to vector<16x2xf32>
    %363 = vector.extract_strided_slice %325 {offsets = [5, 0], sizes = [1, 2], strides = [1, 1]} : vector<16x2xf32> to vector<1x2xf32>
    %364 = vector.broadcast %363 : vector<1x2xf32> to vector<16x2xf32>
    %365 = arith.mulf %362, %364 : vector<16x2xf32>
    %c6_169 = arith.constant 6 : index
    %c0_170 = arith.constant 0 : index
    %c0_171 = arith.constant 0 : index
    %366 = vector.load %arg4[%c6_169, %c0_170, %c0_171] : memref<16x16x2xf32, #tpu.memory_space<vmem>>, vector<1x16x2xf32>
    %367 = vector.shape_cast %366 : vector<1x16x2xf32> to vector<16x2xf32>
    %368 = vector.extract_strided_slice %325 {offsets = [6, 0], sizes = [1, 2], strides = [1, 1]} : vector<16x2xf32> to vector<1x2xf32>
    %369 = vector.broadcast %368 : vector<1x2xf32> to vector<16x2xf32>
    %370 = arith.mulf %367, %369 : vector<16x2xf32>
    %c7_172 = arith.constant 7 : index
    %c0_173 = arith.constant 0 : index
    %c0_174 = arith.constant 0 : index
    %371 = vector.load %arg4[%c7_172, %c0_173, %c0_174] : memref<16x16x2xf32, #tpu.memory_space<vmem>>, vector<1x16x2xf32>
    %372 = vector.shape_cast %371 : vector<1x16x2xf32> to vector<16x2xf32>
    %373 = vector.extract_strided_slice %325 {offsets = [7, 0], sizes = [1, 2], strides = [1, 1]} : vector<16x2xf32> to vector<1x2xf32>
    %374 = vector.broadcast %373 : vector<1x2xf32> to vector<16x2xf32>
    %375 = arith.mulf %372, %374 : vector<16x2xf32>
    %c8_175 = arith.constant 8 : index
    %c0_176 = arith.constant 0 : index
    %c0_177 = arith.constant 0 : index
    %376 = vector.load %arg4[%c8_175, %c0_176, %c0_177] : memref<16x16x2xf32, #tpu.memory_space<vmem>>, vector<1x16x2xf32>
    %377 = vector.shape_cast %376 : vector<1x16x2xf32> to vector<16x2xf32>
    %378 = vector.extract_strided_slice %325 {offsets = [8, 0], sizes = [1, 2], strides = [1, 1]} : vector<16x2xf32> to vector<1x2xf32>
    %379 = vector.broadcast %378 : vector<1x2xf32> to vector<16x2xf32>
    %380 = arith.mulf %377, %379 : vector<16x2xf32>
    %c9_178 = arith.constant 9 : index
    %c0_179 = arith.constant 0 : index
    %c0_180 = arith.constant 0 : index
    %381 = vector.load %arg4[%c9_178, %c0_179, %c0_180] : memref<16x16x2xf32, #tpu.memory_space<vmem>>, vector<1x16x2xf32>
    %382 = vector.shape_cast %381 : vector<1x16x2xf32> to vector<16x2xf32>
    %383 = vector.extract_strided_slice %325 {offsets = [9, 0], sizes = [1, 2], strides = [1, 1]} : vector<16x2xf32> to vector<1x2xf32>
    %384 = vector.broadcast %383 : vector<1x2xf32> to vector<16x2xf32>
    %385 = arith.mulf %382, %384 : vector<16x2xf32>
    %c10_181 = arith.constant 10 : index
    %c0_182 = arith.constant 0 : index
    %c0_183 = arith.constant 0 : index
    %386 = vector.load %arg4[%c10_181, %c0_182, %c0_183] : memref<16x16x2xf32, #tpu.memory_space<vmem>>, vector<1x16x2xf32>
    %387 = vector.shape_cast %386 : vector<1x16x2xf32> to vector<16x2xf32>
    %388 = vector.extract_strided_slice %325 {offsets = [10, 0], sizes = [1, 2], strides = [1, 1]} : vector<16x2xf32> to vector<1x2xf32>
    %389 = vector.broadcast %388 : vector<1x2xf32> to vector<16x2xf32>
    %390 = arith.mulf %387, %389 : vector<16x2xf32>
    %c11_184 = arith.constant 11 : index
    %c0_185 = arith.constant 0 : index
    %c0_186 = arith.constant 0 : index
    %391 = vector.load %arg4[%c11_184, %c0_185, %c0_186] : memref<16x16x2xf32, #tpu.memory_space<vmem>>, vector<1x16x2xf32>
    %392 = vector.shape_cast %391 : vector<1x16x2xf32> to vector<16x2xf32>
    %393 = vector.extract_strided_slice %325 {offsets = [11, 0], sizes = [1, 2], strides = [1, 1]} : vector<16x2xf32> to vector<1x2xf32>
    %394 = vector.broadcast %393 : vector<1x2xf32> to vector<16x2xf32>
    %395 = arith.mulf %392, %394 : vector<16x2xf32>
    %c12_187 = arith.constant 12 : index
    %c0_188 = arith.constant 0 : index
    %c0_189 = arith.constant 0 : index
    %396 = vector.load %arg4[%c12_187, %c0_188, %c0_189] : memref<16x16x2xf32, #tpu.memory_space<vmem>>, vector<1x16x2xf32>
    %397 = vector.shape_cast %396 : vector<1x16x2xf32> to vector<16x2xf32>
    %398 = vector.extract_strided_slice %325 {offsets = [12, 0], sizes = [1, 2], strides = [1, 1]} : vector<16x2xf32> to vector<1x2xf32>
    %399 = vector.broadcast %398 : vector<1x2xf32> to vector<16x2xf32>
    %400 = arith.mulf %397, %399 : vector<16x2xf32>
    %c13_190 = arith.constant 13 : index
    %c0_191 = arith.constant 0 : index
    %c0_192 = arith.constant 0 : index
    %401 = vector.load %arg4[%c13_190, %c0_191, %c0_192] : memref<16x16x2xf32, #tpu.memory_space<vmem>>, vector<1x16x2xf32>
    %402 = vector.shape_cast %401 : vector<1x16x2xf32> to vector<16x2xf32>
    %403 = vector.extract_strided_slice %325 {offsets = [13, 0], sizes = [1, 2], strides = [1, 1]} : vector<16x2xf32> to vector<1x2xf32>
    %404 = vector.broadcast %403 : vector<1x2xf32> to vector<16x2xf32>
    %405 = arith.mulf %402, %404 : vector<16x2xf32>
    %c14_193 = arith.constant 14 : index
    %c0_194 = arith.constant 0 : index
    %c0_195 = arith.constant 0 : index
    %406 = vector.load %arg4[%c14_193, %c0_194, %c0_195] : memref<16x16x2xf32, #tpu.memory_space<vmem>>, vector<1x16x2xf32>
    %407 = vector.shape_cast %406 : vector<1x16x2xf32> to vector<16x2xf32>
    %408 = vector.extract_strided_slice %325 {offsets = [14, 0], sizes = [1, 2], strides = [1, 1]} : vector<16x2xf32> to vector<1x2xf32>
    %409 = vector.broadcast %408 : vector<1x2xf32> to vector<16x2xf32>
    %410 = arith.mulf %407, %409 : vector<16x2xf32>
    %c15_196 = arith.constant 15 : index
    %c0_197 = arith.constant 0 : index
    %c0_198 = arith.constant 0 : index
    %411 = vector.load %arg4[%c15_196, %c0_197, %c0_198] : memref<16x16x2xf32, #tpu.memory_space<vmem>>, vector<1x16x2xf32>
    %412 = vector.shape_cast %411 : vector<1x16x2xf32> to vector<16x2xf32>
    %413 = vector.extract_strided_slice %325 {offsets = [15, 0], sizes = [1, 2], strides = [1, 1]} : vector<16x2xf32> to vector<1x2xf32>
    %414 = vector.broadcast %413 : vector<1x2xf32> to vector<16x2xf32>
    %415 = arith.mulf %412, %414 : vector<16x2xf32>
    %416 = arith.addf %340, %345 : vector<16x2xf32>
    %417 = arith.addf %350, %355 : vector<16x2xf32>
    %418 = arith.addf %360, %365 : vector<16x2xf32>
    %419 = arith.addf %370, %375 : vector<16x2xf32>
    %420 = arith.addf %380, %385 : vector<16x2xf32>
    %421 = arith.addf %390, %395 : vector<16x2xf32>
    %422 = arith.addf %400, %405 : vector<16x2xf32>
    %423 = arith.addf %410, %415 : vector<16x2xf32>
    %424 = arith.addf %416, %417 : vector<16x2xf32>
    %425 = arith.addf %418, %419 : vector<16x2xf32>
    %426 = arith.addf %420, %421 : vector<16x2xf32>
    %427 = arith.addf %422, %423 : vector<16x2xf32>
    %428 = arith.addf %424, %425 : vector<16x2xf32>
    %429 = arith.addf %426, %427 : vector<16x2xf32>
    %430 = arith.addf %428, %429 : vector<16x2xf32>
    %431 = arith.addf %335, %430 : vector<16x2xf32>
    %432 = math.tanh %431 : vector<16x2xf32>
    %433 = arith.mulf %8, %432 : vector<16x2xf32>
    %cst_199 = arith.constant dense<0.000000e+00> : vector<2xf32>
    %434 = vector.multi_reduction <add>, %433, %cst_199 [0] : vector<16x2xf32> to vector<2xf32>
    %435 = vector.shape_cast %434 : vector<2xf32> to vector<1x2xf32>
    %436 = arith.index_cast %c3_i32 : i32 to index
    %c0_200 = arith.constant 0 : index
    %437 = vector.load %arg14[%436, %c0_200] : memref<8x2xf32, #tpu.memory_space<vmem>>, vector<1x2xf32>
    tpu.vector_store %arg14[%436, %c0_200], %435 {strides = array<i32>} : memref<8x2xf32, #tpu.memory_space<vmem>>, vector<1x2xf32>,
    %c4_i32 = arith.constant 4 : i32
    %438 = arith.index_cast %c4_i32 : i32 to index
    %c0_201 = arith.constant 0 : index
    %439 = vector.load %arg13[%438, %c0_201] : memref<8x2xf32, #tpu.memory_space<vmem>>, vector<1x2xf32>
    %440 = vector.broadcast %439 : vector<1x2xf32> to vector<16x2xf32>
    %441 = arith.mulf %6, %440 : vector<16x2xf32>
    %442 = arith.addf %441, %7 : vector<16x2xf32>
    %c0_202 = arith.constant 0 : index
    %c0_203 = arith.constant 0 : index
    %c0_204 = arith.constant 0 : index
    %443 = vector.load %arg4[%c0_202, %c0_203, %c0_204] : memref<16x16x2xf32, #tpu.memory_space<vmem>>, vector<1x16x2xf32>
    %444 = vector.shape_cast %443 : vector<1x16x2xf32> to vector<16x2xf32>
    %445 = vector.extract_strided_slice %432 {offsets = [0, 0], sizes = [1, 2], strides = [1, 1]} : vector<16x2xf32> to vector<1x2xf32>
    %446 = vector.broadcast %445 : vector<1x2xf32> to vector<16x2xf32>
    %447 = arith.mulf %444, %446 : vector<16x2xf32>
    %c1_205 = arith.constant 1 : index
    %c0_206 = arith.constant 0 : index
    %c0_207 = arith.constant 0 : index
    %448 = vector.load %arg4[%c1_205, %c0_206, %c0_207] : memref<16x16x2xf32, #tpu.memory_space<vmem>>, vector<1x16x2xf32>
    %449 = vector.shape_cast %448 : vector<1x16x2xf32> to vector<16x2xf32>
    %450 = vector.extract_strided_slice %432 {offsets = [1, 0], sizes = [1, 2], strides = [1, 1]} : vector<16x2xf32> to vector<1x2xf32>
    %451 = vector.broadcast %450 : vector<1x2xf32> to vector<16x2xf32>
    %452 = arith.mulf %449, %451 : vector<16x2xf32>
    %c2_208 = arith.constant 2 : index
    %c0_209 = arith.constant 0 : index
    %c0_210 = arith.constant 0 : index
    %453 = vector.load %arg4[%c2_208, %c0_209, %c0_210] : memref<16x16x2xf32, #tpu.memory_space<vmem>>, vector<1x16x2xf32>
    %454 = vector.shape_cast %453 : vector<1x16x2xf32> to vector<16x2xf32>
    %455 = vector.extract_strided_slice %432 {offsets = [2, 0], sizes = [1, 2], strides = [1, 1]} : vector<16x2xf32> to vector<1x2xf32>
    %456 = vector.broadcast %455 : vector<1x2xf32> to vector<16x2xf32>
    %457 = arith.mulf %454, %456 : vector<16x2xf32>
    %c3_211 = arith.constant 3 : index
    %c0_212 = arith.constant 0 : index
    %c0_213 = arith.constant 0 : index
    %458 = vector.load %arg4[%c3_211, %c0_212, %c0_213] : memref<16x16x2xf32, #tpu.memory_space<vmem>>, vector<1x16x2xf32>
    %459 = vector.shape_cast %458 : vector<1x16x2xf32> to vector<16x2xf32>
    %460 = vector.extract_strided_slice %432 {offsets = [3, 0], sizes = [1, 2], strides = [1, 1]} : vector<16x2xf32> to vector<1x2xf32>
    %461 = vector.broadcast %460 : vector<1x2xf32> to vector<16x2xf32>
    %462 = arith.mulf %459, %461 : vector<16x2xf32>
    %c4_214 = arith.constant 4 : index
    %c0_215 = arith.constant 0 : index
    %c0_216 = arith.constant 0 : index
    %463 = vector.load %arg4[%c4_214, %c0_215, %c0_216] : memref<16x16x2xf32, #tpu.memory_space<vmem>>, vector<1x16x2xf32>
    %464 = vector.shape_cast %463 : vector<1x16x2xf32> to vector<16x2xf32>
    %465 = vector.extract_strided_slice %432 {offsets = [4, 0], sizes = [1, 2], strides = [1, 1]} : vector<16x2xf32> to vector<1x2xf32>
    %466 = vector.broadcast %465 : vector<1x2xf32> to vector<16x2xf32>
    %467 = arith.mulf %464, %466 : vector<16x2xf32>
    %c5_217 = arith.constant 5 : index
    %c0_218 = arith.constant 0 : index
    %c0_219 = arith.constant 0 : index
    %468 = vector.load %arg4[%c5_217, %c0_218, %c0_219] : memref<16x16x2xf32, #tpu.memory_space<vmem>>, vector<1x16x2xf32>
    %469 = vector.shape_cast %468 : vector<1x16x2xf32> to vector<16x2xf32>
    %470 = vector.extract_strided_slice %432 {offsets = [5, 0], sizes = [1, 2], strides = [1, 1]} : vector<16x2xf32> to vector<1x2xf32>
    %471 = vector.broadcast %470 : vector<1x2xf32> to vector<16x2xf32>
    %472 = arith.mulf %469, %471 : vector<16x2xf32>
    %c6_220 = arith.constant 6 : index
    %c0_221 = arith.constant 0 : index
    %c0_222 = arith.constant 0 : index
    %473 = vector.load %arg4[%c6_220, %c0_221, %c0_222] : memref<16x16x2xf32, #tpu.memory_space<vmem>>, vector<1x16x2xf32>
    %474 = vector.shape_cast %473 : vector<1x16x2xf32> to vector<16x2xf32>
    %475 = vector.extract_strided_slice %432 {offsets = [6, 0], sizes = [1, 2], strides = [1, 1]} : vector<16x2xf32> to vector<1x2xf32>
    %476 = vector.broadcast %475 : vector<1x2xf32> to vector<16x2xf32>
    %477 = arith.mulf %474, %476 : vector<16x2xf32>
    %c7_223 = arith.constant 7 : index
    %c0_224 = arith.constant 0 : index
    %c0_225 = arith.constant 0 : index
    %478 = vector.load %arg4[%c7_223, %c0_224, %c0_225] : memref<16x16x2xf32, #tpu.memory_space<vmem>>, vector<1x16x2xf32>
    %479 = vector.shape_cast %478 : vector<1x16x2xf32> to vector<16x2xf32>
    %480 = vector.extract_strided_slice %432 {offsets = [7, 0], sizes = [1, 2], strides = [1, 1]} : vector<16x2xf32> to vector<1x2xf32>
    %481 = vector.broadcast %480 : vector<1x2xf32> to vector<16x2xf32>
    %482 = arith.mulf %479, %481 : vector<16x2xf32>
    %c8_226 = arith.constant 8 : index
    %c0_227 = arith.constant 0 : index
    %c0_228 = arith.constant 0 : index
    %483 = vector.load %arg4[%c8_226, %c0_227, %c0_228] : memref<16x16x2xf32, #tpu.memory_space<vmem>>, vector<1x16x2xf32>
    %484 = vector.shape_cast %483 : vector<1x16x2xf32> to vector<16x2xf32>
    %485 = vector.extract_strided_slice %432 {offsets = [8, 0], sizes = [1, 2], strides = [1, 1]} : vector<16x2xf32> to vector<1x2xf32>
    %486 = vector.broadcast %485 : vector<1x2xf32> to vector<16x2xf32>
    %487 = arith.mulf %484, %486 : vector<16x2xf32>
    %c9_229 = arith.constant 9 : index
    %c0_230 = arith.constant 0 : index
    %c0_231 = arith.constant 0 : index
    %488 = vector.load %arg4[%c9_229, %c0_230, %c0_231] : memref<16x16x2xf32, #tpu.memory_space<vmem>>, vector<1x16x2xf32>
    %489 = vector.shape_cast %488 : vector<1x16x2xf32> to vector<16x2xf32>
    %490 = vector.extract_strided_slice %432 {offsets = [9, 0], sizes = [1, 2], strides = [1, 1]} : vector<16x2xf32> to vector<1x2xf32>
    %491 = vector.broadcast %490 : vector<1x2xf32> to vector<16x2xf32>
    %492 = arith.mulf %489, %491 : vector<16x2xf32>
    %c10_232 = arith.constant 10 : index
    %c0_233 = arith.constant 0 : index
    %c0_234 = arith.constant 0 : index
    %493 = vector.load %arg4[%c10_232, %c0_233, %c0_234] : memref<16x16x2xf32, #tpu.memory_space<vmem>>, vector<1x16x2xf32>
    %494 = vector.shape_cast %493 : vector<1x16x2xf32> to vector<16x2xf32>
    %495 = vector.extract_strided_slice %432 {offsets = [10, 0], sizes = [1, 2], strides = [1, 1]} : vector<16x2xf32> to vector<1x2xf32>
    %496 = vector.broadcast %495 : vector<1x2xf32> to vector<16x2xf32>
    %497 = arith.mulf %494, %496 : vector<16x2xf32>
    %c11_235 = arith.constant 11 : index
    %c0_236 = arith.constant 0 : index
    %c0_237 = arith.constant 0 : index
    %498 = vector.load %arg4[%c11_235, %c0_236, %c0_237] : memref<16x16x2xf32, #tpu.memory_space<vmem>>, vector<1x16x2xf32>
    %499 = vector.shape_cast %498 : vector<1x16x2xf32> to vector<16x2xf32>
    %500 = vector.extract_strided_slice %432 {offsets = [11, 0], sizes = [1, 2], strides = [1, 1]} : vector<16x2xf32> to vector<1x2xf32>
    %501 = vector.broadcast %500 : vector<1x2xf32> to vector<16x2xf32>
    %502 = arith.mulf %499, %501 : vector<16x2xf32>
    %c12_238 = arith.constant 12 : index
    %c0_239 = arith.constant 0 : index
    %c0_240 = arith.constant 0 : index
    %503 = vector.load %arg4[%c12_238, %c0_239, %c0_240] : memref<16x16x2xf32, #tpu.memory_space<vmem>>, vector<1x16x2xf32>
    %504 = vector.shape_cast %503 : vector<1x16x2xf32> to vector<16x2xf32>
    %505 = vector.extract_strided_slice %432 {offsets = [12, 0], sizes = [1, 2], strides = [1, 1]} : vector<16x2xf32> to vector<1x2xf32>
    %506 = vector.broadcast %505 : vector<1x2xf32> to vector<16x2xf32>
    %507 = arith.mulf %504, %506 : vector<16x2xf32>
    %c13_241 = arith.constant 13 : index
    %c0_242 = arith.constant 0 : index
    %c0_243 = arith.constant 0 : index
    %508 = vector.load %arg4[%c13_241, %c0_242, %c0_243] : memref<16x16x2xf32, #tpu.memory_space<vmem>>, vector<1x16x2xf32>
    %509 = vector.shape_cast %508 : vector<1x16x2xf32> to vector<16x2xf32>
    %510 = vector.extract_strided_slice %432 {offsets = [13, 0], sizes = [1, 2], strides = [1, 1]} : vector<16x2xf32> to vector<1x2xf32>
    %511 = vector.broadcast %510 : vector<1x2xf32> to vector<16x2xf32>
    %512 = arith.mulf %509, %511 : vector<16x2xf32>
    %c14_244 = arith.constant 14 : index
    %c0_245 = arith.constant 0 : index
    %c0_246 = arith.constant 0 : index
    %513 = vector.load %arg4[%c14_244, %c0_245, %c0_246] : memref<16x16x2xf32, #tpu.memory_space<vmem>>, vector<1x16x2xf32>
    %514 = vector.shape_cast %513 : vector<1x16x2xf32> to vector<16x2xf32>
    %515 = vector.extract_strided_slice %432 {offsets = [14, 0], sizes = [1, 2], strides = [1, 1]} : vector<16x2xf32> to vector<1x2xf32>
    %516 = vector.broadcast %515 : vector<1x2xf32> to vector<16x2xf32>
    %517 = arith.mulf %514, %516 : vector<16x2xf32>
    %c15_247 = arith.constant 15 : index
    %c0_248 = arith.constant 0 : index
    %c0_249 = arith.constant 0 : index
    %518 = vector.load %arg4[%c15_247, %c0_248, %c0_249] : memref<16x16x2xf32, #tpu.memory_space<vmem>>, vector<1x16x2xf32>
    %519 = vector.shape_cast %518 : vector<1x16x2xf32> to vector<16x2xf32>
    %520 = vector.extract_strided_slice %432 {offsets = [15, 0], sizes = [1, 2], strides = [1, 1]} : vector<16x2xf32> to vector<1x2xf32>
    %521 = vector.broadcast %520 : vector<1x2xf32> to vector<16x2xf32>
    %522 = arith.mulf %519, %521 : vector<16x2xf32>
    %523 = arith.addf %447, %452 : vector<16x2xf32>
    %524 = arith.addf %457, %462 : vector<16x2xf32>
    %525 = arith.addf %467, %472 : vector<16x2xf32>
    %526 = arith.addf %477, %482 : vector<16x2xf32>
    %527 = arith.addf %487, %492 : vector<16x2xf32>
    %528 = arith.addf %497, %502 : vector<16x2xf32>
    %529 = arith.addf %507, %512 : vector<16x2xf32>
    %530 = arith.addf %517, %522 : vector<16x2xf32>
    %531 = arith.addf %523, %524 : vector<16x2xf32>
    %532 = arith.addf %525, %526 : vector<16x2xf32>
    %533 = arith.addf %527, %528 : vector<16x2xf32>
    %534 = arith.addf %529, %530 : vector<16x2xf32>
    %535 = arith.addf %531, %532 : vector<16x2xf32>
    %536 = arith.addf %533, %534 : vector<16x2xf32>
    %537 = arith.addf %535, %536 : vector<16x2xf32>
    %538 = arith.addf %442, %537 : vector<16x2xf32>
    %539 = math.tanh %538 : vector<16x2xf32>
    %540 = arith.mulf %8, %539 : vector<16x2xf32>
    %cst_250 = arith.constant dense<0.000000e+00> : vector<2xf32>
    %541 = vector.multi_reduction <add>, %540, %cst_250 [0] : vector<16x2xf32> to vector<2xf32>
    %542 = vector.shape_cast %541 : vector<2xf32> to vector<1x2xf32>
    %543 = arith.index_cast %c4_i32 : i32 to index
    %c0_251 = arith.constant 0 : index
    %544 = vector.load %arg14[%543, %c0_251] : memref<8x2xf32, #tpu.memory_space<vmem>>, vector<1x2xf32>
    tpu.vector_store %arg14[%543, %c0_251], %542 {strides = array<i32>} : memref<8x2xf32, #tpu.memory_space<vmem>>, vector<1x2xf32>,
    %c5_i32 = arith.constant 5 : i32
    %545 = arith.index_cast %c5_i32 : i32 to index
    %c0_252 = arith.constant 0 : index
    %546 = vector.load %arg13[%545, %c0_252] : memref<8x2xf32, #tpu.memory_space<vmem>>, vector<1x2xf32>
    %547 = vector.broadcast %546 : vector<1x2xf32> to vector<16x2xf32>
    %548 = arith.mulf %6, %547 : vector<16x2xf32>
    %549 = arith.addf %548, %7 : vector<16x2xf32>
    %c0_253 = arith.constant 0 : index
    %c0_254 = arith.constant 0 : index
    %c0_255 = arith.constant 0 : index
    %550 = vector.load %arg4[%c0_253, %c0_254, %c0_255] : memref<16x16x2xf32, #tpu.memory_space<vmem>>, vector<1x16x2xf32>
    %551 = vector.shape_cast %550 : vector<1x16x2xf32> to vector<16x2xf32>
    %552 = vector.extract_strided_slice %539 {offsets = [0, 0], sizes = [1, 2], strides = [1, 1]} : vector<16x2xf32> to vector<1x2xf32>
    %553 = vector.broadcast %552 : vector<1x2xf32> to vector<16x2xf32>
    %554 = arith.mulf %551, %553 : vector<16x2xf32>
    %c1_256 = arith.constant 1 : index
    %c0_257 = arith.constant 0 : index
    %c0_258 = arith.constant 0 : index
    %555 = vector.load %arg4[%c1_256, %c0_257, %c0_258] : memref<16x16x2xf32, #tpu.memory_space<vmem>>, vector<1x16x2xf32>
    %556 = vector.shape_cast %555 : vector<1x16x2xf32> to vector<16x2xf32>
    %557 = vector.extract_strided_slice %539 {offsets = [1, 0], sizes = [1, 2], strides = [1, 1]} : vector<16x2xf32> to vector<1x2xf32>
    %558 = vector.broadcast %557 : vector<1x2xf32> to vector<16x2xf32>
    %559 = arith.mulf %556, %558 : vector<16x2xf32>
    %c2_259 = arith.constant 2 : index
    %c0_260 = arith.constant 0 : index
    %c0_261 = arith.constant 0 : index
    %560 = vector.load %arg4[%c2_259, %c0_260, %c0_261] : memref<16x16x2xf32, #tpu.memory_space<vmem>>, vector<1x16x2xf32>
    %561 = vector.shape_cast %560 : vector<1x16x2xf32> to vector<16x2xf32>
    %562 = vector.extract_strided_slice %539 {offsets = [2, 0], sizes = [1, 2], strides = [1, 1]} : vector<16x2xf32> to vector<1x2xf32>
    %563 = vector.broadcast %562 : vector<1x2xf32> to vector<16x2xf32>
    %564 = arith.mulf %561, %563 : vector<16x2xf32>
    %c3_262 = arith.constant 3 : index
    %c0_263 = arith.constant 0 : index
    %c0_264 = arith.constant 0 : index
    %565 = vector.load %arg4[%c3_262, %c0_263, %c0_264] : memref<16x16x2xf32, #tpu.memory_space<vmem>>, vector<1x16x2xf32>
    %566 = vector.shape_cast %565 : vector<1x16x2xf32> to vector<16x2xf32>
    %567 = vector.extract_strided_slice %539 {offsets = [3, 0], sizes = [1, 2], strides = [1, 1]} : vector<16x2xf32> to vector<1x2xf32>
    %568 = vector.broadcast %567 : vector<1x2xf32> to vector<16x2xf32>
    %569 = arith.mulf %566, %568 : vector<16x2xf32>
    %c4_265 = arith.constant 4 : index
    %c0_266 = arith.constant 0 : index
    %c0_267 = arith.constant 0 : index
    %570 = vector.load %arg4[%c4_265, %c0_266, %c0_267] : memref<16x16x2xf32, #tpu.memory_space<vmem>>, vector<1x16x2xf32>
    %571 = vector.shape_cast %570 : vector<1x16x2xf32> to vector<16x2xf32>
    %572 = vector.extract_strided_slice %539 {offsets = [4, 0], sizes = [1, 2], strides = [1, 1]} : vector<16x2xf32> to vector<1x2xf32>
    %573 = vector.broadcast %572 : vector<1x2xf32> to vector<16x2xf32>
    %574 = arith.mulf %571, %573 : vector<16x2xf32>
    %c5_268 = arith.constant 5 : index
    %c0_269 = arith.constant 0 : index
    %c0_270 = arith.constant 0 : index
    %575 = vector.load %arg4[%c5_268, %c0_269, %c0_270] : memref<16x16x2xf32, #tpu.memory_space<vmem>>, vector<1x16x2xf32>
    %576 = vector.shape_cast %575 : vector<1x16x2xf32> to vector<16x2xf32>
    %577 = vector.extract_strided_slice %539 {offsets = [5, 0], sizes = [1, 2], strides = [1, 1]} : vector<16x2xf32> to vector<1x2xf32>
    %578 = vector.broadcast %577 : vector<1x2xf32> to vector<16x2xf32>
    %579 = arith.mulf %576, %578 : vector<16x2xf32>
    %c6_271 = arith.constant 6 : index
    %c0_272 = arith.constant 0 : index
    %c0_273 = arith.constant 0 : index
    %580 = vector.load %arg4[%c6_271, %c0_272, %c0_273] : memref<16x16x2xf32, #tpu.memory_space<vmem>>, vector<1x16x2xf32>
    %581 = vector.shape_cast %580 : vector<1x16x2xf32> to vector<16x2xf32>
    %582 = vector.extract_strided_slice %539 {offsets = [6, 0], sizes = [1, 2], strides = [1, 1]} : vector<16x2xf32> to vector<1x2xf32>
    %583 = vector.broadcast %582 : vector<1x2xf32> to vector<16x2xf32>
    %584 = arith.mulf %581, %583 : vector<16x2xf32>
    %c7_274 = arith.constant 7 : index
    %c0_275 = arith.constant 0 : index
    %c0_276 = arith.constant 0 : index
    %585 = vector.load %arg4[%c7_274, %c0_275, %c0_276] : memref<16x16x2xf32, #tpu.memory_space<vmem>>, vector<1x16x2xf32>
    %586 = vector.shape_cast %585 : vector<1x16x2xf32> to vector<16x2xf32>
    %587 = vector.extract_strided_slice %539 {offsets = [7, 0], sizes = [1, 2], strides = [1, 1]} : vector<16x2xf32> to vector<1x2xf32>
    %588 = vector.broadcast %587 : vector<1x2xf32> to vector<16x2xf32>
    %589 = arith.mulf %586, %588 : vector<16x2xf32>
    %c8_277 = arith.constant 8 : index
    %c0_278 = arith.constant 0 : index
    %c0_279 = arith.constant 0 : index
    %590 = vector.load %arg4[%c8_277, %c0_278, %c0_279] : memref<16x16x2xf32, #tpu.memory_space<vmem>>, vector<1x16x2xf32>
    %591 = vector.shape_cast %590 : vector<1x16x2xf32> to vector<16x2xf32>
    %592 = vector.extract_strided_slice %539 {offsets = [8, 0], sizes = [1, 2], strides = [1, 1]} : vector<16x2xf32> to vector<1x2xf32>
    %593 = vector.broadcast %592 : vector<1x2xf32> to vector<16x2xf32>
    %594 = arith.mulf %591, %593 : vector<16x2xf32>
    %c9_280 = arith.constant 9 : index
    %c0_281 = arith.constant 0 : index
    %c0_282 = arith.constant 0 : index
    %595 = vector.load %arg4[%c9_280, %c0_281, %c0_282] : memref<16x16x2xf32, #tpu.memory_space<vmem>>, vector<1x16x2xf32>
    %596 = vector.shape_cast %595 : vector<1x16x2xf32> to vector<16x2xf32>
    %597 = vector.extract_strided_slice %539 {offsets = [9, 0], sizes = [1, 2], strides = [1, 1]} : vector<16x2xf32> to vector<1x2xf32>
    %598 = vector.broadcast %597 : vector<1x2xf32> to vector<16x2xf32>
    %599 = arith.mulf %596, %598 : vector<16x2xf32>
    %c10_283 = arith.constant 10 : index
    %c0_284 = arith.constant 0 : index
    %c0_285 = arith.constant 0 : index
    %600 = vector.load %arg4[%c10_283, %c0_284, %c0_285] : memref<16x16x2xf32, #tpu.memory_space<vmem>>, vector<1x16x2xf32>
    %601 = vector.shape_cast %600 : vector<1x16x2xf32> to vector<16x2xf32>
    %602 = vector.extract_strided_slice %539 {offsets = [10, 0], sizes = [1, 2], strides = [1, 1]} : vector<16x2xf32> to vector<1x2xf32>
    %603 = vector.broadcast %602 : vector<1x2xf32> to vector<16x2xf32>
    %604 = arith.mulf %601, %603 : vector<16x2xf32>
    %c11_286 = arith.constant 11 : index
    %c0_287 = arith.constant 0 : index
    %c0_288 = arith.constant 0 : index
    %605 = vector.load %arg4[%c11_286, %c0_287, %c0_288] : memref<16x16x2xf32, #tpu.memory_space<vmem>>, vector<1x16x2xf32>
    %606 = vector.shape_cast %605 : vector<1x16x2xf32> to vector<16x2xf32>
    %607 = vector.extract_strided_slice %539 {offsets = [11, 0], sizes = [1, 2], strides = [1, 1]} : vector<16x2xf32> to vector<1x2xf32>
    %608 = vector.broadcast %607 : vector<1x2xf32> to vector<16x2xf32>
    %609 = arith.mulf %606, %608 : vector<16x2xf32>
    %c12_289 = arith.constant 12 : index
    %c0_290 = arith.constant 0 : index
    %c0_291 = arith.constant 0 : index
    %610 = vector.load %arg4[%c12_289, %c0_290, %c0_291] : memref<16x16x2xf32, #tpu.memory_space<vmem>>, vector<1x16x2xf32>
    %611 = vector.shape_cast %610 : vector<1x16x2xf32> to vector<16x2xf32>
    %612 = vector.extract_strided_slice %539 {offsets = [12, 0], sizes = [1, 2], strides = [1, 1]} : vector<16x2xf32> to vector<1x2xf32>
    %613 = vector.broadcast %612 : vector<1x2xf32> to vector<16x2xf32>
    %614 = arith.mulf %611, %613 : vector<16x2xf32>
    %c13_292 = arith.constant 13 : index
    %c0_293 = arith.constant 0 : index
    %c0_294 = arith.constant 0 : index
    %615 = vector.load %arg4[%c13_292, %c0_293, %c0_294] : memref<16x16x2xf32, #tpu.memory_space<vmem>>, vector<1x16x2xf32>
    %616 = vector.shape_cast %615 : vector<1x16x2xf32> to vector<16x2xf32>
    %617 = vector.extract_strided_slice %539 {offsets = [13, 0], sizes = [1, 2], strides = [1, 1]} : vector<16x2xf32> to vector<1x2xf32>
    %618 = vector.broadcast %617 : vector<1x2xf32> to vector<16x2xf32>
    %619 = arith.mulf %616, %618 : vector<16x2xf32>
    %c14_295 = arith.constant 14 : index
    %c0_296 = arith.constant 0 : index
    %c0_297 = arith.constant 0 : index
    %620 = vector.load %arg4[%c14_295, %c0_296, %c0_297] : memref<16x16x2xf32, #tpu.memory_space<vmem>>, vector<1x16x2xf32>
    %621 = vector.shape_cast %620 : vector<1x16x2xf32> to vector<16x2xf32>
    %622 = vector.extract_strided_slice %539 {offsets = [14, 0], sizes = [1, 2], strides = [1, 1]} : vector<16x2xf32> to vector<1x2xf32>
    %623 = vector.broadcast %622 : vector<1x2xf32> to vector<16x2xf32>
    %624 = arith.mulf %621, %623 : vector<16x2xf32>
    %c15_298 = arith.constant 15 : index
    %c0_299 = arith.constant 0 : index
    %c0_300 = arith.constant 0 : index
    %625 = vector.load %arg4[%c15_298, %c0_299, %c0_300] : memref<16x16x2xf32, #tpu.memory_space<vmem>>, vector<1x16x2xf32>
    %626 = vector.shape_cast %625 : vector<1x16x2xf32> to vector<16x2xf32>
    %627 = vector.extract_strided_slice %539 {offsets = [15, 0], sizes = [1, 2], strides = [1, 1]} : vector<16x2xf32> to vector<1x2xf32>
    %628 = vector.broadcast %627 : vector<1x2xf32> to vector<16x2xf32>
    %629 = arith.mulf %626, %628 : vector<16x2xf32>
    %630 = arith.addf %554, %559 : vector<16x2xf32>
    %631 = arith.addf %564, %569 : vector<16x2xf32>
    %632 = arith.addf %574, %579 : vector<16x2xf32>
    %633 = arith.addf %584, %589 : vector<16x2xf32>
    %634 = arith.addf %594, %599 : vector<16x2xf32>
    %635 = arith.addf %604, %609 : vector<16x2xf32>
    %636 = arith.addf %614, %619 : vector<16x2xf32>
    %637 = arith.addf %624, %629 : vector<16x2xf32>
    %638 = arith.addf %630, %631 : vector<16x2xf32>
    %639 = arith.addf %632, %633 : vector<16x2xf32>
    %640 = arith.addf %634, %635 : vector<16x2xf32>
    %641 = arith.addf %636, %637 : vector<16x2xf32>
    %642 = arith.addf %638, %639 : vector<16x2xf32>
    %643 = arith.addf %640, %641 : vector<16x2xf32>
    %644 = arith.addf %642, %643 : vector<16x2xf32>
    %645 = arith.addf %549, %644 : vector<16x2xf32>
    %646 = math.tanh %645 : vector<16x2xf32>
    %647 = arith.mulf %8, %646 : vector<16x2xf32>
    %cst_301 = arith.constant dense<0.000000e+00> : vector<2xf32>
    %648 = vector.multi_reduction <add>, %647, %cst_301 [0] : vector<16x2xf32> to vector<2xf32>
    %649 = vector.shape_cast %648 : vector<2xf32> to vector<1x2xf32>
    %650 = arith.index_cast %c5_i32 : i32 to index
    %c0_302 = arith.constant 0 : index
    %651 = vector.load %arg14[%650, %c0_302] : memref<8x2xf32, #tpu.memory_space<vmem>>, vector<1x2xf32>
    tpu.vector_store %arg14[%650, %c0_302], %649 {strides = array<i32>} : memref<8x2xf32, #tpu.memory_space<vmem>>, vector<1x2xf32>,
    %c6_i32 = arith.constant 6 : i32
    %652 = arith.index_cast %c6_i32 : i32 to index
    %c0_303 = arith.constant 0 : index
    %653 = vector.load %arg13[%652, %c0_303] : memref<8x2xf32, #tpu.memory_space<vmem>>, vector<1x2xf32>
    %654 = vector.broadcast %653 : vector<1x2xf32> to vector<16x2xf32>
    %655 = arith.mulf %6, %654 : vector<16x2xf32>
    %656 = arith.addf %655, %7 : vector<16x2xf32>
    %c0_304 = arith.constant 0 : index
    %c0_305 = arith.constant 0 : index
    %c0_306 = arith.constant 0 : index
    %657 = vector.load %arg4[%c0_304, %c0_305, %c0_306] : memref<16x16x2xf32, #tpu.memory_space<vmem>>, vector<1x16x2xf32>
    %658 = vector.shape_cast %657 : vector<1x16x2xf32> to vector<16x2xf32>
    %659 = vector.extract_strided_slice %646 {offsets = [0, 0], sizes = [1, 2], strides = [1, 1]} : vector<16x2xf32> to vector<1x2xf32>
    %660 = vector.broadcast %659 : vector<1x2xf32> to vector<16x2xf32>
    %661 = arith.mulf %658, %660 : vector<16x2xf32>
    %c1_307 = arith.constant 1 : index
    %c0_308 = arith.constant 0 : index
    %c0_309 = arith.constant 0 : index
    %662 = vector.load %arg4[%c1_307, %c0_308, %c0_309] : memref<16x16x2xf32, #tpu.memory_space<vmem>>, vector<1x16x2xf32>
    %663 = vector.shape_cast %662 : vector<1x16x2xf32> to vector<16x2xf32>
    %664 = vector.extract_strided_slice %646 {offsets = [1, 0], sizes = [1, 2], strides = [1, 1]} : vector<16x2xf32> to vector<1x2xf32>
    %665 = vector.broadcast %664 : vector<1x2xf32> to vector<16x2xf32>
    %666 = arith.mulf %663, %665 : vector<16x2xf32>
    %c2_310 = arith.constant 2 : index
    %c0_311 = arith.constant 0 : index
    %c0_312 = arith.constant 0 : index
    %667 = vector.load %arg4[%c2_310, %c0_311, %c0_312] : memref<16x16x2xf32, #tpu.memory_space<vmem>>, vector<1x16x2xf32>
    %668 = vector.shape_cast %667 : vector<1x16x2xf32> to vector<16x2xf32>
    %669 = vector.extract_strided_slice %646 {offsets = [2, 0], sizes = [1, 2], strides = [1, 1]} : vector<16x2xf32> to vector<1x2xf32>
    %670 = vector.broadcast %669 : vector<1x2xf32> to vector<16x2xf32>
    %671 = arith.mulf %668, %670 : vector<16x2xf32>
    %c3_313 = arith.constant 3 : index
    %c0_314 = arith.constant 0 : index
    %c0_315 = arith.constant 0 : index
    %672 = vector.load %arg4[%c3_313, %c0_314, %c0_315] : memref<16x16x2xf32, #tpu.memory_space<vmem>>, vector<1x16x2xf32>
    %673 = vector.shape_cast %672 : vector<1x16x2xf32> to vector<16x2xf32>
    %674 = vector.extract_strided_slice %646 {offsets = [3, 0], sizes = [1, 2], strides = [1, 1]} : vector<16x2xf32> to vector<1x2xf32>
    %675 = vector.broadcast %674 : vector<1x2xf32> to vector<16x2xf32>
    %676 = arith.mulf %673, %675 : vector<16x2xf32>
    %c4_316 = arith.constant 4 : index
    %c0_317 = arith.constant 0 : index
    %c0_318 = arith.constant 0 : index
    %677 = vector.load %arg4[%c4_316, %c0_317, %c0_318] : memref<16x16x2xf32, #tpu.memory_space<vmem>>, vector<1x16x2xf32>
    %678 = vector.shape_cast %677 : vector<1x16x2xf32> to vector<16x2xf32>
    %679 = vector.extract_strided_slice %646 {offsets = [4, 0], sizes = [1, 2], strides = [1, 1]} : vector<16x2xf32> to vector<1x2xf32>
    %680 = vector.broadcast %679 : vector<1x2xf32> to vector<16x2xf32>
    %681 = arith.mulf %678, %680 : vector<16x2xf32>
    %c5_319 = arith.constant 5 : index
    %c0_320 = arith.constant 0 : index
    %c0_321 = arith.constant 0 : index
    %682 = vector.load %arg4[%c5_319, %c0_320, %c0_321] : memref<16x16x2xf32, #tpu.memory_space<vmem>>, vector<1x16x2xf32>
    %683 = vector.shape_cast %682 : vector<1x16x2xf32> to vector<16x2xf32>
    %684 = vector.extract_strided_slice %646 {offsets = [5, 0], sizes = [1, 2], strides = [1, 1]} : vector<16x2xf32> to vector<1x2xf32>
    %685 = vector.broadcast %684 : vector<1x2xf32> to vector<16x2xf32>
    %686 = arith.mulf %683, %685 : vector<16x2xf32>
    %c6_322 = arith.constant 6 : index
    %c0_323 = arith.constant 0 : index
    %c0_324 = arith.constant 0 : index
    %687 = vector.load %arg4[%c6_322, %c0_323, %c0_324] : memref<16x16x2xf32, #tpu.memory_space<vmem>>, vector<1x16x2xf32>
    %688 = vector.shape_cast %687 : vector<1x16x2xf32> to vector<16x2xf32>
    %689 = vector.extract_strided_slice %646 {offsets = [6, 0], sizes = [1, 2], strides = [1, 1]} : vector<16x2xf32> to vector<1x2xf32>
    %690 = vector.broadcast %689 : vector<1x2xf32> to vector<16x2xf32>
    %691 = arith.mulf %688, %690 : vector<16x2xf32>
    %c7_325 = arith.constant 7 : index
    %c0_326 = arith.constant 0 : index
    %c0_327 = arith.constant 0 : index
    %692 = vector.load %arg4[%c7_325, %c0_326, %c0_327] : memref<16x16x2xf32, #tpu.memory_space<vmem>>, vector<1x16x2xf32>
    %693 = vector.shape_cast %692 : vector<1x16x2xf32> to vector<16x2xf32>
    %694 = vector.extract_strided_slice %646 {offsets = [7, 0], sizes = [1, 2], strides = [1, 1]} : vector<16x2xf32> to vector<1x2xf32>
    %695 = vector.broadcast %694 : vector<1x2xf32> to vector<16x2xf32>
    %696 = arith.mulf %693, %695 : vector<16x2xf32>
    %c8_328 = arith.constant 8 : index
    %c0_329 = arith.constant 0 : index
    %c0_330 = arith.constant 0 : index
    %697 = vector.load %arg4[%c8_328, %c0_329, %c0_330] : memref<16x16x2xf32, #tpu.memory_space<vmem>>, vector<1x16x2xf32>
    %698 = vector.shape_cast %697 : vector<1x16x2xf32> to vector<16x2xf32>
    %699 = vector.extract_strided_slice %646 {offsets = [8, 0], sizes = [1, 2], strides = [1, 1]} : vector<16x2xf32> to vector<1x2xf32>
    %700 = vector.broadcast %699 : vector<1x2xf32> to vector<16x2xf32>
    %701 = arith.mulf %698, %700 : vector<16x2xf32>
    %c9_331 = arith.constant 9 : index
    %c0_332 = arith.constant 0 : index
    %c0_333 = arith.constant 0 : index
    %702 = vector.load %arg4[%c9_331, %c0_332, %c0_333] : memref<16x16x2xf32, #tpu.memory_space<vmem>>, vector<1x16x2xf32>
    %703 = vector.shape_cast %702 : vector<1x16x2xf32> to vector<16x2xf32>
    %704 = vector.extract_strided_slice %646 {offsets = [9, 0], sizes = [1, 2], strides = [1, 1]} : vector<16x2xf32> to vector<1x2xf32>
    %705 = vector.broadcast %704 : vector<1x2xf32> to vector<16x2xf32>
    %706 = arith.mulf %703, %705 : vector<16x2xf32>
    %c10_334 = arith.constant 10 : index
    %c0_335 = arith.constant 0 : index
    %c0_336 = arith.constant 0 : index
    %707 = vector.load %arg4[%c10_334, %c0_335, %c0_336] : memref<16x16x2xf32, #tpu.memory_space<vmem>>, vector<1x16x2xf32>
    %708 = vector.shape_cast %707 : vector<1x16x2xf32> to vector<16x2xf32>
    %709 = vector.extract_strided_slice %646 {offsets = [10, 0], sizes = [1, 2], strides = [1, 1]} : vector<16x2xf32> to vector<1x2xf32>
    %710 = vector.broadcast %709 : vector<1x2xf32> to vector<16x2xf32>
    %711 = arith.mulf %708, %710 : vector<16x2xf32>
    %c11_337 = arith.constant 11 : index
    %c0_338 = arith.constant 0 : index
    %c0_339 = arith.constant 0 : index
    %712 = vector.load %arg4[%c11_337, %c0_338, %c0_339] : memref<16x16x2xf32, #tpu.memory_space<vmem>>, vector<1x16x2xf32>
    %713 = vector.shape_cast %712 : vector<1x16x2xf32> to vector<16x2xf32>
    %714 = vector.extract_strided_slice %646 {offsets = [11, 0], sizes = [1, 2], strides = [1, 1]} : vector<16x2xf32> to vector<1x2xf32>
    %715 = vector.broadcast %714 : vector<1x2xf32> to vector<16x2xf32>
    %716 = arith.mulf %713, %715 : vector<16x2xf32>
    %c12_340 = arith.constant 12 : index
    %c0_341 = arith.constant 0 : index
    %c0_342 = arith.constant 0 : index
    %717 = vector.load %arg4[%c12_340, %c0_341, %c0_342] : memref<16x16x2xf32, #tpu.memory_space<vmem>>, vector<1x16x2xf32>
    %718 = vector.shape_cast %717 : vector<1x16x2xf32> to vector<16x2xf32>
    %719 = vector.extract_strided_slice %646 {offsets = [12, 0], sizes = [1, 2], strides = [1, 1]} : vector<16x2xf32> to vector<1x2xf32>
    %720 = vector.broadcast %719 : vector<1x2xf32> to vector<16x2xf32>
    %721 = arith.mulf %718, %720 : vector<16x2xf32>
    %c13_343 = arith.constant 13 : index
    %c0_344 = arith.constant 0 : index
    %c0_345 = arith.constant 0 : index
    %722 = vector.load %arg4[%c13_343, %c0_344, %c0_345] : memref<16x16x2xf32, #tpu.memory_space<vmem>>, vector<1x16x2xf32>
    %723 = vector.shape_cast %722 : vector<1x16x2xf32> to vector<16x2xf32>
    %724 = vector.extract_strided_slice %646 {offsets = [13, 0], sizes = [1, 2], strides = [1, 1]} : vector<16x2xf32> to vector<1x2xf32>
    %725 = vector.broadcast %724 : vector<1x2xf32> to vector<16x2xf32>
    %726 = arith.mulf %723, %725 : vector<16x2xf32>
    %c14_346 = arith.constant 14 : index
    %c0_347 = arith.constant 0 : index
    %c0_348 = arith.constant 0 : index
    %727 = vector.load %arg4[%c14_346, %c0_347, %c0_348] : memref<16x16x2xf32, #tpu.memory_space<vmem>>, vector<1x16x2xf32>
    %728 = vector.shape_cast %727 : vector<1x16x2xf32> to vector<16x2xf32>
    %729 = vector.extract_strided_slice %646 {offsets = [14, 0], sizes = [1, 2], strides = [1, 1]} : vector<16x2xf32> to vector<1x2xf32>
    %730 = vector.broadcast %729 : vector<1x2xf32> to vector<16x2xf32>
    %731 = arith.mulf %728, %730 : vector<16x2xf32>
    %c15_349 = arith.constant 15 : index
    %c0_350 = arith.constant 0 : index
    %c0_351 = arith.constant 0 : index
    %732 = vector.load %arg4[%c15_349, %c0_350, %c0_351] : memref<16x16x2xf32, #tpu.memory_space<vmem>>, vector<1x16x2xf32>
    %733 = vector.shape_cast %732 : vector<1x16x2xf32> to vector<16x2xf32>
    %734 = vector.extract_strided_slice %646 {offsets = [15, 0], sizes = [1, 2], strides = [1, 1]} : vector<16x2xf32> to vector<1x2xf32>
    %735 = vector.broadcast %734 : vector<1x2xf32> to vector<16x2xf32>
    %736 = arith.mulf %733, %735 : vector<16x2xf32>
    %737 = arith.addf %661, %666 : vector<16x2xf32>
    %738 = arith.addf %671, %676 : vector<16x2xf32>
    %739 = arith.addf %681, %686 : vector<16x2xf32>
    %740 = arith.addf %691, %696 : vector<16x2xf32>
    %741 = arith.addf %701, %706 : vector<16x2xf32>
    %742 = arith.addf %711, %716 : vector<16x2xf32>
    %743 = arith.addf %721, %726 : vector<16x2xf32>
    %744 = arith.addf %731, %736 : vector<16x2xf32>
    %745 = arith.addf %737, %738 : vector<16x2xf32>
    %746 = arith.addf %739, %740 : vector<16x2xf32>
    %747 = arith.addf %741, %742 : vector<16x2xf32>
    %748 = arith.addf %743, %744 : vector<16x2xf32>
    %749 = arith.addf %745, %746 : vector<16x2xf32>
    %750 = arith.addf %747, %748 : vector<16x2xf32>
    %751 = arith.addf %749, %750 : vector<16x2xf32>
    %752 = arith.addf %656, %751 : vector<16x2xf32>
    %753 = math.tanh %752 : vector<16x2xf32>
    %754 = arith.mulf %8, %753 : vector<16x2xf32>
    %cst_352 = arith.constant dense<0.000000e+00> : vector<2xf32>
    %755 = vector.multi_reduction <add>, %754, %cst_352 [0] : vector<16x2xf32> to vector<2xf32>
    %756 = vector.shape_cast %755 : vector<2xf32> to vector<1x2xf32>
    %757 = arith.index_cast %c6_i32 : i32 to index
    %c0_353 = arith.constant 0 : index
    %758 = vector.load %arg14[%757, %c0_353] : memref<8x2xf32, #tpu.memory_space<vmem>>, vector<1x2xf32>
    tpu.vector_store %arg14[%757, %c0_353], %756 {strides = array<i32>} : memref<8x2xf32, #tpu.memory_space<vmem>>, vector<1x2xf32>,
    %c7_i32 = arith.constant 7 : i32
    %759 = arith.index_cast %c7_i32 : i32 to index
    %c0_354 = arith.constant 0 : index
    %760 = vector.load %arg13[%759, %c0_354] : memref<8x2xf32, #tpu.memory_space<vmem>>, vector<1x2xf32>
    %761 = vector.broadcast %760 : vector<1x2xf32> to vector<16x2xf32>
    %762 = arith.mulf %6, %761 : vector<16x2xf32>
    %763 = arith.addf %762, %7 : vector<16x2xf32>
    %c0_355 = arith.constant 0 : index
    %c0_356 = arith.constant 0 : index
    %c0_357 = arith.constant 0 : index
    %764 = vector.load %arg4[%c0_355, %c0_356, %c0_357] : memref<16x16x2xf32, #tpu.memory_space<vmem>>, vector<1x16x2xf32>
    %765 = vector.shape_cast %764 : vector<1x16x2xf32> to vector<16x2xf32>
    %766 = vector.extract_strided_slice %753 {offsets = [0, 0], sizes = [1, 2], strides = [1, 1]} : vector<16x2xf32> to vector<1x2xf32>
    %767 = vector.broadcast %766 : vector<1x2xf32> to vector<16x2xf32>
    %768 = arith.mulf %765, %767 : vector<16x2xf32>
    %c1_358 = arith.constant 1 : index
    %c0_359 = arith.constant 0 : index
    %c0_360 = arith.constant 0 : index
    %769 = vector.load %arg4[%c1_358, %c0_359, %c0_360] : memref<16x16x2xf32, #tpu.memory_space<vmem>>, vector<1x16x2xf32>
    %770 = vector.shape_cast %769 : vector<1x16x2xf32> to vector<16x2xf32>
    %771 = vector.extract_strided_slice %753 {offsets = [1, 0], sizes = [1, 2], strides = [1, 1]} : vector<16x2xf32> to vector<1x2xf32>
    %772 = vector.broadcast %771 : vector<1x2xf32> to vector<16x2xf32>
    %773 = arith.mulf %770, %772 : vector<16x2xf32>
    %c2_361 = arith.constant 2 : index
    %c0_362 = arith.constant 0 : index
    %c0_363 = arith.constant 0 : index
    %774 = vector.load %arg4[%c2_361, %c0_362, %c0_363] : memref<16x16x2xf32, #tpu.memory_space<vmem>>, vector<1x16x2xf32>
    %775 = vector.shape_cast %774 : vector<1x16x2xf32> to vector<16x2xf32>
    %776 = vector.extract_strided_slice %753 {offsets = [2, 0], sizes = [1, 2], strides = [1, 1]} : vector<16x2xf32> to vector<1x2xf32>
    %777 = vector.broadcast %776 : vector<1x2xf32> to vector<16x2xf32>
    %778 = arith.mulf %775, %777 : vector<16x2xf32>
    %c3_364 = arith.constant 3 : index
    %c0_365 = arith.constant 0 : index
    %c0_366 = arith.constant 0 : index
    %779 = vector.load %arg4[%c3_364, %c0_365, %c0_366] : memref<16x16x2xf32, #tpu.memory_space<vmem>>, vector<1x16x2xf32>
    %780 = vector.shape_cast %779 : vector<1x16x2xf32> to vector<16x2xf32>
    %781 = vector.extract_strided_slice %753 {offsets = [3, 0], sizes = [1, 2], strides = [1, 1]} : vector<16x2xf32> to vector<1x2xf32>
    %782 = vector.broadcast %781 : vector<1x2xf32> to vector<16x2xf32>
    %783 = arith.mulf %780, %782 : vector<16x2xf32>
    %c4_367 = arith.constant 4 : index
    %c0_368 = arith.constant 0 : index
    %c0_369 = arith.constant 0 : index
    %784 = vector.load %arg4[%c4_367, %c0_368, %c0_369] : memref<16x16x2xf32, #tpu.memory_space<vmem>>, vector<1x16x2xf32>
    %785 = vector.shape_cast %784 : vector<1x16x2xf32> to vector<16x2xf32>
    %786 = vector.extract_strided_slice %753 {offsets = [4, 0], sizes = [1, 2], strides = [1, 1]} : vector<16x2xf32> to vector<1x2xf32>
    %787 = vector.broadcast %786 : vector<1x2xf32> to vector<16x2xf32>
    %788 = arith.mulf %785, %787 : vector<16x2xf32>
    %c5_370 = arith.constant 5 : index
    %c0_371 = arith.constant 0 : index
    %c0_372 = arith.constant 0 : index
    %789 = vector.load %arg4[%c5_370, %c0_371, %c0_372] : memref<16x16x2xf32, #tpu.memory_space<vmem>>, vector<1x16x2xf32>
    %790 = vector.shape_cast %789 : vector<1x16x2xf32> to vector<16x2xf32>
    %791 = vector.extract_strided_slice %753 {offsets = [5, 0], sizes = [1, 2], strides = [1, 1]} : vector<16x2xf32> to vector<1x2xf32>
    %792 = vector.broadcast %791 : vector<1x2xf32> to vector<16x2xf32>
    %793 = arith.mulf %790, %792 : vector<16x2xf32>
    %c6_373 = arith.constant 6 : index
    %c0_374 = arith.constant 0 : index
    %c0_375 = arith.constant 0 : index
    %794 = vector.load %arg4[%c6_373, %c0_374, %c0_375] : memref<16x16x2xf32, #tpu.memory_space<vmem>>, vector<1x16x2xf32>
    %795 = vector.shape_cast %794 : vector<1x16x2xf32> to vector<16x2xf32>
    %796 = vector.extract_strided_slice %753 {offsets = [6, 0], sizes = [1, 2], strides = [1, 1]} : vector<16x2xf32> to vector<1x2xf32>
    %797 = vector.broadcast %796 : vector<1x2xf32> to vector<16x2xf32>
    %798 = arith.mulf %795, %797 : vector<16x2xf32>
    %c7_376 = arith.constant 7 : index
    %c0_377 = arith.constant 0 : index
    %c0_378 = arith.constant 0 : index
    %799 = vector.load %arg4[%c7_376, %c0_377, %c0_378] : memref<16x16x2xf32, #tpu.memory_space<vmem>>, vector<1x16x2xf32>
    %800 = vector.shape_cast %799 : vector<1x16x2xf32> to vector<16x2xf32>
    %801 = vector.extract_strided_slice %753 {offsets = [7, 0], sizes = [1, 2], strides = [1, 1]} : vector<16x2xf32> to vector<1x2xf32>
    %802 = vector.broadcast %801 : vector<1x2xf32> to vector<16x2xf32>
    %803 = arith.mulf %800, %802 : vector<16x2xf32>
    %c8_379 = arith.constant 8 : index
    %c0_380 = arith.constant 0 : index
    %c0_381 = arith.constant 0 : index
    %804 = vector.load %arg4[%c8_379, %c0_380, %c0_381] : memref<16x16x2xf32, #tpu.memory_space<vmem>>, vector<1x16x2xf32>
    %805 = vector.shape_cast %804 : vector<1x16x2xf32> to vector<16x2xf32>
    %806 = vector.extract_strided_slice %753 {offsets = [8, 0], sizes = [1, 2], strides = [1, 1]} : vector<16x2xf32> to vector<1x2xf32>
    %807 = vector.broadcast %806 : vector<1x2xf32> to vector<16x2xf32>
    %808 = arith.mulf %805, %807 : vector<16x2xf32>
    %c9_382 = arith.constant 9 : index
    %c0_383 = arith.constant 0 : index
    %c0_384 = arith.constant 0 : index
    %809 = vector.load %arg4[%c9_382, %c0_383, %c0_384] : memref<16x16x2xf32, #tpu.memory_space<vmem>>, vector<1x16x2xf32>
    %810 = vector.shape_cast %809 : vector<1x16x2xf32> to vector<16x2xf32>
    %811 = vector.extract_strided_slice %753 {offsets = [9, 0], sizes = [1, 2], strides = [1, 1]} : vector<16x2xf32> to vector<1x2xf32>
    %812 = vector.broadcast %811 : vector<1x2xf32> to vector<16x2xf32>
    %813 = arith.mulf %810, %812 : vector<16x2xf32>
    %c10_385 = arith.constant 10 : index
    %c0_386 = arith.constant 0 : index
    %c0_387 = arith.constant 0 : index
    %814 = vector.load %arg4[%c10_385, %c0_386, %c0_387] : memref<16x16x2xf32, #tpu.memory_space<vmem>>, vector<1x16x2xf32>
    %815 = vector.shape_cast %814 : vector<1x16x2xf32> to vector<16x2xf32>
    %816 = vector.extract_strided_slice %753 {offsets = [10, 0], sizes = [1, 2], strides = [1, 1]} : vector<16x2xf32> to vector<1x2xf32>
    %817 = vector.broadcast %816 : vector<1x2xf32> to vector<16x2xf32>
    %818 = arith.mulf %815, %817 : vector<16x2xf32>
    %c11_388 = arith.constant 11 : index
    %c0_389 = arith.constant 0 : index
    %c0_390 = arith.constant 0 : index
    %819 = vector.load %arg4[%c11_388, %c0_389, %c0_390] : memref<16x16x2xf32, #tpu.memory_space<vmem>>, vector<1x16x2xf32>
    %820 = vector.shape_cast %819 : vector<1x16x2xf32> to vector<16x2xf32>
    %821 = vector.extract_strided_slice %753 {offsets = [11, 0], sizes = [1, 2], strides = [1, 1]} : vector<16x2xf32> to vector<1x2xf32>
    %822 = vector.broadcast %821 : vector<1x2xf32> to vector<16x2xf32>
    %823 = arith.mulf %820, %822 : vector<16x2xf32>
    %c12_391 = arith.constant 12 : index
    %c0_392 = arith.constant 0 : index
    %c0_393 = arith.constant 0 : index
    %824 = vector.load %arg4[%c12_391, %c0_392, %c0_393] : memref<16x16x2xf32, #tpu.memory_space<vmem>>, vector<1x16x2xf32>
    %825 = vector.shape_cast %824 : vector<1x16x2xf32> to vector<16x2xf32>
    %826 = vector.extract_strided_slice %753 {offsets = [12, 0], sizes = [1, 2], strides = [1, 1]} : vector<16x2xf32> to vector<1x2xf32>
    %827 = vector.broadcast %826 : vector<1x2xf32> to vector<16x2xf32>
    %828 = arith.mulf %825, %827 : vector<16x2xf32>
    %c13_394 = arith.constant 13 : index
    %c0_395 = arith.constant 0 : index
    %c0_396 = arith.constant 0 : index
    %829 = vector.load %arg4[%c13_394, %c0_395, %c0_396] : memref<16x16x2xf32, #tpu.memory_space<vmem>>, vector<1x16x2xf32>
    %830 = vector.shape_cast %829 : vector<1x16x2xf32> to vector<16x2xf32>
    %831 = vector.extract_strided_slice %753 {offsets = [13, 0], sizes = [1, 2], strides = [1, 1]} : vector<16x2xf32> to vector<1x2xf32>
    %832 = vector.broadcast %831 : vector<1x2xf32> to vector<16x2xf32>
    %833 = arith.mulf %830, %832 : vector<16x2xf32>
    %c14_397 = arith.constant 14 : index
    %c0_398 = arith.constant 0 : index
    %c0_399 = arith.constant 0 : index
    %834 = vector.load %arg4[%c14_397, %c0_398, %c0_399] : memref<16x16x2xf32, #tpu.memory_space<vmem>>, vector<1x16x2xf32>
    %835 = vector.shape_cast %834 : vector<1x16x2xf32> to vector<16x2xf32>
    %836 = vector.extract_strided_slice %753 {offsets = [14, 0], sizes = [1, 2], strides = [1, 1]} : vector<16x2xf32> to vector<1x2xf32>
    %837 = vector.broadcast %836 : vector<1x2xf32> to vector<16x2xf32>
    %838 = arith.mulf %835, %837 : vector<16x2xf32>
    %c15_400 = arith.constant 15 : index
    %c0_401 = arith.constant 0 : index
    %c0_402 = arith.constant 0 : index
    %839 = vector.load %arg4[%c15_400, %c0_401, %c0_402] : memref<16x16x2xf32, #tpu.memory_space<vmem>>, vector<1x16x2xf32>
    %840 = vector.shape_cast %839 : vector<1x16x2xf32> to vector<16x2xf32>
    %841 = vector.extract_strided_slice %753 {offsets = [15, 0], sizes = [1, 2], strides = [1, 1]} : vector<16x2xf32> to vector<1x2xf32>
    %842 = vector.broadcast %841 : vector<1x2xf32> to vector<16x2xf32>
    %843 = arith.mulf %840, %842 : vector<16x2xf32>
    %844 = arith.addf %768, %773 : vector<16x2xf32>
    %845 = arith.addf %778, %783 : vector<16x2xf32>
    %846 = arith.addf %788, %793 : vector<16x2xf32>
    %847 = arith.addf %798, %803 : vector<16x2xf32>
    %848 = arith.addf %808, %813 : vector<16x2xf32>
    %849 = arith.addf %818, %823 : vector<16x2xf32>
    %850 = arith.addf %828, %833 : vector<16x2xf32>
    %851 = arith.addf %838, %843 : vector<16x2xf32>
    %852 = arith.addf %844, %845 : vector<16x2xf32>
    %853 = arith.addf %846, %847 : vector<16x2xf32>
    %854 = arith.addf %848, %849 : vector<16x2xf32>
    %855 = arith.addf %850, %851 : vector<16x2xf32>
    %856 = arith.addf %852, %853 : vector<16x2xf32>
    %857 = arith.addf %854, %855 : vector<16x2xf32>
    %858 = arith.addf %856, %857 : vector<16x2xf32>
    %859 = arith.addf %763, %858 : vector<16x2xf32>
    %860 = math.tanh %859 : vector<16x2xf32>
    %861 = arith.mulf %8, %860 : vector<16x2xf32>
    %cst_403 = arith.constant dense<0.000000e+00> : vector<2xf32>
    %862 = vector.multi_reduction <add>, %861, %cst_403 [0] : vector<16x2xf32> to vector<2xf32>
    %863 = vector.shape_cast %862 : vector<2xf32> to vector<1x2xf32>
    %864 = arith.index_cast %c7_i32 : i32 to index
    %c0_404 = arith.constant 0 : index
    %865 = vector.load %arg14[%864, %c0_404] : memref<8x2xf32, #tpu.memory_space<vmem>>, vector<1x2xf32>
    tpu.vector_store %arg14[%864, %c0_404], %863 {strides = array<i32>} : memref<8x2xf32, #tpu.memory_space<vmem>>, vector<1x2xf32>,
    %c8_i32 = arith.constant 8 : i32
    %c0_405 = arith.constant 0 : index
    %c0_406 = arith.constant 0 : index
    %866 = vector.load %arg12[%c0_405, %c0_406] : memref<16x2xf32, #tpu.memory_space<vmem>>, vector<16x2xf32>
    tpu.vector_store %arg12[%c0_405, %c0_406], %860 {strides = array<i32>} : memref<16x2xf32, #tpu.memory_space<vmem>>, vector<16x2xf32>,
    %c0_i32_407 = arith.constant 0 : i32
    %867 = arith.cmpi eq, %arg1, %c0_i32_407 : i32
    %868 = arith.extui %867 : i1 to i32
    %c0_i32_408 = arith.constant 0 : i32
    %869 = arith.cmpi ne, %868, %c0_i32_408 : i32
    scf.if %869 {
      %876 = tpu.transpose %860, [1, 0] : vector<16x2xf32> -> vector<2x16xf32>
      %c0_415 = arith.constant 0 : index
      %c0_416 = arith.constant 0 : index
      %c0_417 = arith.constant 0 : index
      %877 = vector.load %arg11[%c0_415, %c0_416, %c0_417] : memref<1x2x16xf32, #tpu.memory_space<vmem>>, vector<1x2x16xf32>
      %878 = vector.shape_cast %877 : vector<1x2x16xf32> to vector<2x16xf32>
      %879 = vector.shape_cast %876 : vector<2x16xf32> to vector<1x2x16xf32>
      tpu.vector_store %arg11[%c0_415, %c0_416, %c0_417], %879 {strides = array<i32>} : memref<1x2x16xf32, #tpu.memory_space<vmem>>, vector<1x2x16xf32>,
    } else {
    }
    %c0_409 = arith.constant 0 : index
    %c0_410 = arith.constant 0 : index
    %870 = vector.load %arg14[%c0_409, %c0_410] : memref<8x2xf32, #tpu.memory_space<vmem>>, vector<8x2xf32>
    %871 = tpu.transpose %870, [1, 0] : vector<8x2xf32> -> vector<2x8xf32>
    %c0_411 = arith.constant 0 : index
    %c0_412 = arith.constant 0 : index
    %872 = vector.load %arg9[%c0_411, %c0_412] : memref<1x1xf32, #tpu.memory_space<vmem>>, vector<1x1xf32>
    %873 = vector.broadcast %872 : vector<1x1xf32> to vector<2x8xf32>
    %874 = arith.addf %871, %873 : vector<2x8xf32>
    %c0_413 = arith.constant 0 : index
    %c0_414 = arith.constant 0 : index
    %875 = vector.load %arg10[%c0_413, %c0_414] : memref<2x8xf32, #tpu.memory_space<vmem>>, vector<2x8xf32>
    tpu.vector_store %arg10[%c0_413, %c0_414], %874 {strides = array<i32>} : memref<2x8xf32, #tpu.memory_space<vmem>>, vector<2x8xf32>,
    return
  }
  func.func @transform_0(%arg0: i32, %arg1: i32) -> (i32, i32) {
    %c0_i32 = arith.constant 0 : i32
    return %arg0, %arg1 : i32, i32
  }
  func.func @transform_1(%arg0: i32, %arg1: i32) -> (i32, i32, i32) {
    %c0_i32 = arith.constant 0 : i32
    %c0_i32_0 = arith.constant 0 : i32
    %c0_i32_1 = arith.constant 0 : i32
    return %c0_i32, %arg0, %c0_i32_0 : i32, i32, i32
  }
  func.func @transform_2(%arg0: i32, %arg1: i32) -> (i32, i32, i32) {
    %c0_i32 = arith.constant 0 : i32
    %c0_i32_0 = arith.constant 0 : i32
    %c0_i32_1 = arith.constant 0 : i32
    %c0_i32_2 = arith.constant 0 : i32
    return %c0_i32, %c0_i32_0, %c0_i32_1 : i32, i32, i32
  }
  func.func @transform_3(%arg0: i32, %arg1: i32) -> (i32, i32) {
    %c0_i32 = arith.constant 0 : i32
    %c0_i32_0 = arith.constant 0 : i32
    %c0_i32_1 = arith.constant 0 : i32
    return %c0_i32, %c0_i32_0 : i32, i32
  }
  func.func @transform_4(%arg0: i32, %arg1: i32) -> (i32, i32) {
    %c0_i32 = arith.constant 0 : i32
    %c0_i32_0 = arith.constant 0 : i32
    %c0_i32_1 = arith.constant 0 : i32
    return %c0_i32, %c0_i32_0 : i32, i32
  }
  func.func @transform_5(%arg0: i32, %arg1: i32) -> (i32, i32) {
    %c0_i32 = arith.constant 0 : i32
    %c0_i32_0 = arith.constant 0 : i32
    %c0_i32_1 = arith.constant 0 : i32
    return %c0_i32, %c0_i32_0 : i32, i32
  }
  func.func @transform_6(%arg0: i32, %arg1: i32) -> (i32, i32) {
    %c0_i32 = arith.constant 0 : i32
    %c0_i32_0 = arith.constant 0 : i32
    %c0_i32_1 = arith.constant 0 : i32
    return %c0_i32, %c0_i32_0 : i32, i32
  }
  func.func @transform_7(%arg0: i32, %arg1: i32) -> (i32, i32) {
    %c0_i32 = arith.constant 0 : i32
    %c0_i32_0 = arith.constant 0 : i32
    %c0_i32_1 = arith.constant 0 : i32
    return %c0_i32, %c0_i32_0 : i32, i32
  }
  func.func @transform_8(%arg0: i32, %arg1: i32) -> (i32, i32) {
    %c0_i32 = arith.constant 0 : i32
    return %arg0, %arg1 : i32, i32
  }
  func.func @transform_9(%arg0: i32, %arg1: i32) -> (i32, i32, i32) {
    %c0_i32 = arith.constant 0 : i32
    %c0_i32_0 = arith.constant 0 : i32
    %c0_i32_1 = arith.constant 0 : i32
    return %c0_i32, %arg0, %c0_i32_0 : i32, i32, i32
  }
}

</mosaic_0001>

<bundles_post_ra>
// kernel: net_forward.1
= control target key start
LH: loop header
LB: loop body
LE: loop exit
PB: predicated region body
PF: predicated region fallthrough
CT: control target
= control target key end

     0   :  { %s3119_s0 = inlined_call_operand.vmem [shape: f32[2,8], index: 0, kind: input, shape index: {}]   ;;  %s3120_s1 = inlined_call_operand.vmem [shape: f32[1,2,16], index: 1, kind: input, shape index: {}]   ;;  %s3121_s2 = inlined_call_operand.vmem [shape: f32[16,16,2], index: 2, kind: input, shape index: {}]   ;;  %s3122_s3 = inlined_call_operand.vmem [shape: f32[16,16], index: 3, kind: input, shape index: {}]   ;;  %s3123_s4 = inlined_call_operand.vmem [shape: f32[16,2], index: 4, kind: input, shape index: {}]   ;;  %s3124_s5 = inlined_call_operand.vmem [shape: f32[16,2], index: 5, kind: input, shape index: {}]   ;;  %s3125_s6 = inlined_call_operand.vmem [shape: f32[16,2], index: 6, kind: input, shape index: {}]   ;;  %s3126_s7 = inlined_call_operand.<no memory space> [shape: f32[1,1], index: 7, kind: input, shape index: {}]   ;;  %s3127_s8 = inlined_call_operand.vmem [shape: f32[2,8], index: 8, kind: output, shape index: {0}]   ;;  %s3128_s9 = inlined_call_operand.hbm [shape: f32[1,2,16], index: 9, kind: output, shape index: {1}]  }
   0x1   :  { %v15_v0 = vstv %s3126_s7 }
   0x2   :  { %16 = vst [vmem:[#allocation5] sm:$0x1] %v15_v0 }
   0x3   :  { %v38_v1 = vld [vmem:[%s3120_s1] sm:$0x3] }
   0x4   :  { %39 = vxpose.xlu0.b32.start.end [1/1] (short) (narrow) %v38_v1, 16 }
   0x5   :  { %17 = vsyncpa [#allocation7], 0  ;;  %v74_v2 = vld [vmem:[%s3119_s0] sm:$0x3]  ;;  %v3129_v4 = vmov 0   ;;  %v128_v5 = vlaneseq  ;;  %vm71_vm0 = vcmask 15360  }
   0x6   :  { %1952 = vset.pattern.permute.xlu1 %v3129_v4  ;;  %v2091_v16 = vld [vmem:[%s3121_s2] sm:$0xff]  ;;  %v2096_v17 = vld [vmem:[%s3121_s2 + $0x8] sm:$0xff]  ;;  %v2101_v18 = vld [vmem:[%s3121_s2 + $0x10] sm:$0xff]  ;;  %vm314_vm1 = vcmask 8192   ;;  %vm1634_vm2 = vcmask 123904  }
   0x7   :  { %v129_v7 = vshrl.u32 %v128_v5, 7  ;;  %3266 = vst [vmem:[#allocation11_spill] sm:$0xff] %v2091_v16  ;;  %3267 = vst [vmem:[#allocation12_spill] sm:$0xff] %v2096_v17  ;;  %v2108_v22 = vld [vmem:[%s3121_s2 + $0x18] sm:$0xff]  ;;  %v2113_v23 = vld [vmem:[%s3121_s2 + $0x20] sm:$0xff] }
   0x8   :  { %3268 = vst [vmem:[#allocation13_spill] sm:$0xff] %v2101_v18  ;;  %3270 = vst [vmem:[#allocation15_spill] sm:$0xff] %v2108_v22  ;;  %v2121_v26 = vld [vmem:[%s3121_s2 + $0x28] sm:$0xff]  ;;  %v2127_v28 = vld [vmem:[%s3121_s2 + $0x30] sm:$0xff] }
   0x9   :  { %v1948_v3 = vld [vmem:[#allocation5] ss:$0 sm:$0xff]  ;;  %75 = vxpose.xlu0.b32.start.end [1/1] (short) (narrow) %v74_v2, 8  ;;  %v2074_v9 = vsub.s32 0, %v129_v7  ;;  %v2076_v10 = vsub.s32 1, %v129_v7  ;;  %v2078_v11 = vsub.s32 2, %v129_v7 }
   0xa   :  { %1676 = vperm.xlu1 %1952, %v1948_v3   ;;  %v2080_v12 = vsub.s32 3, %v129_v7  ;;  %v2082_v13 = vsub.s32 4, %v129_v7  ;;  %v2084_v14 = vsub.s32 5, %v129_v7  ;;  %v2086_v15 = vsub.s32 6, %v129_v7  ;;  %3271 = vst [vmem:[#allocation16_spill] sm:$0xff] %v2113_v23  ;;  %3272 = vst [vmem:[#allocation17_spill] sm:$0xff] %v2121_v26 }
   0xb   :  { %v2103_v19 = vsub.s32 7, %v129_v7  ;;  %3273 = vst [vmem:[#allocation18_spill] sm:$0xff] %v2127_v28  ;;  %v2132_v29 = vld [vmem:[%s3121_s2 + $0x38] sm:$0xff]  ;;  %v2138_v31 = vld [vmem:[%s3121_s2 + $0x40] sm:$0xff]  ;;  %v2143_v32 = vld [vmem:[%s3121_s2 + $0x48] sm:$0xff] }
   0xc   :  { %3264 = vst [vmem:[#allocation9_spill] sm:$0xff] %v2084_v14  ;;  %3265 = vst [vmem:[#allocation10_spill] sm:$0xff] %v2086_v15  ;;  %v2149_v34 = vld [vmem:[%s3121_s2 + $0x50] sm:$0xff]  ;;  %v2162_v39 = vld [vmem:[%s3121_s2 + $0x58] sm:$0xff] }
   0xd   :  { %3269 = vst [vmem:[#allocation14_spill] sm:$0xff] %v2103_v19  ;;  %3274 = vst [vmem:[#allocation19_spill] sm:$0xff] %v2132_v29  ;;  %v2167_v40 = vld [vmem:[%s3121_s2 + $0x60] sm:$0xff]  ;;  %v2172_v41 = vld [vmem:[%s3121_s2 + $0x68] sm:$0xff] }
   0xe   :  { %3275 = vst [vmem:[#allocation20_spill] sm:$0xff] %v2138_v31  ;;  %3276 = vst [vmem:[#allocation21_spill] sm:$0xff] %v2143_v32  ;;  %v2178_v43 = vld [vmem:[%s3123_s4] sm:$0xff]  ;;  %v2183_v44 = vld [vmem:[%s3123_s4 + $0x8] sm:$0xff] }
   0xf   :  { %3277 = vst [vmem:[#allocation22_spill] sm:$0xff] %v2149_v34  ;;  %3278 = vst [vmem:[#allocation23_spill] sm:$0xff] %v2162_v39  ;;  %v2192_v50 = vld [vmem:[%s3121_s2 + $0x70] sm:$0xff]  ;;  %v2201_v55 = vld [vmem:[%s3121_s2 + $0x78] sm:$0xff] }
  0x10   :  { %3279 = vst [vmem:[#allocation24_spill] sm:$0xff] %v2167_v40  ;;  %3280 = vst [vmem:[#allocation25_spill] sm:$0xff] %v2172_v41  ;;  %v2206_v56 = vld [vmem:[%s3121_s2 + $0x80] sm:$0xff]  ;;  %v2211_v57 = vld [vmem:[%s3121_s2 + $0x88] sm:$0xff] }
  0x11   :  { %3281 = vst [vmem:[#allocation26_spill] sm:$0xff] %v2192_v50  ;;  %3282 = vst [vmem:[#allocation27_spill] sm:$0xff] %v2201_v55  ;;  %v2220_v62 = vld [vmem:[%s3121_s2 + $0x90] sm:$0xff]  ;;  %v2225_v63 = vld [vmem:[%s3121_s2 + $0x98] sm:$0xff] }
  0x12   :  { %3283 = vst [vmem:[#allocation28_spill] sm:$0xff] %v2206_v56  ;;  %3284 = vst [vmem:[#allocation29_spill] sm:$0xff] %v2211_v57  ;;  %v2230_v0 = vld [vmem:[%s3121_s2 + $0xa0] sm:$0xff]  ;;  %v2237_v3 = vld [vmem:[%s3121_s2 + $0xa8] sm:$0xff] }
  0x13   :  { %3285 = vst [vmem:[#allocation30_spill] sm:$0xff] %v2220_v62  ;;  %3286 = vst [vmem:[#allocation31_spill] sm:$0xff] %v2225_v63  ;;  %v2248_v7 = vld [vmem:[%s3121_s2 + $0xb8] sm:$0xff] }
  0x14   :  { %3287 = vst [vmem:[#allocation32_spill] sm:$0xff] %v2230_v0  ;;  %3288 = vst [vmem:[#allocation33_spill] sm:$0xff] %v2237_v3  ;;  %v2275_v4 = vld [vmem:[%s3121_s2 + $0xd8] sm:$0xff] }
  0x15   :  { %3290 = vst [vmem:[#allocation35_spill] sm:$0xff] %v2248_v7  ;;  %3294 = vst [vmem:[#allocation39_spill] sm:$0xff] %v2275_v4 }
  0x80   :  { %v55_v6 = vpop.trf.xlu0 }
  0x81   :  { %72 = vst.msk [vmem:[#allocation2] sm:$0xff] %vm71_vm0, %v55_v6  ;;  %v2243_v6 = vld [vmem:[%s3121_s2 + $0xb0] sm:$0xff] }
  0x82   :  { %3289 = vst [vmem:[#allocation34_spill] sm:$0xff] %v2243_v6 }
  0x84   :  { %v56_v8 = vpop.trf.xlu0 }
  0x85   :  { %73 = vst.msk [vmem:[#allocation2 + $0x8] sm:$0xff] %vm71_vm0, %v56_v8 }
  0x88   :  { %v91_v20 = vpop.trf.xlu0  ;;  %v115_v21 = vld [vmem:[#allocation2] sm:$0xff] }
  0x89   :  { %108 = vst.msk [vmem:[#allocation3] sm:$0xff] %vm71_vm0, %v91_v20  ;;  %v131_v24 = vrot.slane %v115_v21, %v2074_v9  ;;  %v140_v25 = vrot.slane %v115_v21, %v2076_v10  ;;  %v149_v27 = vrot.slane %v115_v21, %v2078_v11  ;;  %v158_v30 = vrot.slane %v115_v21, %v2080_v12 }
  0x8a   :  { %v167_v33 = vrot.slane %v115_v21, %v2082_v13  ;;  %v176_v35 = vrot.slane %v115_v21, %v2084_v14  ;;  %v185_v36 = vrot.slane %v115_v21, %v2086_v15  ;;  %v194_v42 = vrot.slane %v115_v21, %v2103_v19 }
  0x8b   :  { %v2154_v37 = vmul.f32 %v131_v24, %v2091_v16  ;;  %v2157_v38 = vmul.f32 %v131_v24, %v2096_v17  ;;  %v141_v46 = vmul.f32 %v2101_v18, %v140_v25  ;;  %v142_v47 = vmul.f32 %v2108_v22, %v140_v25  ;;  %v2256_v25 = vld [vmem:[%s3121_s2 + $0xc0] sm:$0xff] }
  0x8c   :  { %v116_v45 = vld [vmem:[#allocation2 + $0x8] sm:$0xff]  ;;  %v150_v48 = vmul.f32 %v2113_v23, %v149_v27  ;;  %v151_v49 = vmul.f32 %v2121_v26, %v149_v27  ;;  %v159_v51 = vmul.f32 %v2127_v28, %v158_v30  ;;  %v160_v52 = vmul.f32 %v2132_v29, %v158_v30  ;;  %3291 = vst [vmem:[#allocation36_spill] sm:$0xff] %v2256_v25 }
  0x8d   :  { %v168_v53 = vmul.f32 %v2138_v31, %v167_v33  ;;  %v169_v54 = vmul.f32 %v2143_v32, %v167_v33  ;;  %v177_v58 = vmul.f32 %v2149_v34, %v176_v35  ;;  %v178_v59 = vmul.f32 %v2162_v39, %v176_v35  ;;  %v2261_v27 = vld [vmem:[%s3121_s2 + $0xc8] sm:$0xff]  ;;  %v2296_v31 = vld [vmem:[%s3121_s2 + $0xf0] sm:$0xff] }
  0x8e   :  { %v186_v60 = vmul.f32 %v2167_v40, %v185_v36  ;;  %v187_v61 = vmul.f32 %v2172_v41, %v185_v36  ;;  %v203_v1 = vrot.slane %v116_v45, %v2074_v9  ;;  %v212_v2 = vrot.slane %v116_v45, %v2076_v10  ;;  %3292 = vst [vmem:[#allocation37_spill] sm:$0xff] %v2261_v27  ;;  %v2291_v32 = vld [vmem:[%s3121_s2 + $0xe8] sm:$0xff] }
  0x8f   :  { %v221_v5 = vrot.slane %v116_v45, %v2078_v11  ;;  %v230_v8 = vrot.slane %v116_v45, %v2080_v12  ;;  %v195_v21 = vmul.f32 %v2192_v50, %v194_v42  ;;  %v196_v24 = vmul.f32 %v2201_v55, %v194_v42  ;;  %v2270_v42 = vld [vmem:[%s3121_s2 + $0xd0] sm:$0xff]  ;;  %v2280_v55 = vld [vmem:[%s3121_s2 + $0xe0] sm:$0xff]  ;;  %3296 = vst [vmem:[#allocation41_spill] sm:$0xff] %v2291_v32 }
  0x90   :  { %v1700_v20 = vld [vmem:[#allocation3] ss:$0 sm:$0xff]  ;;  %v239_v30 = vrot.slane %v116_v45, %v2082_v13  ;;  %v248_v33 = vrot.slane %v116_v45, %v2084_v14  ;;  %3293 = vst [vmem:[#allocation38_spill] sm:$0xff] %v2270_v42  ;;  %3295 = vst [vmem:[#allocation40_spill] sm:$0xff] %v2280_v55  ;;  %v257_v50 = vrot.slane %v116_v45, %v2086_v15 }
  0x91   :  { %v122_v35 = vmul.f32 %v1700_v20, %v2178_v43  ;;  %v123_v36 = vmul.f32 %v1700_v20, %v2183_v44  ;;  %v266_v41 = vrot.slane %v116_v45, %v2103_v19  ;;  %v204_v20 = vmul.f32 %v2206_v56, %v203_v1  ;;  %3297 = vst [vmem:[#allocation42_spill] sm:$0xff] %v2296_v31  ;;  %v2301_v45 = vld [vmem:[%s3121_s2 + $0xf8] sm:$0xff] }
  0x92   :  { %v205_v40 = vmul.f32 %v2211_v57, %v203_v1  ;;  %v213_v39 = vmul.f32 %v2220_v62, %v212_v2  ;;  %v214_v34 = vmul.f32 %v2225_v63, %v212_v2  ;;  %v222_v1 = vmul.f32 %v2230_v0, %v221_v5 }
  0x93   :  { %v223_v62 = vmul.f32 %v2237_v3, %v221_v5  ;;  %v231_v2 = vmul.f32 %v2243_v6, %v230_v8  ;;  %v232_v63 = vmul.f32 %v2248_v7, %v230_v8  ;;  %v240_v57 = vmul.f32 %v2256_v25, %v239_v30 }
  0x94   :  { %v241_v56 = vmul.f32 %v2261_v27, %v239_v30  ;;  %v249_v29 = vmul.f32 %v2270_v42, %v248_v33  ;;  %v250_v28 = vmul.f32 %v2275_v4, %v248_v33  ;;  %v258_v26 = vmul.f32 %v2280_v55, %v257_v50 }
  0x95   :  { %v259_v23 = vmul.f32 %v2291_v32, %v257_v50  ;;  %v267_v0 = vmul.f32 %v2296_v31, %v266_v41  ;;  %v268_v5 = vmul.f32 %v2301_v45, %v266_v41  ;;  %v269_v6 = vadd.f32 %v141_v46, %v2154_v37  ;;  %v2320_v50 = vld [vmem:[%s3124_s5] sm:$0xff]  ;;  %v2325_v37 = vld [vmem:[%s3124_s5 + $0x8] sm:$0xff] }
  0x96   :  { %v270_v8 = vadd.f32 %v142_v47, %v2157_v38  ;;  %v271_v7 = vadd.f32 %v159_v51, %v150_v48  ;;  %v272_v25 = vadd.f32 %v160_v52, %v151_v49  ;;  %v273_v3 = vadd.f32 %v177_v58, %v168_v53  ;;  %v1793_v58 = vld [vmem:[#allocation3 + $0x3] ss:$0 sm:$0xff] }
  0x97   :  { %v274_v30 = vadd.f32 %v178_v59, %v169_v54  ;;  %v275_v27 = vadd.f32 %v195_v21, %v186_v60  ;;  %v276_v42 = vadd.f32 %v196_v24, %v187_v61  ;;  %v277_v22 = vadd.f32 %v213_v39, %v204_v20 }
  0x98   :  { %v278_v33 = vadd.f32 %v214_v34, %v205_v40  ;;  %v279_v4 = vadd.f32 %v231_v2, %v222_v1  ;;  %v280_v55 = vadd.f32 %v232_v63, %v223_v62  ;;  %v281_v38 = vadd.f32 %v249_v29, %v240_v57  ;;  %v1762_v40 = vld [vmem:[#allocation3 + $0x2] ss:$0 sm:$0xff] }
  0x99   :  { %v282_v41 = vadd.f32 %v250_v28, %v241_v56  ;;  %v283_v46 = vadd.f32 %v267_v0, %v258_v26  ;;  %v284_v47 = vadd.f32 %v268_v5, %v259_v23  ;;  %v285_v48 = vadd.f32 %v271_v7, %v269_v6  ;;  %v1824_v56 = vld [vmem:[#allocation3 + $0x4] ss:$0 sm:$0xff]  ;;  %v1886_v6 = vld [vmem:[#allocation3 + $0x6] ss:$0 sm:$0xff] }
  0x9a   :  { %v286_v49 = vadd.f32 %v272_v25, %v270_v8  ;;  %v287_v39 = vadd.f32 %v275_v27, %v273_v3  ;;  %v288_v34 = vadd.f32 %v276_v42, %v274_v30  ;;  %v289_v51 = vadd.f32 %v279_v4, %v277_v22  ;;  %v1855_v22 = vld [vmem:[#allocation3 + $0x5] ss:$0 sm:$0xff]  ;;  %v1917_v27 = vld [vmem:[#allocation3 + $0x7] ss:$0 sm:$0xff] }
  0x9b   :  { %v290_v52 = vadd.f32 %v280_v55, %v278_v33  ;;  %v291_v53 = vadd.f32 %v283_v46, %v281_v38  ;;  %v292_v54 = vadd.f32 %v284_v47, %v282_v41  ;;  %v124_v59 = vadd.f32 %v122_v35, %v2320_v50 }
  0x9c   :  { %v125_v60 = vadd.f32 %v123_v36, %v2325_v37  ;;  %v293_v61 = vadd.f32 %v287_v39, %v285_v48  ;;  %v294_v62 = vadd.f32 %v288_v34, %v286_v49  ;;  %v504_v23 = vmul.f32 %v1762_v40, %v2178_v43  ;;  %v2377_v39 = vld [vmem:[#allocation3 + $0x1] ss:$0 sm:$0xff] }
  0x9d   :  { %v295_v29 = vadd.f32 %v291_v53, %v289_v51  ;;  %v296_v28 = vadd.f32 %v292_v54, %v290_v52  ;;  %v505_v26 = vmul.f32 %v1762_v40, %v2183_v44  ;;  %v687_v57 = vmul.f32 %v1793_v58, %v2178_v43 }
  0x9e   :  { %v688_v4 = vmul.f32 %v1793_v58, %v2183_v44  ;;  %v2334_v0 = vadd.f32 %v504_v23, %v2320_v50  ;;  %v870_v24 = vmul.f32 %v1824_v56, %v2178_v43  ;;  %v871_v25 = vmul.f32 %v1824_v56, %v2183_v44  ;;  %v3311_v56 = vld [vmem:[#allocation16_spill] sm:$0xff] }
  0x9f   :  { %v297_v55 = vadd.f32 %v295_v29, %v293_v61  ;;  %v298_v63 = vadd.f32 %v296_v28, %v294_v62  ;;  %v2337_v3 = vadd.f32 %v505_v26, %v2325_v37  ;;  %v2340_v7 = vadd.f32 %v687_v57, %v2320_v50  ;;  %v3310_v28 = vld [vmem:[#allocation15_spill] sm:$0xff] }
  0xa0   :  { %3298 = vst [vmem:[#allocation43_spill] sm:$0xff] %v2334_v0  ;;  %v2343_v21 = vadd.f32 %v688_v4, %v2325_v37  ;;  %v1053_v42 = vmul.f32 %v1855_v22, %v2178_v43  ;;  %v1054_v20 = vmul.f32 %v1855_v22, %v2183_v44  ;;  %v2350_v1 = vadd.f32 %v870_v24, %v2320_v50  ;;  %v3312_v4 = vld [vmem:[#allocation17_spill] sm:$0xff] }
  0xa1   :  { %3299 = vst [vmem:[#allocation44_spill] sm:$0xff] %v2337_v3  ;;  %3300 = vst [vmem:[#allocation45_spill] sm:$0xff] %v2340_v7  ;;  %v299_v35 = vadd.f32 %v297_v55, %v124_v59  ;;  %v300_v36 = vadd.f32 %v298_v63, %v125_v60  ;;  %v2353_v2 = vadd.f32 %v871_v25, %v2325_v37  ;;  %v3313_v55 = vld [vmem:[#allocation18_spill] sm:$0xff]  ;;  %v3315_v25 = vld [vmem:[#allocation20_spill] sm:$0xff] }
  0xa2   :  { %3301 = vst [vmem:[#allocation46_spill] sm:$0xff] %v2343_v21  ;;  %3302 = vst [vmem:[#allocation47_spill] sm:$0xff] %v2350_v1  ;;  %v1236_v5 = vmul.f32 %v1886_v6, %v2178_v43  ;;  %v1237_v8 = vmul.f32 %v1886_v6, %v2183_v44  ;;  %v2358_v30 = vadd.f32 %v1053_v42, %v2320_v50  ;;  %v3314_v6 = vld [vmem:[#allocation19_spill] sm:$0xff]  ;;  %v3317_v42 = vld [vmem:[#allocation22_spill] sm:$0xff] }
  0xa3   :  { %3303 = vst [vmem:[#allocation48_spill] sm:$0xff] %v2353_v2  ;;  %1954 = vtanh.f32 %v299_v35  ;;  %v2361_v33 = vadd.f32 %v1054_v20, %v2325_v37  ;;  %v1419_v38 = vmul.f32 %v1917_v27, %v2178_v43  ;;  %v1420_v47 = vmul.f32 %v1917_v27, %v2183_v44  ;;  %v3316_v35 = vld [vmem:[#allocation21_spill] sm:$0xff]  ;;  %v3323_v2 = vld [vmem:[#allocation28_spill] sm:$0xff]  ;;  %v3325_v3 = vld [vmem:[#allocation30_spill] sm:$0xff] }
  0xa4   :  { %3304 = vst [vmem:[#allocation49_spill] sm:$0xff] %v2358_v30  ;;  %v2365_v41 = vadd.f32 %v1236_v5, %v2320_v50  ;;  %v2368_v46 = vadd.f32 %v1237_v8, %v2325_v37  ;;  %1956 = vtanh.f32 %v300_v36  ;;  %v2383_v40 = vmul.f32 %v2377_v39, %v2178_v43  ;;  %v3318_v5 = vld [vmem:[#allocation23_spill] sm:$0xff]  ;;  %v3324_v21 = vld [vmem:[#allocation29_spill] sm:$0xff] }
  0xa5   :  { %3305 = vst [vmem:[#allocation50_spill] sm:$0xff] %v2361_v33  ;;  %v2372_v48 = vadd.f32 %v1419_v38, %v2320_v50  ;;  %v2375_v49 = vadd.f32 %v1420_v47, %v2325_v37  ;;  %v3319_v38 = vld [vmem:[#allocation24_spill] sm:$0xff] }
  0xa6   :  { %3306 = vst [vmem:[#allocation51_spill] sm:$0xff] %v2365_v41  ;;  %3307 = vst [vmem:[#allocation52_spill] sm:$0xff] %v2368_v46  ;;  %v3322_v46 = vld [vmem:[#allocation27_spill] sm:$0xff] }
  0xa7   :  { %3308 = vst [vmem:[#allocation53_spill] sm:$0xff] %v2372_v48  ;;  %3309 = vst [vmem:[#allocation54_spill] sm:$0xff] %v2375_v49  ;;  %v3321_v49 = vld [vmem:[#allocation26_spill] sm:$0xff] }
  0xb0   :  { %v2379_v34 = vpop.eup %1954 }
  0xb1   :  { %v330_v51 = vrot.slane %v2379_v34, %v2074_v9  ;;  %v338_v52 = vrot.slane %v2379_v34, %v2076_v10  ;;  %v346_v53 = vrot.slane %v2379_v34, %v2078_v11  ;;  %v354_v54 = vrot.slane %v2379_v34, %v2080_v12  ;;  %v2405_v26 = vpop.eup %1956 }
  0xb2   :  { %v362_v58 = vrot.slane %v2379_v34, %v2082_v13  ;;  %v370_v59 = vrot.slane %v2379_v34, %v2084_v14  ;;  %v378_v43 = vrot.slane %v2379_v34, %v2086_v15  ;;  %v386_v60 = vrot.slane %v2379_v34, %v2103_v19 }
  0xb3   :  { %v331_v61 = vmul.f32 %v330_v51, %v2091_v16  ;;  %v332_v62 = vmul.f32 %v330_v51, %v2096_v17  ;;  %v339_v29 = vmul.f32 %v2101_v18, %v338_v52  ;;  %v340_v23 = vmul.f32 %v3310_v28, %v338_v52  ;;  %v3320_v51 = vld [vmem:[#allocation25_spill] sm:$0xff]  ;;  %v3333_v17 = vld [vmem:[#allocation38_spill] sm:$0xff]  ;;  %v3334_v16 = vld [vmem:[#allocation39_spill] sm:$0xff] }
  0xb4   :  { %v347_v57 = vmul.f32 %v3311_v56, %v346_v53  ;;  %v348_v22 = vmul.f32 %v3312_v4, %v346_v53  ;;  %v355_v63 = vmul.f32 %v3313_v55, %v354_v54  ;;  %v356_v24 = vmul.f32 %v3314_v6, %v354_v54  ;;  %v3330_v6 = vld [vmem:[#allocation35_spill] sm:$0xff]  ;;  %v3331_v4 = vld [vmem:[#allocation36_spill] sm:$0xff]  ;;  %v3332_v28 = vld [vmem:[#allocation37_spill] sm:$0xff] }
  0xb5   :  { %v363_v27 = vmul.f32 %v3315_v25, %v362_v58  ;;  %v364_v36 = vmul.f32 %v3316_v35, %v362_v58  ;;  %v371_v20 = vmul.f32 %v3317_v42, %v370_v59  ;;  %v372_v8 = vmul.f32 %v3318_v5, %v370_v59  ;;  %v3328_v5 = vld [vmem:[#allocation33_spill] sm:$0xff]  ;;  %v3329_v35 = vld [vmem:[#allocation34_spill] sm:$0xff] }
  0xb6   :  { %v379_v47 = vmul.f32 %v3319_v38, %v378_v43  ;;  %v380_v52 = vmul.f32 %v3320_v51, %v378_v43  ;;  %v387_v48 = vmul.f32 %v3321_v49, %v386_v60  ;;  %v388_v53 = vmul.f32 %v3322_v46, %v386_v60  ;;  %v3326_v46 = vld [vmem:[#allocation31_spill] sm:$0xff]  ;;  %v3327_v51 = vld [vmem:[#allocation32_spill] sm:$0xff] }
  0xb7   :  { %v394_v41 = vrot.slane %v2405_v26, %v2074_v9  ;;  %v402_v54 = vrot.slane %v2405_v26, %v2076_v10  ;;  %v410_v58 = vrot.slane %v2405_v26, %v2078_v11  ;;  %v418_v59 = vrot.slane %v2405_v26, %v2080_v12 }
  0xb8   :  { %v426_v33 = vrot.slane %v2405_v26, %v2082_v13  ;;  %v434_v43 = vrot.slane %v2405_v26, %v2084_v14  ;;  %v442_v60 = vrot.slane %v2405_v26, %v2086_v15  ;;  %v450_v30 = vrot.slane %v2405_v26, %v2103_v19 }
  0xb9   :  { %v395_v1 = vmul.f32 %v3323_v2, %v394_v41  ;;  %v396_v7 = vmul.f32 %v3324_v21, %v394_v41  ;;  %v403_v0 = vmul.f32 %v3325_v3, %v402_v54  ;;  %v404_v49 = vmul.f32 %v3326_v46, %v402_v54  ;;  %v3335_v21 = vld [vmem:[#allocation40_spill] sm:$0xff] }
  0xba   :  { %v411_v38 = vmul.f32 %v3327_v51, %v410_v58  ;;  %v412_v42 = vmul.f32 %v3328_v5, %v410_v58  ;;  %v419_v25 = vmul.f32 %v3329_v35, %v418_v59  ;;  %v420_v55 = vmul.f32 %v3330_v6, %v418_v59 }
  0xbb   :  { %v427_v56 = vmul.f32 %v3331_v4, %v426_v33  ;;  %v428_v18 = vmul.f32 %v3332_v28, %v426_v33  ;;  %v435_v2 = vmul.f32 %v3333_v17, %v434_v43  ;;  %v436_v41 = vmul.f32 %v3334_v16, %v434_v43 }
  0xbc   :  { %v443_v3 = vmul.f32 %v3335_v21, %v442_v60  ;;  %v444_v54 = vmul.f32 %v2291_v32, %v442_v60  ;;  %v451_v51 = vmul.f32 %v2296_v31, %v450_v30  ;;  %v452_v58 = vmul.f32 %v2301_v45, %v450_v30  ;;  %v2454_v30 = vld [vmem:[%s3125_s6] sm:$0xff] }
  0xbd   :  { %v453_v5 = vadd.f32 %v339_v29, %v331_v61  ;;  %v454_v35 = vadd.f32 %v340_v23, %v332_v62  ;;  %v455_v46 = vadd.f32 %v355_v63, %v347_v57  ;;  %v456_v59 = vadd.f32 %v356_v24, %v348_v22  ;;  %v2459_v61 = vld [vmem:[%s3125_s6 + $0x8] sm:$0xff] }
  0xbe   :  { %v457_v6 = vadd.f32 %v371_v20, %v363_v27  ;;  %v458_v4 = vadd.f32 %v372_v8, %v364_v36  ;;  %v459_v19 = vadd.f32 %v387_v48, %v379_v47  ;;  %v460_v33 = vadd.f32 %v388_v53, %v380_v52  ;;  %v3341_v53 = vld [vmem:[#allocation13_spill] sm:$0xff] }
  0xbf   :  { %v461_v28 = vadd.f32 %v403_v0, %v395_v1  ;;  %v462_v17 = vadd.f32 %v404_v49, %v396_v7  ;;  %v463_v15 = vadd.f32 %v419_v25, %v411_v38  ;;  %v464_v43 = vadd.f32 %v420_v55, %v412_v42  ;;  %v3337_v42 = vld [vmem:[#allocation10_spill] sm:$0xff]  ;;  %v3339_v38 = vld [vmem:[#allocation11_spill] sm:$0xff] }
  0xc0   :  { %v465_v16 = vadd.f32 %v435_v2, %v427_v56  ;;  %v466_v21 = vadd.f32 %v436_v41, %v428_v18  ;;  %v467_v14 = vadd.f32 %v451_v51, %v443_v3  ;;  %v468_v60 = vadd.f32 %v452_v58, %v444_v54  ;;  %v3340_v51 = vld [vmem:[#allocation12_spill] sm:$0xff]  ;;  %v3342_v54 = vld [vmem:[#allocation15_spill] sm:$0xff] }
  0xc1   :  { %v469_v48 = vadd.f32 %v455_v46, %v453_v5  ;;  %v470_v62 = vadd.f32 %v456_v59, %v454_v35  ;;  %v471_v0 = vadd.f32 %v459_v19, %v457_v6  ;;  %v472_v7 = vadd.f32 %v460_v33, %v458_v4  ;;  %v3336_v35 = vld [vmem:[#allocation9_spill] sm:$0xff]  ;;  %v3338_v5 = vld [vmem:[#allocation14_spill] sm:$0xff]  ;;  %v3343_v33 = vld [vmem:[#allocation16_spill] sm:$0xff] }
  0xc2   :  { %v473_v1 = vadd.f32 %v463_v15, %v461_v28  ;;  %v474_v49 = vadd.f32 %v464_v43, %v462_v17  ;;  %v475_v2 = vadd.f32 %v467_v14, %v465_v16  ;;  %v476_v18 = vadd.f32 %v468_v60, %v466_v21  ;;  %v3344_v60 = vld [vmem:[#allocation17_spill] sm:$0xff] }
  0xc3   :  { %v477_v3 = vadd.f32 %v471_v0, %v469_v48  ;;  %v478_v29 = vadd.f32 %v472_v7, %v470_v62  ;;  %v303_v23 = vmul.f32 %v2379_v34, %v2454_v30  ;;  %v304_v56 = vmul.f32 %v2405_v26, %v2459_v61  ;;  %v3345_v62 = vld [vmem:[#allocation18_spill] sm:$0xff]  ;;  %v3346_v7 = vld [vmem:[#allocation19_spill] sm:$0xff] }
  0xc4   :  { %v322_v57 = vmul.f32 %v2377_v39, %v2183_v44  ;;  %v479_v22 = vadd.f32 %v475_v2, %v473_v1  ;;  %v480_v46 = vadd.f32 %v476_v18, %v474_v49  ;;  %v323_v14 = vadd.f32 %v2383_v40, %v2320_v50  ;;  %v3347_v49 = vld [vmem:[#allocation20_spill] sm:$0xff]  ;;  %v3348_v18 = vld [vmem:[#allocation21_spill] sm:$0xff] }
  0xc5   :  { %v305_v19 = vsel %vm71_vm0, %v303_v23, 0.0  ;;  %v306_v15 = vsel %vm71_vm0, %v304_v56, 0.0  ;;  %v3350_v56 = vld [vmem:[#allocation23_spill] sm:$0xff] }
  0xc6   :  { %v481_v16 = vadd.f32 %v479_v22, %v477_v3  ;;  %v482_v17 = vadd.f32 %v480_v46, %v478_v29  ;;  %v307_v21 = vadd.f32 %v306_v15, %v305_v19  ;;  %v324_v34 = vadd.f32 %v322_v57, %v2325_v37  ;;  %v3349_v29 = vld [vmem:[#allocation22_spill] sm:$0xff]  ;;  %v3351_v22 = vld [vmem:[#allocation24_spill] sm:$0xff]  ;;  %v3352_v19 = vld [vmem:[#allocation25_spill] sm:$0xff] }
  0xc8   :  { %v483_v28 = vadd.f32 %v481_v16, %v323_v14  ;;  %v308_v4 = vrot.slane %v307_v21, 4  ;;  %v484_v26 = vadd.f32 %v482_v17, %v324_v34  ;;  %v3353_v14 = vld [vmem:[#allocation26_spill] sm:$0xff]  ;;  %v3354_v17 = vld [vmem:[#allocation27_spill] sm:$0xff] }
  0xca   :  { %1958 = vtanh.f32 %v483_v28  ;;  %v309_v55 = vadd.f32 %v308_v4, %v307_v21 }
  0xcb   :  { %1960 = vtanh.f32 %v484_v26 }
  0xcc   :  { %v310_v44 = vrot.slane %v309_v55, 2 }
  0xce   :  { %v311_v39 = vadd.f32 %v310_v44, %v309_v55 }
  0xd0   :  { %v312_v63 = vrot.slane %v311_v39, 1 }
  0xd2   :  { %v313_v6 = vadd.f32 %v312_v63, %v311_v39 }
  0xd4   :  { %315 = vst.msk [vmem:[#allocation4] sm:$0x1] %vm314_vm1, %v313_v6  ;;  %v3355_v6 = vld [vmem:[#allocation28_spill] sm:$0xff] }
  0xd7   :  { %v2473_v24 = vpop.eup %1958 }
  0xd8   :  { %v513_v50 = vrot.slane %v2473_v24, %v2074_v9  ;;  %v521_v37 = vrot.slane %v2473_v24, %v2076_v10  ;;  %v529_v40 = vrot.slane %v2473_v24, %v2078_v11  ;;  %v537_v25 = vrot.slane %v2473_v24, %v2080_v12  ;;  %v2495_v59 = vpop.eup %1960 }
  0xd9   :  { %v545_v27 = vrot.slane %v2473_v24, %v2082_v13  ;;  %v553_v36 = vrot.slane %v2473_v24, %v3336_v35  ;;  %v561_v20 = vrot.slane %v2473_v24, %v3337_v42  ;;  %v569_v8 = vrot.slane %v2473_v24, %v3338_v5 }
  0xda   :  { %v514_v47 = vmul.f32 %v513_v50, %v3339_v38  ;;  %v515_v52 = vmul.f32 %v513_v50, %v3340_v51  ;;  %v522_v41 = vmul.f32 %v3341_v53, %v521_v37  ;;  %v523_v58 = vmul.f32 %v3342_v54, %v521_v37  ;;  %v3356_v37 = vld [vmem:[#allocation29_spill] sm:$0xff]  ;;  %v3366_v54 = vld [vmem:[#allocation39_spill] sm:$0xff] }
  0xdb   :  { %v530_v43 = vmul.f32 %v3343_v33, %v529_v40  ;;  %v531_v48 = vmul.f32 %v3344_v60, %v529_v40  ;;  %v538_v0 = vmul.f32 %v3345_v62, %v537_v25  ;;  %v539_v1 = vmul.f32 %v3346_v7, %v537_v25  ;;  %v3357_v25 = vld [vmem:[#allocation30_spill] sm:$0xff]  ;;  %v3364_v62 = vld [vmem:[#allocation37_spill] sm:$0xff] }
  0xdc   :  { %v546_v2 = vmul.f32 %v3347_v49, %v545_v27  ;;  %v547_v3 = vmul.f32 %v3348_v18, %v545_v27  ;;  %v554_v23 = vmul.f32 %v3349_v29, %v553_v36  ;;  %v555_v57 = vmul.f32 %v3350_v56, %v553_v36  ;;  %v3358_v36 = vld [vmem:[#allocation31_spill] sm:$0xff]  ;;  %v3363_v49 = vld [vmem:[#allocation36_spill] sm:$0xff]  ;;  %v3365_v33 = vld [vmem:[#allocation38_spill] sm:$0xff] }
  0xdd   :  { %v562_v46 = vmul.f32 %v3351_v22, %v561_v20  ;;  %v563_v15 = vmul.f32 %v3352_v19, %v561_v20  ;;  %v570_v16 = vmul.f32 %v3353_v14, %v569_v8  ;;  %v571_v21 = vmul.f32 %v3354_v17, %v569_v8  ;;  %v3359_v8 = vld [vmem:[#allocation32_spill] sm:$0xff]  ;;  %v3360_v14 = vld [vmem:[#allocation33_spill] sm:$0xff]  ;;  %v3361_v22 = vld [vmem:[#allocation34_spill] sm:$0xff] }
  0xde   :  { %v577_v34 = vrot.slane %v2495_v59, %v2074_v9  ;;  %v585_v28 = vrot.slane %v2495_v59, %v2076_v10  ;;  %v593_v4 = vrot.slane %v2495_v59, %v2078_v11  ;;  %v601_v26 = vrot.slane %v2495_v59, %v2080_v12  ;;  %v3362_v29 = vld [vmem:[#allocation35_spill] sm:$0xff] }
  0xdf   :  { %v609_v55 = vrot.slane %v2495_v59, %v2082_v13  ;;  %v617_v44 = vrot.slane %v2495_v59, %v3336_v35  ;;  %v625_v39 = vrot.slane %v2495_v59, %v3337_v42  ;;  %v633_v63 = vrot.slane %v2495_v59, %v3338_v5 }
  0xe0   :  { %v578_v50 = vmul.f32 %v3355_v6, %v577_v34  ;;  %v579_v40 = vmul.f32 %v3356_v37, %v577_v34  ;;  %v586_v27 = vmul.f32 %v3357_v25, %v585_v28  ;;  %v587_v20 = vmul.f32 %v3358_v36, %v585_v28  ;;  %v3367_v37 = vld [vmem:[#allocation40_spill] sm:$0xff] }
  0xe1   :  { %v594_v17 = vmul.f32 %v3359_v8, %v593_v4  ;;  %v595_v19 = vmul.f32 %v3360_v14, %v593_v4  ;;  %v602_v56 = vmul.f32 %v3361_v22, %v601_v26  ;;  %v603_v18 = vmul.f32 %v3362_v29, %v601_v26 }
  0xe2   :  { %v610_v7 = vmul.f32 %v3363_v49, %v609_v55  ;;  %v611_v60 = vmul.f32 %v3364_v62, %v609_v55  ;;  %v618_v6 = vmul.f32 %v3365_v33, %v617_v44  ;;  %v619_v34 = vmul.f32 %v3366_v54, %v617_v44 }
  0xe3   :  { %v626_v25 = vmul.f32 %v3367_v37, %v625_v39  ;;  %v627_v28 = vmul.f32 %v2291_v32, %v625_v39  ;;  %v634_v8 = vmul.f32 %v2296_v31, %v633_v63  ;;  %v635_v4 = vmul.f32 %v2301_v45, %v633_v63 }
  0xe4   :  { %v636_v14 = vadd.f32 %v522_v41, %v514_v47  ;;  %v637_v22 = vadd.f32 %v523_v58, %v515_v52  ;;  %v638_v36 = vadd.f32 %v538_v0, %v530_v43  ;;  %v639_v26 = vadd.f32 %v539_v1, %v531_v48 }
  0xe5   :  { %v640_v29 = vadd.f32 %v554_v23, %v546_v2  ;;  %v641_v49 = vadd.f32 %v555_v57, %v547_v3  ;;  %v642_v53 = vadd.f32 %v570_v16, %v562_v46  ;;  %v643_v55 = vadd.f32 %v571_v21, %v563_v15 }
  0xe6   :  { %v644_v62 = vadd.f32 %v586_v27, %v578_v50  ;;  %v645_v33 = vadd.f32 %v587_v20, %v579_v40  ;;  %v646_v51 = vadd.f32 %v602_v56, %v594_v17  ;;  %v647_v44 = vadd.f32 %v603_v18, %v595_v19  ;;  %v3371_v17 = vld [vmem:[#allocation11_spill] sm:$0xff]  ;;  %v3375_v20 = vld [vmem:[#allocation16_spill] sm:$0xff] }
  0xe7   :  { %v648_v54 = vadd.f32 %v618_v6, %v610_v7  ;;  %v649_v37 = vadd.f32 %v619_v34, %v611_v60  ;;  %v650_v38 = vadd.f32 %v634_v8, %v626_v25  ;;  %v651_v39 = vadd.f32 %v635_v4, %v627_v28  ;;  %v3372_v6 = vld [vmem:[#allocation12_spill] sm:$0xff]  ;;  %v3374_v25 = vld [vmem:[#allocation15_spill] sm:$0xff]  ;;  %v3376_v34 = vld [vmem:[#allocation17_spill] sm:$0xff] }
  0xe8   :  { %v652_v32 = vadd.f32 %v638_v36, %v636_v14  ;;  %v653_v31 = vadd.f32 %v639_v26, %v637_v22  ;;  %v654_v5 = vadd.f32 %v642_v53, %v640_v29  ;;  %v655_v63 = vadd.f32 %v643_v55, %v641_v49  ;;  %v3370_v14 = vld [vmem:[#allocation14_spill] sm:$0xff]  ;;  %v3378_v55 = vld [vmem:[#allocation19_spill] sm:$0xff] }
  0xe9   :  { %v656_v47 = vadd.f32 %v646_v51, %v644_v62  ;;  %v657_v52 = vadd.f32 %v647_v44, %v645_v33  ;;  %v658_v41 = vadd.f32 %v650_v38, %v648_v54  ;;  %v659_v58 = vadd.f32 %v651_v39, %v649_v37  ;;  %v3368_v33 = vld [vmem:[#allocation43_spill] sm:$0xff]  ;;  %v3373_v37 = vld [vmem:[#allocation13_spill] sm:$0xff]  ;;  %v3377_v4 = vld [vmem:[#allocation18_spill] sm:$0xff] }
  0xea   :  { %v660_v43 = vadd.f32 %v654_v5, %v652_v32  ;;  %v661_v48 = vadd.f32 %v655_v63, %v653_v31  ;;  %v487_v0 = vmul.f32 %v2473_v24, %v2454_v30  ;;  %v488_v1 = vmul.f32 %v2495_v59, %v2459_v61  ;;  %v3369_v32 = vld [vmem:[#allocation44_spill] sm:$0xff] }
  0xeb   :  { %v662_v7 = vadd.f32 %v658_v41, %v656_v47  ;;  %v663_v60 = vadd.f32 %v659_v58, %v657_v52  ;;  %v3379_v39 = vld [vmem:[#allocation20_spill] sm:$0xff]  ;;  %v3380_v47 = vld [vmem:[#allocation21_spill] sm:$0xff]  ;;  %v3381_v41 = vld [vmem:[#allocation22_spill] sm:$0xff] }
  0xec   :  { %v489_v2 = vsel %vm71_vm0, %v487_v0, 0.0  ;;  %v490_v18 = vsel %vm71_vm0, %v488_v1, 0.0  ;;  %v3383_v0 = vld [vmem:[#allocation24_spill] sm:$0xff] }
  0xed   :  { %v664_v53 = vadd.f32 %v662_v7, %v660_v43  ;;  %v665_v49 = vadd.f32 %v663_v60, %v661_v48  ;;  %v491_v51 = vadd.f32 %v490_v18, %v489_v2  ;;  %v3382_v43 = vld [vmem:[#allocation23_spill] sm:$0xff]  ;;  %v3384_v7 = vld [vmem:[#allocation25_spill] sm:$0xff]  ;;  %v3385_v2 = vld [vmem:[#allocation26_spill] sm:$0xff] }
  0xef   :  { %v666_v38 = vadd.f32 %v664_v53, %v3368_v33  ;;  %v492_v54 = vrot.slane %v491_v51, 4  ;;  %v667_v31 = vadd.f32 %v665_v49, %v3369_v32  ;;  %v3386_v53 = vld [vmem:[#allocation27_spill] sm:$0xff] }
  0xf1   :  { %1962 = vtanh.f32 %v666_v38  ;;  %v493_v5 = vadd.f32 %v492_v54, %v491_v51 }
  0xf2   :  { %1964 = vtanh.f32 %v667_v31 }
  0xf3   :  { %v494_v24 = vrot.slane %v493_v5, 2 }
  0xf5   :  { %v495_v62 = vadd.f32 %v494_v24, %v493_v5 }
  0xf7   :  { %v496_v59 = vrot.slane %v495_v62, 1 }
  0xf9   :  { %v497_v3 = vadd.f32 %v496_v59, %v495_v62  ;;  %v3387_v62 = vld [vmem:[#allocation28_spill] sm:$0xff] }
  0xfb   :  { %498 = vst.msk [vmem:[#allocation4 + $0x1] sm:$0x1] %vm314_vm1, %v497_v3  ;;  %v3388_v3 = vld [vmem:[#allocation29_spill] sm:$0xff] }
  0xfe   :  { %v2550_v29 = vpop.eup %1962 }
  0xff   :  { %v696_v23 = vrot.slane %v2550_v29, %v2074_v9  ;;  %v704_v56 = vrot.slane %v2550_v29, %v2076_v10  ;;  %v712_v57 = vrot.slane %v2550_v29, %v2078_v11  ;;  %v720_v22 = vrot.slane %v2550_v29, %v2080_v12  ;;  %v2572_v36 = vpop.eup %1964 }
 0x100   :  { %v728_v46 = vrot.slane %v2550_v29, %v2082_v13  ;;  %v736_v19 = vrot.slane %v2550_v29, %v3336_v35  ;;  %v744_v15 = vrot.slane %v2550_v29, %v3337_v42  ;;  %v752_v16 = vrot.slane %v2550_v29, %v3370_v14 }
 0x101   :  { %v697_v21 = vmul.f32 %v696_v23, %v3371_v17  ;;  %v698_v50 = vmul.f32 %v696_v23, %v3372_v6  ;;  %v705_v40 = vmul.f32 %v3373_v37, %v704_v56  ;;  %v706_v27 = vmul.f32 %v3374_v25, %v704_v56  ;;  %v3389_v56 = vld [vmem:[#allocation30_spill] sm:$0xff] }
 0x102   :  { %v713_v8 = vmul.f32 %v3375_v20, %v712_v57  ;;  %v714_v28 = vmul.f32 %v3376_v34, %v712_v57  ;;  %v721_v26 = vmul.f32 %v3377_v4, %v720_v22  ;;  %v722_v44 = vmul.f32 %v3378_v55, %v720_v22  ;;  %v3390_v22 = vld [vmem:[#allocation31_spill] sm:$0xff]  ;;  %v3397_v4 = vld [vmem:[#allocation38_spill] sm:$0xff]  ;;  %v3400_v20 = vld [vmem:[#allocation41_spill] sm:$0xff] }
 0x103   :  { %v729_v63 = vmul.f32 %v3379_v39, %v728_v46  ;;  %v730_v52 = vmul.f32 %v3380_v47, %v728_v46  ;;  %v737_v58 = vmul.f32 %v3381_v41, %v736_v19  ;;  %v738_v48 = vmul.f32 %v3382_v43, %v736_v19  ;;  %v3391_v19 = vld [vmem:[#allocation32_spill] sm:$0xff]  ;;  %v3396_v39 = vld [vmem:[#allocation37_spill] sm:$0xff]  ;;  %v3398_v34 = vld [vmem:[#allocation39_spill] sm:$0xff] }
 0x104   :  { %v745_v1 = vmul.f32 %v3383_v0, %v744_v15  ;;  %v746_v60 = vmul.f32 %v3384_v7, %v744_v15  ;;  %v753_v18 = vmul.f32 %v3385_v2, %v752_v16  ;;  %v754_v49 = vmul.f32 %v3386_v53, %v752_v16  ;;  %v3392_v16 = vld [vmem:[#allocation33_spill] sm:$0xff]  ;;  %v3393_v2 = vld [vmem:[#allocation34_spill] sm:$0xff]  ;;  %v3394_v0 = vld [vmem:[#allocation35_spill] sm:$0xff] }
 0x105   :  { %v760_v51 = vrot.slane %v2572_v36, %v2074_v9  ;;  %v768_v33 = vrot.slane %v2572_v36, %v2076_v10  ;;  %v776_v38 = vrot.slane %v2572_v36, %v2078_v11  ;;  %v784_v54 = vrot.slane %v2572_v36, %v2080_v12  ;;  %v3395_v41 = vld [vmem:[#allocation36_spill] sm:$0xff] }
 0x106   :  { %v792_v32 = vrot.slane %v2572_v36, %v2082_v13  ;;  %v800_v31 = vrot.slane %v2572_v36, %v3336_v35  ;;  %v808_v5 = vrot.slane %v2572_v36, %v3337_v42  ;;  %v816_v24 = vrot.slane %v2572_v36, %v3370_v14 }
 0x107   :  { %v761_v59 = vmul.f32 %v3387_v62, %v760_v51  ;;  %v762_v23 = vmul.f32 %v3388_v3, %v760_v51  ;;  %v769_v57 = vmul.f32 %v3389_v56, %v768_v33  ;;  %v770_v46 = vmul.f32 %v3390_v22, %v768_v33  ;;  %v3399_v3 = vld [vmem:[#allocation40_spill] sm:$0xff]  ;;  %v3401_v22 = vld [vmem:[#allocation42_spill] sm:$0xff] }
 0x108   :  { %v777_v15 = vmul.f32 %v3391_v19, %v776_v38  ;;  %v778_v53 = vmul.f32 %v3392_v16, %v776_v38  ;;  %v785_v7 = vmul.f32 %v3393_v2, %v784_v54  ;;  %v786_v43 = vmul.f32 %v3394_v0, %v784_v54 }
 0x109   :  { %v793_v47 = vmul.f32 %v3395_v41, %v792_v32  ;;  %v794_v55 = vmul.f32 %v3396_v39, %v792_v32  ;;  %v801_v62 = vmul.f32 %v3397_v4, %v800_v31  ;;  %v802_v51 = vmul.f32 %v3398_v34, %v800_v31 }
 0x10a   :  { %v809_v56 = vmul.f32 %v3399_v3, %v808_v5  ;;  %v810_v33 = vmul.f32 %v3400_v20, %v808_v5  ;;  %v817_v19 = vmul.f32 %v3401_v22, %v816_v24  ;;  %v818_v38 = vmul.f32 %v2301_v45, %v816_v24 }
 0x10b   :  { %v819_v16 = vadd.f32 %v705_v40, %v697_v21  ;;  %v820_v2 = vadd.f32 %v706_v27, %v698_v50  ;;  %v821_v25 = vadd.f32 %v721_v26, %v713_v8  ;;  %v822_v54 = vadd.f32 %v722_v44, %v714_v28 }
 0x10c   :  { %v823_v0 = vadd.f32 %v737_v58, %v729_v63  ;;  %v824_v41 = vadd.f32 %v738_v48, %v730_v52  ;;  %v825_v37 = vadd.f32 %v753_v18, %v745_v1  ;;  %v826_v32 = vadd.f32 %v754_v49, %v746_v60 }
 0x10d   :  { %v827_v39 = vadd.f32 %v769_v57, %v761_v59  ;;  %v828_v4 = vadd.f32 %v770_v46, %v762_v23  ;;  %v829_v6 = vadd.f32 %v785_v7, %v777_v15  ;;  %v830_v31 = vadd.f32 %v786_v43, %v778_v53  ;;  %v3404_v53 = vld [vmem:[#allocation14_spill] sm:$0xff]  ;;  %v3409_v15 = vld [vmem:[#allocation16_spill] sm:$0xff] }
 0x10e   :  { %v831_v34 = vadd.f32 %v801_v62, %v793_v47  ;;  %v832_v3 = vadd.f32 %v802_v51, %v794_v55  ;;  %v833_v17 = vadd.f32 %v817_v19, %v809_v56  ;;  %v834_v5 = vadd.f32 %v818_v38, %v810_v33  ;;  %v3405_v62 = vld [vmem:[#allocation11_spill] sm:$0xff]  ;;  %v3407_v56 = vld [vmem:[#allocation13_spill] sm:$0xff]  ;;  %v3411_v38 = vld [vmem:[#allocation18_spill] sm:$0xff] }
 0x10f   :  { %v835_v20 = vadd.f32 %v821_v25, %v819_v16  ;;  %v836_v22 = vadd.f32 %v822_v54, %v820_v2  ;;  %v837_v14 = vadd.f32 %v825_v37, %v823_v0  ;;  %v838_v24 = vadd.f32 %v826_v32, %v824_v41  ;;  %v3410_v51 = vld [vmem:[#allocation17_spill] sm:$0xff]  ;;  %v3412_v32 = vld [vmem:[#allocation19_spill] sm:$0xff] }
 0x110   :  { %v839_v21 = vadd.f32 %v829_v6, %v827_v39  ;;  %v840_v50 = vadd.f32 %v830_v31, %v828_v4  ;;  %v841_v40 = vadd.f32 %v833_v17, %v831_v34  ;;  %v842_v27 = vadd.f32 %v834_v5, %v832_v3  ;;  %v3402_v4 = vld [vmem:[#allocation45_spill] sm:$0xff]  ;;  %v3403_v34 = vld [vmem:[#allocation46_spill] sm:$0xff]  ;;  %v3406_v3 = vld [vmem:[#allocation12_spill] sm:$0xff] }
 0x111   :  { %v843_v8 = vadd.f32 %v837_v14, %v835_v20  ;;  %v844_v28 = vadd.f32 %v838_v24, %v836_v22  ;;  %v670_v26 = vmul.f32 %v2550_v29, %v2454_v30  ;;  %v671_v44 = vmul.f32 %v2572_v36, %v2459_v61  ;;  %v3408_v22 = vld [vmem:[#allocation15_spill] sm:$0xff]  ;;  %v3413_v5 = vld [vmem:[#allocation20_spill] sm:$0xff] }
 0x112   :  { %v845_v63 = vadd.f32 %v841_v40, %v839_v21  ;;  %v846_v55 = vadd.f32 %v842_v27, %v840_v50  ;;  %v3414_v21 = vld [vmem:[#allocation21_spill] sm:$0xff]  ;;  %v3415_v40 = vld [vmem:[#allocation22_spill] sm:$0xff] }
 0x113   :  { %v672_v47 = vsel %vm71_vm0, %v670_v26, 0.0  ;;  %v673_v25 = vsel %vm71_vm0, %v671_v44, 0.0  ;;  %v3417_v26 = vld [vmem:[#allocation24_spill] sm:$0xff] }
 0x114   :  { %v847_v37 = vadd.f32 %v845_v63, %v843_v8  ;;  %v848_v52 = vadd.f32 %v846_v55, %v844_v28  ;;  %v674_v6 = vadd.f32 %v673_v25, %v672_v47  ;;  %v3416_v8 = vld [vmem:[#allocation23_spill] sm:$0xff]  ;;  %v3418_v63 = vld [vmem:[#allocation25_spill] sm:$0xff]  ;;  %v3419_v47 = vld [vmem:[#allocation26_spill] sm:$0xff] }
 0x116   :  { %v849_v17 = vadd.f32 %v847_v37, %v3402_v4  ;;  %v850_v14 = vadd.f32 %v848_v52, %v3403_v34  ;;  %v675_v20 = vrot.slane %v674_v6, 4  ;;  %v3420_v37 = vld [vmem:[#allocation27_spill] sm:$0xff] }
 0x118   :  { %1966 = vtanh.f32 %v849_v17  ;;  %v676_v39 = vadd.f32 %v675_v20, %v674_v6 }
 0x119   :  { %1968 = vtanh.f32 %v850_v14 }
 0x11a   :  { %v677_v29 = vrot.slane %v676_v39, 2 }
 0x11c   :  { %v678_v41 = vadd.f32 %v677_v29, %v676_v39 }
 0x11e   :  { %v679_v36 = vrot.slane %v678_v41, 1 }
 0x120   :  { %v680_v58 = vadd.f32 %v679_v36, %v678_v41  ;;  %v3421_v41 = vld [vmem:[#allocation28_spill] sm:$0xff] }
 0x122   :  { %681 = vst.msk [vmem:[#allocation4 + $0x2] sm:$0x1] %vm314_vm1, %v680_v58  ;;  %v3422_v58 = vld [vmem:[#allocation29_spill] sm:$0xff] }
 0x125   :  { %v2627_v43 = vpop.eup %1966 }
 0x126   :  { %v879_v48 = vrot.slane %v2627_v43, %v2074_v9  ;;  %v887_v0 = vrot.slane %v2627_v43, %v2076_v10  ;;  %v895_v1 = vrot.slane %v2627_v43, %v2078_v11  ;;  %v903_v7 = vrot.slane %v2627_v43, %v2080_v12  ;;  %v2649_v19 = vpop.eup %1968 }
 0x127   :  { %v911_v60 = vrot.slane %v2627_v43, %v2082_v13  ;;  %v919_v2 = vrot.slane %v2627_v43, %v3336_v35  ;;  %v927_v18 = vrot.slane %v2627_v43, %v3337_v42  ;;  %v935_v49 = vrot.slane %v2627_v43, %v3404_v53 }
 0x128   :  { %v880_v59 = vmul.f32 %v879_v48, %v3405_v62  ;;  %v881_v23 = vmul.f32 %v879_v48, %v3406_v3  ;;  %v888_v57 = vmul.f32 %v3407_v56, %v887_v0  ;;  %v889_v46 = vmul.f32 %v3408_v22, %v887_v0  ;;  %v3423_v0 = vld [vmem:[#allocation30_spill] sm:$0xff]  ;;  %v3428_v22 = vld [vmem:[#allocation35_spill] sm:$0xff] }
 0x129   :  { %v896_v16 = vmul.f32 %v3409_v15, %v895_v1  ;;  %v897_v33 = vmul.f32 %v3410_v51, %v895_v1  ;;  %v904_v54 = vmul.f32 %v3411_v38, %v903_v7  ;;  %v905_v31 = vmul.f32 %v3412_v32, %v903_v7  ;;  %v3424_v7 = vld [vmem:[#allocation31_spill] sm:$0xff]  ;;  %v3427_v3 = vld [vmem:[#allocation34_spill] sm:$0xff]  ;;  %v3429_v51 = vld [vmem:[#allocation36_spill] sm:$0xff] }
 0x12a   :  { %v912_v24 = vmul.f32 %v3413_v5, %v911_v60  ;;  %v913_v50 = vmul.f32 %v3414_v21, %v911_v60  ;;  %v920_v27 = vmul.f32 %v3415_v40, %v919_v2  ;;  %v921_v28 = vmul.f32 %v3416_v8, %v919_v2  ;;  %v3425_v2 = vld [vmem:[#allocation32_spill] sm:$0xff]  ;;  %v3430_v32 = vld [vmem:[#allocation37_spill] sm:$0xff]  ;;  %v3431_v21 = vld [vmem:[#allocation38_spill] sm:$0xff] }
 0x12b   :  { %v928_v44 = vmul.f32 %v3417_v26, %v927_v18  ;;  %v929_v55 = vmul.f32 %v3418_v63, %v927_v18  ;;  %v936_v25 = vmul.f32 %v3419_v47, %v935_v49  ;;  %v937_v52 = vmul.f32 %v3420_v37, %v935_v49  ;;  %v3426_v49 = vld [vmem:[#allocation33_spill] sm:$0xff]  ;;  %v3432_v8 = vld [vmem:[#allocation39_spill] sm:$0xff]  ;;  %v3433_v63 = vld [vmem:[#allocation40_spill] sm:$0xff] }
 0x12c   :  { %v943_v6 = vrot.slane %v2649_v19, %v2074_v9  ;;  %v951_v4 = vrot.slane %v2649_v19, %v2076_v10  ;;  %v959_v17 = vrot.slane %v2649_v19, %v2078_v11  ;;  %v967_v34 = vrot.slane %v2649_v19, %v2080_v12  ;;  %v3434_v37 = vld [vmem:[#allocation41_spill] sm:$0xff] }
 0x12d   :  { %v975_v14 = vrot.slane %v2649_v19, %v2082_v13  ;;  %v983_v20 = vrot.slane %v2649_v19, %v3336_v35  ;;  %v991_v39 = vrot.slane %v2649_v19, %v3337_v42  ;;  %v999_v29 = vrot.slane %v2649_v19, %v3404_v53 }
 0x12e   :  { %v944_v36 = vmul.f32 %v3421_v41, %v943_v6  ;;  %v945_v48 = vmul.f32 %v3422_v58, %v943_v6  ;;  %v952_v1 = vmul.f32 %v3423_v0, %v951_v4  ;;  %v953_v60 = vmul.f32 %v3424_v7, %v951_v4  ;;  %v3435_v4 = vld [vmem:[#allocation42_spill] sm:$0xff] }
 0x12f   :  { %v960_v18 = vmul.f32 %v3425_v2, %v959_v17  ;;  %v961_v62 = vmul.f32 %v3426_v49, %v959_v17  ;;  %v968_v56 = vmul.f32 %v3427_v3, %v967_v34  ;;  %v969_v15 = vmul.f32 %v3428_v22, %v967_v34 }
 0x130   :  { %v976_v38 = vmul.f32 %v3429_v51, %v975_v14  ;;  %v977_v5 = vmul.f32 %v3430_v32, %v975_v14  ;;  %v984_v40 = vmul.f32 %v3431_v21, %v983_v20  ;;  %v985_v26 = vmul.f32 %v3432_v8, %v983_v20 }
 0x131   :  { %v992_v47 = vmul.f32 %v3433_v63, %v991_v39  ;;  %v993_v6 = vmul.f32 %v3434_v37, %v991_v39  ;;  %v1000_v41 = vmul.f32 %v3435_v4, %v999_v29  ;;  %v1001_v17 = vmul.f32 %v2301_v45, %v999_v29 }
 0x132   :  { %v1002_v58 = vadd.f32 %v888_v57, %v880_v59  ;;  %v1003_v0 = vadd.f32 %v889_v46, %v881_v23  ;;  %v1004_v7 = vadd.f32 %v904_v54, %v896_v16  ;;  %v1005_v34 = vadd.f32 %v905_v31, %v897_v33 }
 0x133   :  { %v1006_v2 = vadd.f32 %v920_v27, %v912_v24  ;;  %v1007_v49 = vadd.f32 %v921_v28, %v913_v50  ;;  %v1008_v3 = vadd.f32 %v936_v25, %v928_v44  ;;  %v1009_v14 = vadd.f32 %v937_v52, %v929_v55  ;;  %v3436_v52 = vld [vmem:[#allocation47_spill] sm:$0xff] }
 0x134   :  { %v1010_v22 = vadd.f32 %v952_v1, %v944_v36  ;;  %v1011_v51 = vadd.f32 %v953_v60, %v945_v48  ;;  %v1012_v32 = vadd.f32 %v968_v56, %v960_v18  ;;  %v1013_v20 = vadd.f32 %v969_v15, %v961_v62  ;;  %v3437_v36 = vld [vmem:[#allocation48_spill] sm:$0xff]  ;;  %v2712_v56 = vld [vmem:[%s3121_s2 + $0x8] sm:$0xff]  ;;  %v2717_v15 = vld [vmem:[%s3121_s2 + $0x10] sm:$0xff] }
 0x135   :  { %v1014_v21 = vadd.f32 %v984_v40, %v976_v38  ;;  %v1015_v8 = vadd.f32 %v985_v26, %v977_v5  ;;  %v1016_v63 = vadd.f32 %v1000_v41, %v992_v47  ;;  %v1017_v39 = vadd.f32 %v1001_v17, %v993_v6  ;;  %v2707_v62 = vld [vmem:[%s3121_s2] sm:$0xff]  ;;  %3439 = vst [vmem:[#allocation10_spill] sm:$0xff] %v2712_v56  ;;  %v2722_v38 = vld [vmem:[%s3121_s2 + $0x18] sm:$0xff]  ;;  %v2734_v26 = vld [vmem:[%s3121_s2 + $0x28] sm:$0xff] }
 0x136   :  { %v1018_v37 = vadd.f32 %v1004_v7, %v1002_v58  ;;  %v1019_v4 = vadd.f32 %v1005_v34, %v1003_v0  ;;  %v1020_v53 = vadd.f32 %v1008_v3, %v1006_v2  ;;  %v1021_v45 = vadd.f32 %v1009_v14, %v1007_v49  ;;  %3438 = vst [vmem:[#allocation9_spill] sm:$0xff] %v2707_v62  ;;  %v2729_v40 = vld [vmem:[%s3121_s2 + $0x20] sm:$0xff]  ;;  %v2739_v47 = vld [vmem:[%s3121_s2 + $0x30] sm:$0xff]  ;;  %v2750_v58 = vld [vmem:[%s3121_s2 + $0x38] sm:$0xff] }
 0x137   :  { %v1022_v59 = vadd.f32 %v1012_v32, %v1010_v22  ;;  %v1023_v23 = vadd.f32 %v1013_v20, %v1011_v51  ;;  %v1024_v57 = vadd.f32 %v1016_v63, %v1014_v21  ;;  %v1025_v46 = vadd.f32 %v1017_v39, %v1015_v8  ;;  %3440 = vst [vmem:[#allocation43_spill] sm:$0xff] %v2717_v15  ;;  %v2757_v7 = vld [vmem:[%s3121_s2 + $0x40] sm:$0xff]  ;;  %v2762_v34 = vld [vmem:[%s3121_s2 + $0x48] sm:$0xff]  ;;  %v2769_v49 = vld [vmem:[%s3121_s2 + $0x50] sm:$0xff] }
 0x138   :  { %v1026_v16 = vadd.f32 %v1020_v53, %v1018_v37  ;;  %v1027_v33 = vadd.f32 %v1021_v45, %v1019_v4  ;;  %v853_v54 = vmul.f32 %v2627_v43, %v2454_v30  ;;  %v854_v31 = vmul.f32 %v2649_v19, %v2459_v61  ;;  %3441 = vst [vmem:[#allocation44_spill] sm:$0xff] %v2722_v38  ;;  %v2774_v3 = vld [vmem:[%s3121_s2 + $0x58] sm:$0xff]  ;;  %v2781_v22 = vld [vmem:[%s3121_s2 + $0x60] sm:$0xff]  ;;  %v3451_v32 = vld [vmem:[#allocation14_spill] sm:$0xff] }
 0x139   :  { %v1028_v24 = vadd.f32 %v1024_v57, %v1022_v59  ;;  %v1029_v50 = vadd.f32 %v1025_v46, %v1023_v23  ;;  %3442 = vst [vmem:[#allocation45_spill] sm:$0xff] %v2729_v40  ;;  %3443 = vst [vmem:[#allocation46_spill] sm:$0xff] %v2734_v26  ;;  %v2794_v37 = vld [vmem:[%s3121_s2 + $0x68] sm:$0xff]  ;;  %v2799_v4 = vld [vmem:[%s3121_s2 + $0x70] sm:$0xff] }
 0x13a   :  { %v855_v27 = vsel %vm71_vm0, %v853_v54, 0.0  ;;  %v856_v28 = vsel %vm71_vm0, %v854_v31, 0.0  ;;  %3444 = vst [vmem:[#allocation11_spill] sm:$0xff] %v2739_v47  ;;  %3445 = vst [vmem:[#allocation12_spill] sm:$0xff] %v2750_v58  ;;  %v2804_v45 = vld [vmem:[%s3121_s2 + $0x78] sm:$0xff] }
 0x13b   :  { %v1030_v44 = vadd.f32 %v1028_v24, %v1026_v16  ;;  %v1031_v55 = vadd.f32 %v1029_v50, %v1027_v33  ;;  %v857_v25 = vadd.f32 %v856_v28, %v855_v27  ;;  %3446 = vst [vmem:[#allocation13_spill] sm:$0xff] %v2757_v7  ;;  %3447 = vst [vmem:[#allocation15_spill] sm:$0xff] %v2762_v34  ;;  %v2815_v33 = vld [vmem:[%s3121_s2 + $0x80] sm:$0xff]  ;;  %v2824_v27 = vld [vmem:[%s3121_s2 + $0x88] sm:$0xff] }
 0x13c   :  { %3448 = vst [vmem:[#allocation16_spill] sm:$0xff] %v2769_v49  ;;  %3449 = vst [vmem:[#allocation17_spill] sm:$0xff] %v2774_v3  ;;  %v2829_v28 = vld [vmem:[%s3121_s2 + $0x90] sm:$0xff] }
 0x13d   :  { %v1032_v29 = vadd.f32 %v1030_v44, %v3436_v52  ;;  %v1033_v53 = vadd.f32 %v1031_v55, %v3437_v36  ;;  %v858_v48 = vrot.slane %v857_v25, 4  ;;  %3450 = vst [vmem:[#allocation18_spill] sm:$0xff] %v2781_v22  ;;  %3452 = vst [vmem:[#allocation19_spill] sm:$0xff] %v2794_v37  ;;  %v2834_v44 = vld [vmem:[%s3121_s2 + $0x98] sm:$0xff]  ;;  %v2843_v36 = vld [vmem:[%s3121_s2 + $0xa0] sm:$0xff] }
 0x13e   :  { %3453 = vst [vmem:[#allocation20_spill] sm:$0xff] %v2799_v4  ;;  %3454 = vst [vmem:[#allocation21_spill] sm:$0xff] %v2804_v45 }
 0x13f   :  { %1970 = vtanh.f32 %v1032_v29  ;;  %v859_v1 = vadd.f32 %v858_v48, %v857_v25  ;;  %3455 = vst [vmem:[#allocation22_spill] sm:$0xff] %v2815_v33  ;;  %3456 = vst [vmem:[#allocation23_spill] sm:$0xff] %v2824_v27  ;;  %v2853_v48 = vld [vmem:[%s3121_s2 + $0xb0] sm:$0xff] }
 0x140   :  { %1972 = vtanh.f32 %v1033_v53  ;;  %3457 = vst [vmem:[#allocation24_spill] sm:$0xff] %v2829_v28  ;;  %3458 = vst [vmem:[#allocation25_spill] sm:$0xff] %v2834_v44  ;;  %v2848_v53 = vld [vmem:[%s3121_s2 + $0xa8] sm:$0xff] }
 0x141   :  { %v860_v43 = vrot.slane %v859_v1, 2  ;;  %3459 = vst [vmem:[#allocation26_spill] sm:$0xff] %v2843_v36  ;;  %3460 = vst [vmem:[#allocation27_spill] sm:$0xff] %v2848_v53 }
 0x142   :  { %3461 = vst [vmem:[#allocation28_spill] sm:$0xff] %v2853_v48 }
 0x143   :  { %v861_v60 = vadd.f32 %v860_v43, %v859_v1 }
 0x145   :  { %v862_v19 = vrot.slane %v861_v60, 1 }
 0x147   :  { %v863_v18 = vadd.f32 %v862_v19, %v861_v60  ;;  %v2864_v19 = vld [vmem:[%s3121_s2 + $0xb8] sm:$0xff] }
 0x148   :  { %3462 = vst [vmem:[#allocation29_spill] sm:$0xff] %v2864_v19 }
 0x149   :  { %864 = vst.msk [vmem:[#allocation4 + $0x3] sm:$0x1] %vm314_vm1, %v863_v18 }
 0x14c   :  { %v2724_v5 = vpop.eup %1970 }
 0x14d   :  { %v1062_v6 = vrot.slane %v2724_v5, %v2074_v9  ;;  %v1070_v41 = vrot.slane %v2724_v5, %v2076_v10  ;;  %v1078_v17 = vrot.slane %v2724_v5, %v2078_v11  ;;  %v1086_v0 = vrot.slane %v2724_v5, %v2080_v12  ;;  %v2806_v59 = vpop.eup %1972 }
 0x14e   :  { %v1094_v2 = vrot.slane %v2724_v5, %v2082_v13  ;;  %v1102_v14 = vrot.slane %v2724_v5, %v3336_v35  ;;  %v1110_v51 = vrot.slane %v2724_v5, %v3337_v42  ;;  %v1118_v20 = vrot.slane %v2724_v5, %v3451_v32 }
 0x14f   :  { %v1063_v21 = vmul.f32 %v1062_v6, %v2707_v62  ;;  %v1064_v8 = vmul.f32 %v1062_v6, %v2712_v56  ;;  %v1071_v63 = vmul.f32 %v2717_v15, %v1070_v41  ;;  %v1072_v39 = vmul.f32 %v2722_v38, %v1070_v41  ;;  %v2871_v6 = vld [vmem:[%s3121_s2 + $0xc0] sm:$0xff]  ;;  %v2876_v41 = vld [vmem:[%s3121_s2 + $0xc8] sm:$0xff] }
 0x150   :  { %v1079_v23 = vmul.f32 %v2729_v40, %v1078_v17  ;;  %v1080_v57 = vmul.f32 %v2734_v26, %v1078_v17  ;;  %v1087_v46 = vmul.f32 %v2739_v47, %v1086_v0  ;;  %v1088_v16 = vmul.f32 %v2750_v58, %v1086_v0  ;;  %3463 = vst [vmem:[#allocation30_spill] sm:$0xff] %v2871_v6  ;;  %v2883_v0 = vld [vmem:[%s3121_s2 + $0xd0] sm:$0xff] }
 0x151   :  { %v1095_v54 = vmul.f32 %v2757_v7, %v1094_v2  ;;  %v1096_v31 = vmul.f32 %v2762_v34, %v1094_v2  ;;  %v1103_v24 = vmul.f32 %v2769_v49, %v1102_v14  ;;  %v1104_v50 = vmul.f32 %v2774_v3, %v1102_v14  ;;  %3464 = vst [vmem:[#allocation31_spill] sm:$0xff] %v2876_v41  ;;  %v2888_v2 = vld [vmem:[%s3121_s2 + $0xd8] sm:$0xff]  ;;  %v2908_v49 = vld [vmem:[%s3121_s2 + $0xe8] sm:$0xff]  ;;  %v2913_v34 = vld [vmem:[%s3121_s2 + $0xf0] sm:$0xff] }
 0x152   :  { %v1111_v55 = vmul.f32 %v2781_v22, %v1110_v51  ;;  %v1112_v25 = vmul.f32 %v2794_v37, %v1110_v51  ;;  %v1119_v52 = vmul.f32 %v2799_v4, %v1118_v20  ;;  %v1120_v29 = vmul.f32 %v2804_v45, %v1118_v20  ;;  %3465 = vst [vmem:[#allocation32_spill] sm:$0xff] %v2883_v0  ;;  %v2895_v51 = vld [vmem:[%s3121_s2 + $0xe0] sm:$0xff] }
 0x153   :  { %v1126_v1 = vrot.slane %v2806_v59, %v2074_v9  ;;  %v1134_v43 = vrot.slane %v2806_v59, %v2076_v10  ;;  %v1142_v60 = vrot.slane %v2806_v59, %v2078_v11  ;;  %v1150_v18 = vrot.slane %v2806_v59, %v2080_v12  ;;  %3466 = vst [vmem:[#allocation33_spill] sm:$0xff] %v2888_v2 }
 0x154   :  { %v1158_v17 = vrot.slane %v2806_v59, %v2082_v13  ;;  %v1166_v14 = vrot.slane %v2806_v59, %v3336_v35  ;;  %3467 = vst [vmem:[#allocation34_spill] sm:$0xff] %v2895_v51  ;;  %v1174_v20 = vrot.slane %v2806_v59, %v3337_v42  ;;  %v1182_v45 = vrot.slane %v2806_v59, %v3451_v32 }
 0x155   :  { %v1127_v4 = vmul.f32 %v2815_v33, %v1126_v1  ;;  %v1128_v37 = vmul.f32 %v2824_v27, %v1126_v1  ;;  %v1135_v22 = vmul.f32 %v2829_v28, %v1134_v43  ;;  %v1136_v3 = vmul.f32 %v2834_v44, %v1134_v43  ;;  %3468 = vst [vmem:[#allocation35_spill] sm:$0xff] %v2908_v49  ;;  %v2918_v33 = vld [vmem:[%s3121_s2 + $0xf8] sm:$0xff] }
 0x156   :  { %3469 = vst [vmem:[#allocation36_spill] sm:$0xff] %v2913_v34  ;;  %v1143_v1 = vmul.f32 %v2843_v36, %v1142_v60  ;;  %v1144_v28 = vmul.f32 %v2848_v53, %v1142_v60  ;;  %v1151_v43 = vmul.f32 %v2853_v48, %v1150_v18  ;;  %v1152_v44 = vmul.f32 %v2864_v19, %v1150_v18 }
 0x157   :  { %v1159_v27 = vmul.f32 %v2871_v6, %v1158_v17  ;;  %v1160_v7 = vmul.f32 %v2876_v41, %v1158_v17  ;;  %v1167_v58 = vmul.f32 %v2883_v0, %v1166_v14  ;;  %v1168_v47 = vmul.f32 %v2888_v2, %v1166_v14 }
 0x158   :  { %v1175_v26 = vmul.f32 %v2895_v51, %v1174_v20  ;;  %v1176_v40 = vmul.f32 %v2908_v49, %v1174_v20  ;;  %v1183_v36 = vmul.f32 %v2913_v34, %v1182_v45  ;;  %v1184_v60 = vmul.f32 %v2918_v33, %v1182_v45 }
 0x159   :  { %v1185_v53 = vadd.f32 %v1071_v63, %v1063_v21  ;;  %v1186_v48 = vadd.f32 %v1072_v39, %v1064_v8  ;;  %v1187_v38 = vadd.f32 %v1087_v46, %v1079_v23  ;;  %v1188_v18 = vadd.f32 %v1088_v16, %v1080_v57 }
 0x15a   :  { %v1189_v19 = vadd.f32 %v1103_v24, %v1095_v54  ;;  %v1190_v6 = vadd.f32 %v1104_v50, %v1096_v31  ;;  %v1191_v15 = vadd.f32 %v1119_v52, %v1111_v55  ;;  %v1192_v17 = vadd.f32 %v1120_v29, %v1112_v25  ;;  %v3473_v55 = vld [vmem:[#allocation9_spill] sm:$0xff]  ;;  %v3474_v52 = vld [vmem:[#allocation10_spill] sm:$0xff] }
 0x15b   :  { %v1193_v41 = vadd.f32 %v1135_v22, %v1127_v4  ;;  %v1194_v0 = vadd.f32 %v1136_v3, %v1128_v37  ;;  %v1195_v56 = vadd.f32 %v1151_v43, %v1143_v1  ;;  %v1196_v14 = vadd.f32 %v1152_v44, %v1144_v28  ;;  %v3471_v37 = vld [vmem:[#allocation50_spill] sm:$0xff]  ;;  %v3479_v1 = vld [vmem:[#allocation11_spill] sm:$0xff] }
 0x15c   :  { %v1197_v2 = vadd.f32 %v1167_v58, %v1159_v27  ;;  %v1198_v51 = vadd.f32 %v1168_v47, %v1160_v7  ;;  %v1199_v62 = vadd.f32 %v1183_v36, %v1175_v26  ;;  %v1200_v20 = vadd.f32 %v1184_v60, %v1176_v40  ;;  %v3470_v7 = vld [vmem:[#allocation49_spill] sm:$0xff]  ;;  %v3472_v28 = vld [vmem:[#allocation14_spill] sm:$0xff]  ;;  %v3475_v36 = vld [vmem:[#allocation43_spill] sm:$0xff] }
 0x15d   :  { %v1201_v49 = vadd.f32 %v1187_v38, %v1185_v53  ;;  %v1202_v34 = vadd.f32 %v1188_v18, %v1186_v48  ;;  %v1203_v32 = vadd.f32 %v1191_v15, %v1189_v19  ;;  %v1204_v45 = vadd.f32 %v1192_v17, %v1190_v6  ;;  %v3476_v48 = vld [vmem:[#allocation44_spill] sm:$0xff]  ;;  %v3481_v17 = vld [vmem:[#allocation13_spill] sm:$0xff] }
 0x15e   :  { %v1205_v21 = vadd.f32 %v1195_v56, %v1193_v41  ;;  %v1206_v8 = vadd.f32 %v1196_v14, %v1194_v0  ;;  %v1207_v63 = vadd.f32 %v1199_v62, %v1197_v2  ;;  %v1208_v39 = vadd.f32 %v1200_v20, %v1198_v51  ;;  %v3477_v41 = vld [vmem:[#allocation45_spill] sm:$0xff]  ;;  %v3478_v2 = vld [vmem:[#allocation46_spill] sm:$0xff]  ;;  %v3480_v60 = vld [vmem:[#allocation12_spill] sm:$0xff] }
 0x15f   :  { %v1209_v23 = vadd.f32 %v1203_v32, %v1201_v49  ;;  %v1210_v57 = vadd.f32 %v1204_v45, %v1202_v34  ;;  %v1036_v22 = vmul.f32 %v2724_v5, %v2454_v30  ;;  %v1037_v3 = vmul.f32 %v2806_v59, %v2459_v61  ;;  %v3482_v20 = vld [vmem:[#allocation15_spill] sm:$0xff] }
 0x160   :  { %v1211_v58 = vadd.f32 %v1207_v63, %v1205_v21  ;;  %v1212_v47 = vadd.f32 %v1208_v39, %v1206_v8  ;;  %v3483_v21 = vld [vmem:[#allocation16_spill] sm:$0xff]  ;;  %v3484_v63 = vld [vmem:[#allocation17_spill] sm:$0xff] }
 0x161   :  { %v1038_v40 = vsel %vm71_vm0, %v1036_v22, 0.0  ;;  %v1039_v38 = vsel %vm71_vm0, %v1037_v3, 0.0  ;;  %v3486_v22 = vld [vmem:[#allocation19_spill] sm:$0xff] }
 0x162   :  { %v1213_v15 = vadd.f32 %v1211_v58, %v1209_v23  ;;  %v1214_v26 = vadd.f32 %v1212_v47, %v1210_v57  ;;  %v1040_v56 = vadd.f32 %v1039_v38, %v1038_v40  ;;  %v3485_v23 = vld [vmem:[#allocation18_spill] sm:$0xff]  ;;  %v3487_v58 = vld [vmem:[#allocation20_spill] sm:$0xff]  ;;  %v3488_v40 = vld [vmem:[#allocation21_spill] sm:$0xff] }
 0x164   :  { %v1215_v62 = vadd.f32 %v1213_v15, %v3470_v7  ;;  %v1216_v49 = vadd.f32 %v1214_v26, %v3471_v37  ;;  %v1041_v34 = vrot.slane %v1040_v56, 4 }
 0x166   :  { %1974 = vtanh.f32 %v1215_v62  ;;  %v1042_v32 = vadd.f32 %v1041_v34, %v1040_v56 }
 0x167   :  { %1976 = vtanh.f32 %v1216_v49 }
 0x168   :  { %v1043_v30 = vrot.slane %v1042_v32, 2 }
 0x16a   :  { %v1044_v5 = vadd.f32 %v1043_v30, %v1042_v32  ;;  %v3489_v32 = vld [vmem:[#allocation22_spill] sm:$0xff] }
 0x16c   :  { %v1045_v61 = vrot.slane %v1044_v5, 1 }
 0x16e   :  { %v1046_v4 = vadd.f32 %v1045_v61, %v1044_v5  ;;  %v3490_v5 = vld [vmem:[#allocation23_spill] sm:$0xff] }
 0x170   :  { %1047 = vst.msk [vmem:[#allocation4 + $0x4] sm:$0x1] %vm314_vm1, %v1046_v4  ;;  %v3491_v4 = vld [vmem:[#allocation24_spill] sm:$0xff] }
 0x173   :  { %v2941_v59 = vpop.eup %1974 }
 0x174   :  { %v1245_v46 = vrot.slane %v2941_v59, %v2074_v9  ;;  %v1253_v16 = vrot.slane %v2941_v59, %v2076_v10  ;;  %v1261_v54 = vrot.slane %v2941_v59, %v2078_v11  ;;  %v1269_v31 = vrot.slane %v2941_v59, %v2080_v12  ;;  %v2963_v6 = vpop.eup %1976 }
 0x175   :  { %v1277_v24 = vrot.slane %v2941_v59, %v2082_v13  ;;  %v1285_v50 = vrot.slane %v2941_v59, %v3336_v35  ;;  %v1293_v27 = vrot.slane %v2941_v59, %v3337_v42  ;;  %v1301_v44 = vrot.slane %v2941_v59, %v3472_v28 }
 0x176   :  { %v1246_v25 = vmul.f32 %v1245_v46, %v3473_v55  ;;  %v1247_v29 = vmul.f32 %v1245_v46, %v3474_v52  ;;  %v1254_v53 = vmul.f32 %v3475_v36, %v1253_v16  ;;  %v1255_v19 = vmul.f32 %v3476_v48, %v1253_v16  ;;  %v3492_v16 = vld [vmem:[#allocation25_spill] sm:$0xff]  ;;  %v3499_v52 = vld [vmem:[#allocation32_spill] sm:$0xff] }
 0x177   :  { %v1262_v0 = vmul.f32 %v3477_v41, %v1261_v54  ;;  %v1263_v51 = vmul.f32 %v3478_v2, %v1261_v54  ;;  %v1270_v43 = vmul.f32 %v3479_v1, %v1269_v31  ;;  %v1271_v18 = vmul.f32 %v3480_v60, %v1269_v31  ;;  %v3493_v31 = vld [vmem:[#allocation26_spill] sm:$0xff]  ;;  %v3498_v2 = vld [vmem:[#allocation31_spill] sm:$0xff] }
 0x178   :  { %v1278_v14 = vmul.f32 %v3481_v17, %v1277_v24  ;;  %v1279_v45 = vmul.f32 %v3482_v20, %v1277_v24  ;;  %v1286_v8 = vmul.f32 %v3483_v21, %v1285_v50  ;;  %v1287_v39 = vmul.f32 %v3484_v63, %v1285_v50  ;;  %v3494_v50 = vld [vmem:[#allocation27_spill] sm:$0xff]  ;;  %v3497_v20 = vld [vmem:[#allocation30_spill] sm:$0xff] }
 0x179   :  { %v1294_v57 = vmul.f32 %v3485_v23, %v1293_v27  ;;  %v1295_v3 = vmul.f32 %v3486_v22, %v1293_v27  ;;  %v1302_v47 = vmul.f32 %v3487_v58, %v1301_v44  ;;  %v1303_v38 = vmul.f32 %v3488_v40, %v1301_v44  ;;  %v3495_v44 = vld [vmem:[#allocation28_spill] sm:$0xff]  ;;  %v3496_v22 = vld [vmem:[#allocation29_spill] sm:$0xff]  ;;  %v3502_v23 = vld [vmem:[#allocation35_spill] sm:$0xff] }
 0x17a   :  { %v1309_v15 = vrot.slane %v2963_v6, %v2074_v9  ;;  %v1317_v26 = vrot.slane %v2963_v6, %v2076_v10  ;;  %v1325_v56 = vrot.slane %v2963_v6, %v2078_v11  ;;  %v1333_v7 = vrot.slane %v2963_v6, %v2080_v12  ;;  %v3500_v58 = vld [vmem:[#allocation33_spill] sm:$0xff] }
 0x17b   :  { %v1341_v62 = vrot.slane %v2963_v6, %v2082_v13  ;;  %v1349_v37 = vrot.slane %v2963_v6, %v3336_v35  ;;  %v1357_v49 = vrot.slane %v2963_v6, %v3337_v42  ;;  %v1365_v34 = vrot.slane %v2963_v6, %v3472_v28 }
 0x17c   :  { %v1310_v30 = vmul.f32 %v3489_v32, %v1309_v15  ;;  %v1311_v61 = vmul.f32 %v3490_v5, %v1309_v15  ;;  %v1318_v46 = vmul.f32 %v3491_v4, %v1317_v26  ;;  %v1319_v54 = vmul.f32 %v3492_v16, %v1317_v26  ;;  %v3501_v5 = vld [vmem:[#allocation34_spill] sm:$0xff]  ;;  %v3503_v16 = vld [vmem:[#allocation36_spill] sm:$0xff] }
 0x17d   :  { %v1326_v24 = vmul.f32 %v3493_v31, %v1325_v56  ;;  %v1327_v27 = vmul.f32 %v3494_v50, %v1325_v56  ;;  %v1334_v40 = vmul.f32 %v3495_v44, %v1333_v7  ;;  %v1335_v63 = vmul.f32 %v3496_v22, %v1333_v7 }
 0x17e   :  { %v1342_v60 = vmul.f32 %v3497_v20, %v1341_v62  ;;  %v1343_v48 = vmul.f32 %v3498_v2, %v1341_v62  ;;  %v1350_v32 = vmul.f32 %v3499_v52, %v1349_v37  ;;  %v1351_v15 = vmul.f32 %v3500_v58, %v1349_v37 }
 0x17f   :  { %v1358_v4 = vmul.f32 %v3501_v5, %v1357_v49  ;;  %v1359_v26 = vmul.f32 %v3502_v23, %v1357_v49  ;;  %v1366_v31 = vmul.f32 %v3503_v16, %v1365_v34  ;;  %v1367_v56 = vmul.f32 %v2918_v33, %v1365_v34 }
 0x180   :  { %v1368_v50 = vadd.f32 %v1254_v53, %v1246_v25  ;;  %v1369_v44 = vadd.f32 %v1255_v19, %v1247_v29  ;;  %v1370_v21 = vadd.f32 %v1270_v43, %v1262_v0  ;;  %v1371_v7 = vadd.f32 %v1271_v18, %v1263_v51  ;;  %v3012_v43 = vld [vmem:[%s3125_s6] sm:$0xff] }
 0x181   :  { %v1372_v22 = vadd.f32 %v1286_v8, %v1278_v14  ;;  %v1373_v20 = vadd.f32 %v1287_v39, %v1279_v45  ;;  %v1374_v17 = vadd.f32 %v1302_v47, %v1294_v57  ;;  %v1375_v62 = vadd.f32 %v1303_v38, %v1295_v3 }
 0x182   :  { %v1376_v2 = vadd.f32 %v1318_v46, %v1310_v30  ;;  %v1377_v52 = vadd.f32 %v1319_v54, %v1311_v61  ;;  %v1378_v1 = vadd.f32 %v1334_v40, %v1326_v24  ;;  %v1379_v37 = vadd.f32 %v1335_v63, %v1327_v27  ;;  %v3506_v46 = vld [vmem:[#allocation43_spill] sm:$0xff]  ;;  %v3507_v54 = vld [vmem:[#allocation45_spill] sm:$0xff] }
 0x183   :  { %v1380_v58 = vadd.f32 %v1350_v32, %v1342_v60  ;;  %v1381_v5 = vadd.f32 %v1351_v15, %v1343_v48  ;;  %v1382_v41 = vadd.f32 %v1366_v31, %v1358_v4  ;;  %v1383_v49 = vadd.f32 %v1367_v56, %v1359_v26  ;;  %v3019_v60 = vld [vmem:[%s3125_s6 + $0x8] sm:$0xff]  ;;  %v3508_v24 = vld [vmem:[#allocation11_spill] sm:$0xff]  ;;  %v3510_v15 = vld [vmem:[#allocation16_spill] sm:$0xff]  ;;  %s2011_s6 = smov [#allocation6]  }
 0x184   :  { %v1384_v23 = vadd.f32 %v1370_v21, %v1368_v50  ;;  %v1385_v16 = vadd.f32 %v1371_v7, %v1369_v44  ;;  %v1386_v36 = vadd.f32 %v1374_v17, %v1372_v22  ;;  %v1387_v34 = vadd.f32 %v1375_v62, %v1373_v20  ;;  %v3504_v20 = vld [vmem:[#allocation51_spill] sm:$0xff]  ;;  %v3509_v27 = vld [vmem:[#allocation13_spill] sm:$0xff]  ;;  %v3511_v56 = vld [vmem:[#allocation18_spill] sm:$0xff]  ;;  %s1690_s21 = sshll.u32 %s2011_s6, 4  ;;  %s1691_s21 = int_to_ptr.vmem [resolvable:$true] %s1690_s21 }
 0x185   :  { %v1388_v25 = vadd.f32 %v1378_v1, %v1376_v2  ;;  %v1389_v29 = vadd.f32 %v1379_v37, %v1377_v52  ;;  %v1390_v53 = vadd.f32 %v1382_v41, %v1380_v58  ;;  %v1391_v19 = vadd.f32 %v1383_v49, %v1381_v5  ;;  %v3512_v62 = vld [vmem:[#allocation20_spill] sm:$0xff]  ;;  %s1988_s22 = scalar_lea.vmem %s1691_s21, 32  ;;  %p1993_p1 = scmp.lt.s32.totalorder %s1691_s21, %s1691_s21 }
 0x186   :  { %v1392_v0 = vadd.f32 %v1386_v36, %v1384_v23  ;;  %v1393_v51 = vadd.f32 %v1387_v34, %v1385_v16  ;;  %v1219_v48 = vmul.f32 %v3012_v43, %v2941_v59  ;;  %v1220_v52 = vmul.f32 %v3019_v60, %v2963_v6  ;;  %v3505_v59 = vld [vmem:[#allocation52_spill] sm:$0xff]  ;;  %p1989_p0 = scmp.ne.s32.totalorder %s1691_s21, %s1988_s22  ;;  %p1994_p2 = scmp.lt.s32.totalorder %s1988_s22, %s1988_s22 }
 0x187   :  { %v1394_v41 = vadd.f32 %v1390_v53, %v1388_v25  ;;  %v1395_v2 = vadd.f32 %v1391_v19, %v1389_v29 }
 0x188   :  { %v1221_v36 = vsel %vm71_vm0, %v1219_v48, 0.0  ;;  %v1222_v1 = vsel %vm71_vm0, %v1220_v52, 0.0  ;;  %p1995_p3 = por %p1994_p2, %p1993_p1 }
 0x189   :  { %v1396_v18 = vadd.f32 %v1394_v41, %v1392_v0  ;;  %v1397_v17 = vadd.f32 %v1395_v2, %v1393_v51  ;;  %v1223_v14 = vadd.f32 %v1222_v1, %v1221_v36  ;;  %v3513_v0 = vld [vmem:[#allocation22_spill] sm:$0xff]  ;;  %v3514_v51 = vld [vmem:[#allocation24_spill] sm:$0xff] }
 0x18a   :  { %v3516_v41 = vld [vmem:[#allocation28_spill] sm:$0xff]  ;;  %v3517_v2 = vld [vmem:[#allocation30_spill] sm:$0xff]  ;;  %p1996_p4 = pnand %p1995_p3, %p1989_p0 }
 0x18b   :  { %v1398_v45 = vadd.f32 %v1396_v18, %v3504_v20  ;;  %v1399_v21 = vadd.f32 %v1397_v17, %v3505_v59  ;;  %v1224_v8 = vrot.slane %v1223_v14, 4  ;;  %v3519_v18 = vld [vmem:[#allocation34_spill] sm:$0xff]  ;;  %v3520_v17 = vld [vmem:[#allocation36_spill] sm:$0xff] }
 0x18d   :  { %1978 = vtanh.f32 %v1398_v45  ;;  %v1225_v63 = vadd.f32 %v1224_v8, %v1223_v14 }
 0x18e   :  { %1980 = vtanh.f32 %v1399_v21 }
 0x18f   :  { %v1226_v39 = vrot.slane %v1225_v63, 2 }
 0x191   :  { %v1227_v23 = vadd.f32 %v1226_v39, %v1225_v63 }
 0x193   :  { %v1228_v6 = vrot.slane %v1227_v23, 1 }
 0x195   :  { %v1229_v57 = vadd.f32 %v1228_v6, %v1227_v23  ;;  %v3521_v6 = vld [vmem:[#allocation10_spill] sm:$0xff] }
 0x197   :  { %1230 = vst.msk [vmem:[#allocation4 + $0x5] sm:$0x1] %vm314_vm1, %v1229_v57 }
 0x19a   :  { %v3028_v22 = vpop.eup %1978 }
 0x19b   :  { %v1428_v3 = vrot.slane %v3028_v22, %v2074_v9  ;;  %v1436_v58 = vrot.slane %v3028_v22, %v2076_v10  ;;  %v1444_v47 = vrot.slane %v3028_v22, %v2078_v11  ;;  %v1452_v40 = vrot.slane %v3028_v22, %v2080_v12  ;;  %v3038_v38 = vpop.eup %1980 }
 0x19c   :  { %v1460_v32 = vrot.slane %v3028_v22, %v2082_v13  ;;  %v1468_v30 = vrot.slane %v3028_v22, %v3336_v35  ;;  %v1476_v5 = vrot.slane %v3028_v22, %v3337_v42  ;;  %v1484_v61 = vrot.slane %v3028_v22, %v3472_v28 }
 0x19d   :  { %v1429_v4 = vmul.f32 %v1428_v3, %v3473_v55  ;;  %v1437_v16 = vmul.f32 %v3506_v46, %v1436_v58  ;;  %v1445_v31 = vmul.f32 %v3507_v54, %v1444_v47  ;;  %v1453_v50 = vmul.f32 %v3508_v24, %v1452_v40  ;;  %v3522_v46 = vld [vmem:[#allocation44_spill] sm:$0xff] }
 0x19e   :  { %v1461_v44 = vmul.f32 %v3509_v27, %v1460_v32  ;;  %v1469_v26 = vmul.f32 %v3510_v15, %v1468_v30  ;;  %v1477_v7 = vmul.f32 %v3511_v56, %v1476_v5  ;;  %v1485_v37 = vmul.f32 %v3512_v62, %v1484_v61  ;;  %v3523_v15 = vld [vmem:[#allocation46_spill] sm:$0xff]  ;;  %v3524_v62 = vld [vmem:[#allocation12_spill] sm:$0xff] }
 0x19f   :  { %v1492_v49 = vrot.slane %v3038_v38, %v2074_v9  ;;  %v1500_v55 = vrot.slane %v3038_v38, %v2076_v10  ;;  %v1508_v34 = vrot.slane %v3038_v38, %v2078_v11  ;;  %v1516_v25 = vrot.slane %v3038_v38, %v2080_v12  ;;  %v3515_v11 = vld [vmem:[#allocation26_spill] sm:$0xff] }
 0x1a0   :  { %v1524_v29 = vrot.slane %v3038_v38, %v2082_v13  ;;  %v1532_v53 = vrot.slane %v3038_v38, %v3336_v35  ;;  %v1540_v19 = vrot.slane %v3038_v38, %v3337_v42  ;;  %v1548_v9 = vrot.slane %v3038_v38, %v3472_v28  ;;  %v3518_v13 = vld [vmem:[#allocation32_spill] sm:$0xff] }
 0x1a1   :  { %v1493_v10 = vmul.f32 %v3513_v0, %v1492_v49  ;;  %v1501_v48 = vmul.f32 %v3514_v51, %v1500_v55  ;;  %v1509_v52 = vmul.f32 %v3515_v11, %v1508_v34  ;;  %v1517_v12 = vmul.f32 %v3516_v41, %v1516_v25  ;;  %v3530_v11 = vld [vmem:[#allocation25_spill] sm:$0xff] }
 0x1a2   :  { %v1525_v36 = vmul.f32 %v3517_v2, %v1524_v29  ;;  %v1533_v1 = vmul.f32 %v3518_v13, %v1532_v53  ;;  %v1541_v35 = vmul.f32 %v3519_v18, %v1540_v19  ;;  %v1549_v14 = vmul.f32 %v3520_v17, %v1548_v9  ;;  %v3533_v2 = vld [vmem:[#allocation31_spill] sm:$0xff] }
 0x1a3   :  { %v1551_v42 = vadd.f32 %v1437_v16, %v1429_v4  ;;  %v1553_v20 = vadd.f32 %v1453_v50, %v1445_v31  ;;  %v1555_v45 = vadd.f32 %v1469_v26, %v1461_v44  ;;  %v1557_v28 = vadd.f32 %v1485_v37, %v1477_v7  ;;  %v3525_v16 = vld [vmem:[#allocation15_spill] sm:$0xff]  ;;  %v3526_v50 = vld [vmem:[#allocation17_spill] sm:$0xff] }
 0x1a4   :  { %v1559_v59 = vadd.f32 %v1501_v48, %v1493_v10  ;;  %v1561_v21 = vadd.f32 %v1517_v12, %v1509_v52  ;;  %v1563_v8 = vadd.f32 %v1533_v1, %v1525_v36  ;;  %v1565_v63 = vadd.f32 %v1549_v14, %v1541_v35  ;;  %v3527_v26 = vld [vmem:[#allocation19_spill] sm:$0xff]  ;;  %v3528_v10 = vld [vmem:[#allocation21_spill] sm:$0xff] }
 0x1a5   :  { %v1567_v39 = vadd.f32 %v1553_v20, %v1551_v42  ;;  %v1569_v23 = vadd.f32 %v1557_v28, %v1555_v45  ;;  %v1430_v57 = vmul.f32 %v1428_v3, %v3521_v6  ;;  %v1438_v54 = vmul.f32 %v3522_v46, %v1436_v58  ;;  %v3529_v48 = vld [vmem:[#allocation23_spill] sm:$0xff]  ;;  %v3532_v12 = vld [vmem:[#allocation29_spill] sm:$0xff] }
 0x1a6   :  { %v1571_v24 = vadd.f32 %v1561_v21, %v1559_v59  ;;  %v1573_v27 = vadd.f32 %v1565_v63, %v1563_v8  ;;  %v1446_v56 = vmul.f32 %v3523_v15, %v1444_v47  ;;  %v1454_v0 = vmul.f32 %v3524_v62, %v1452_v40  ;;  %v3531_v52 = vld [vmem:[#allocation27_spill] sm:$0xff]  ;;  %v3534_v36 = vld [vmem:[#allocation33_spill] sm:$0xff] }
 0x1a7   :  { %v1575_v4 = vadd.f32 %v1569_v23, %v1567_v39  ;;  %v1462_v31 = vmul.f32 %v3525_v16, %v1460_v32  ;;  %v1470_v44 = vmul.f32 %v3526_v50, %v1468_v30  ;;  %v1478_v7 = vmul.f32 %v3527_v26, %v1476_v5  ;;  %v3535_v1 = vld [vmem:[#allocation35_spill] sm:$0xff]  ;;  %v3536_v14 = vld [vmem:[#allocation53_spill] sm:$0xff]  ;;  %v3537_v23 = vld [vmem:[#allocation54_spill] sm:$0xff] }
 0x1a8   :  { %v1577_v37 = vadd.f32 %v1573_v27, %v1571_v24  ;;  %v1486_v51 = vmul.f32 %v3528_v10, %v1484_v61  ;;  %v1494_v3 = vmul.f32 %v3529_v48, %v1492_v49  ;;  %v1502_v58 = vmul.f32 %v3530_v11, %v1500_v55 }
 0x1a9   :  { %v1510_v41 = vmul.f32 %v3531_v52, %v1508_v34  ;;  %v1518_v47 = vmul.f32 %v3532_v12, %v1516_v25  ;;  %v1526_v40 = vmul.f32 %v3533_v2, %v1524_v29  ;;  %v1534_v13 = vmul.f32 %v3534_v36, %v1532_v53 }
 0x1aa   :  { %v1579_v32 = vadd.f32 %v1577_v37, %v1575_v4  ;;  %v1542_v30 = vmul.f32 %v3535_v1, %v1540_v19  ;;  %v1550_v5 = vmul.f32 %v2918_v33, %v1548_v9  ;;  %v1552_v18 = vadd.f32 %v1438_v54, %v1430_v57 }
 0x1ab   :  { %v1554_v35 = vadd.f32 %v1454_v0, %v1446_v56  ;;  %v1556_v61 = vadd.f32 %v1470_v44, %v1462_v31  ;;  %v1558_v17 = vadd.f32 %v1486_v51, %v1478_v7  ;;  %v1560_v49 = vadd.f32 %v1502_v58, %v1494_v3 }
 0x1ac   :  { %v1581_v55 = vadd.f32 %v1579_v32, %v3536_v14  ;;  %v1562_v42 = vadd.f32 %v1518_v47, %v1510_v41  ;;  %v1564_v34 = vadd.f32 %v1534_v13, %v1526_v40  ;;  %v1566_v20 = vadd.f32 %v1550_v5, %v1542_v30 }
 0x1ad   :  { %v1568_v25 = vadd.f32 %v1554_v35, %v1552_v18  ;;  %v1570_v45 = vadd.f32 %v1558_v17, %v1556_v61  ;;  %v1402_v29 = vmul.f32 %v3012_v43, %v3028_v22  ;;  %v1403_v53 = vmul.f32 %v3019_v60, %v3038_v38 }
 0x1ae   :  { %1982 = vtanh.f32 %v1581_v55  ;;  %v1572_v33 = vadd.f32 %v1562_v42, %v1560_v49  ;;  %v1574_v19 = vadd.f32 %v1566_v20, %v1564_v34  ;;  %v3538_v37 = vmov 0  }
 0x1af   :  { %v1576_v9 = vadd.f32 %v1570_v45, %v1568_v25  ;;  %v1404_v28 = vsel %vm71_vm0, %v1402_v29, 0.0  ;;  %v1405_v59 = vsel %vm71_vm0, %v1403_v53, 0.0 }
 0x1b0   :  { %v1578_v21 = vadd.f32 %v1574_v19, %v1572_v33  ;;  %v1406_v8 = vadd.f32 %v1405_v59, %v1404_v28 }
 0x1b2   :  { %v1580_v63 = vadd.f32 %v1578_v21, %v1576_v9  ;;  %v1407_v39 = vrot.slane %v1406_v8, 4 }
 0x1b4   :  { %v1582_v6 = vadd.f32 %v1580_v63, %v3537_v23  ;;  %v1408_v57 = vadd.f32 %v1407_v39, %v1406_v8 }
 0x1b6   :  { %1984 = vtanh.f32 %v1582_v6  ;;  %v1409_v22 = vrot.slane %v1408_v57, 2 }
 0x1b8   :  { %v1410_v46 = vadd.f32 %v1409_v22, %v1408_v57 }
 0x1ba   :  { %v1411_v54 = vrot.slane %v1410_v46, 1 }
 0x1bb   :  { %v1983_v38 = vpop.eup %1982 }
 0x1bc   :  { %1602 = vxpose.xlu0.b32.start [1/2] (short) (narrow) %v1983_v38, 8  ;;  %1597 = vst.msk [vmem:[#allocation2] sm:$0xff] %vm71_vm0, %v1983_v38  ;;  %v1412_v24 = vadd.f32 %v1411_v54, %v1410_v46  ;;  %v1585_v27 = vmul.f32 %v3012_v43, %v1983_v38 }
 0x1be   :  { %1413 = vst.msk [vmem:[#allocation4 + $0x6] sm:$0x1] %vm314_vm1, %v1412_v24  ;;  %v1587_v62 = vsel %vm71_vm0, %v1585_v27, 0.0 }
 0x1c3   :  { %v1985_v15 = vpop.eup %1984 }
 0x1c4   :  { %1603 = vxpose.xlu0.b32.end [2/2] (short) (narrow) %v1985_v15, 8  ;;  %1598 = vst.msk [vmem:[#allocation2 + $0x8] sm:$0xff] %vm71_vm0, %v1985_v15  ;;  %v1586_v56 = vmul.f32 %v3019_v60, %v1985_v15 }
 0x1c6   :  { %v1588_v0 = vsel %vm71_vm0, %v1586_v56, 0.0 }
 0x1c7   :  { %v1589_v4 = vadd.f32 %v1588_v0, %v1587_v62 }
 0x1c9   :  { %v1590_v16 = vrot.slane %v1589_v4, 4 }
 0x1cb   :  { %v1591_v31 = vadd.f32 %v1590_v16, %v1589_v4 }
 0x1cd   :  { %v1592_v50 = vrot.slane %v1591_v31, 2 }
 0x1cf   :  { %v1593_v44 = vadd.f32 %v1592_v50, %v1591_v31 }
 0x1d1   :  { %v1594_v26 = vrot.slane %v1593_v44, 1 }
 0x1d3   :  { %v1595_v7 = vadd.f32 %v1594_v26, %v1593_v44 }
 0x1d5   :  { %1596 = vst.msk [vmem:[#allocation4 + $0x7] sm:$0x1] %vm314_vm1, %v1595_v7 }
 0x1dc   :  { %v1636_v43 = vld [vmem:[#allocation4] sm:$0xff] }
 0x1dd   :  { %1637 = vxpose.xlu1.b32.start.end [1/1] (short) (narrow) %v1636_v43, 8 }
 0x1ed   :  { %1953 = vset.pattern.permute.xlu0 %v3538_v37 }
 0x23c   :  { %v1618_v60 = vpop.trf.xlu0 }
 0x23d   :  { %1635 = vst.msk [vmem:[#allocation6] sm:$0x3] %vm1634_vm2, %v1618_v60 }
 0x23e   :  { %1999 = shalt.err (!%p1996_p4)
}
 0x23f   :  { %1693 = dma.vmem_to_hbm [thread:$0]  %s1691_s21, 32, %s3128_s9, [#allocation7]   ;;  %v1677_v10 = vpop.permute.xlu1 %1676  ;;  %vm1680_vm3 = vcmask 58368  }
 0x259   :  { %v1653_v51 = vpop.trf.xlu1 }
 0x25a   :  { %v1679_v48 = vadd.f32 %v1677_v10, %v1653_v51 }
 0x25c   :  { %1681 = vst.msk [vmem:[%s3127_s8] sm:$0x3] %vm1680_vm3, %v1679_v48 }
 0x25d   :  { %2008 = dma.done.wait [#allocation7], 32  }
 0x25e   :  { %2009 = vsyncadd [#allocation7], 4294967264 }
 0x25f   :  { %1699 = vsyncpa [#allocation7], 1 }

</bundles_post_ra>
